<compile_context>
chip_gen: v7x
topology: tpu7x:2x2x1
jax: 0.10.0
libtpu: 0.0.40
codegen_flags: <defaults>
</compile_context>

<pallas_src>
import functools
import math

import jax
import jax.numpy as jnp
import numpy as np
from jax.experimental import pallas as pl
from jax.experimental.pallas import tpu as pltpu

# -----------------------------------------------------------------------------
# Synthetic Darknet cfg (mirrors parse_model_cfg output structure)
# -----------------------------------------------------------------------------
MODULE_DEFS = [
    {'type': 'net', 'channels': 4},
    {'type': 'convolutional', 'bn': 1, 'filters': 8,  'size': 3, 'stride': 1, 'pad': 1, 'activation': 'leaky'},   # 0
    {'type': 'convolutional', 'bn': 1, 'filters': 16, 'size': 3, 'stride': 2, 'pad': 1, 'activation': 'leaky'},   # 1
    {'type': 'convolutional', 'bn': 1, 'filters': 16, 'size': 1, 'stride': 1, 'pad': 0, 'activation': 'leaky'},   # 2
    {'type': 'shortcut', 'from': -2},                                                                             # 3
    {'type': 'convolutional', 'bn': 1, 'filters': 32, 'size': 3, 'stride': 2, 'pad': 1, 'activation': 'leaky'},   # 4
    {'type': 'convolutional', 'bn': 0, 'filters': 21, 'size': 1, 'stride': 1, 'pad': 0, 'activation': 'linear'},  # 5
    {'type': 'yolo', 'anchors': [[10., 13.], [16., 30.], [33., 23.]], 'classes': 2},                              # 6
    {'type': 'route', 'layers': [4]},                                                                             # 7
    {'type': 'upsample', 'stride': 2},                                                                            # 8
    {'type': 'route', 'layers': [8, 3]},                                                                          # 9
    {'type': 'maxpool', 'size': 2, 'stride': 1},                                                                  # 10
    {'type': 'convolutional', 'bn': 0, 'filters': 21, 'size': 1, 'stride': 1, 'pad': 0, 'activation': 'linear'},  # 11
    {'type': 'yolo', 'anchors': [[5., 6.], [8., 10.], [12., 14.]], 'classes': 2},                                 # 12
]

_PARALLEL = pltpu.CompilerParams(dimension_semantics=("parallel",))


def _round_up(n, m):
    return ((n + m - 1) // m) * m


# -----------------------------------------------------------------------------
# Pallas kernels
# -----------------------------------------------------------------------------
def _conv_kernel(*refs, taps, oh, ow, leaky, has_res):
    """Fused conv (+BN shift) (+LeakyReLU) (+residual add) for one image.

    x_ref : (1, S*S, HP, WP, CinP)  phase-separated, zero-padded activation
    w_ref : (KH*KW, CinP, CoutP)    per-tap weights, BN scale folded in
    b_ref : (1, CoutP)              BN shift / conv bias
    r_ref : (1, oh*ow, CoutP)       optional residual (fused shortcut)
    o_ref : (1, oh*ow, CoutP)
    """
    if has_res:
        x_ref, w_ref, b_ref, r_ref, o_ref = refs
    else:
        x_ref, w_ref, b_ref, o_ref = refs
    cin = x_ref.shape[-1]
    coutp = o_ref.shape[-1]
    acc = jnp.zeros((oh * ow, coutp), jnp.float32)
    for t, (ph, dh, dw) in enumerate(taps):
        xt = x_ref[0, ph, pl.ds(dh, oh), pl.ds(dw, ow), :]          # (oh, ow, cin)
        acc = acc + jnp.dot(xt.reshape(oh * ow, cin), w_ref[t],
                            preferred_element_type=jnp.float32)
    y = acc + b_ref[...]
    if leaky:
        y = jnp.where(y > 0.0, y, 0.1 * y)
    if has_res:
        y = y + r_ref[0]
    o_ref[0] = y


def _yolo_head_kernel(x_ref, w_ref, b_ref, sigmul_ref, expmul_ref, add_ref,
                      raw_ref, dec_ref, *, oh, ow, pre_pool):
    """Fused (optional 2x2/s1 maxpool) + 1x1 conv + bias + YOLO decode.

    x_ref      : (1, oh[+1], ow[+1], CinP)   zero-padded NHWC activation
    w_ref      : (1, CinP, CoutP)            1x1 conv weights
    b_ref      : (1, CoutP)                  conv bias
    sigmul_ref : (1, CoutP)                  per-lane sigmoid multiplier
    expmul_ref : (1, CoutP)                  per-lane exp multiplier (anchors)
    add_ref    : (oh*ow, CoutP)              per-(pixel,lane) additive grid term
    raw_ref    : (1, oh*ow, CoutP)           raw logits  -> p
    dec_ref    : (1, oh*ow, CoutP)           decoded io
    """
    cin = x_ref.shape[-1]
    if pre_pool:
        # ZeroPad2d((0,1,0,1)) + MaxPool2d(k=2, s=1): max of 4 shifted windows.
        x00 = x_ref[0, pl.ds(0, oh), pl.ds(0, ow), :]
        x01 = x_ref[0, pl.ds(0, oh), pl.ds(1, ow), :]
        x10 = x_ref[0, pl.ds(1, oh), pl.ds(0, ow), :]
        x11 = x_ref[0, pl.ds(1, oh), pl.ds(1, ow), :]
        xin = jnp.maximum(jnp.maximum(x00, x01), jnp.maximum(x10, x11))
    else:
        xin = x_ref[0]
    y = jnp.dot(xin.reshape(oh * ow, cin), w_ref[0],
                preferred_element_type=jnp.float32) + b_ref[...]
    raw_ref[0] = y
    e = jnp.exp(y)                                      # single EUP pass
    sig = 1.0 - pl.reciprocal(1.0 + e, approx=True)     # sigmoid(y), overflow-safe
    dec_ref[0] = sigmul_ref[...] * sig + expmul_ref[...] * e + add_ref[...]


def _maxpool_kernel(x_ref, o_ref):
    # Fallback standalone maxpool (not used with this cfg: folded into the head conv).
    h, w = o_ref.shape[1], o_ref.shape[2]
    x00 = x_ref[0, pl.ds(0, h), pl.ds(0, w), :]
    x01 = x_ref[0, pl.ds(0, h), pl.ds(1, w), :]
    x10 = x_ref[0, pl.ds(1, h), pl.ds(0, w), :]
    x11 = x_ref[0, pl.ds(1, h), pl.ds(1, w), :]
    o_ref[0] = jnp.maximum(jnp.maximum(x00, x01), jnp.maximum(x10, x11))


# -----------------------------------------------------------------------------
# Layer wrappers
# -----------------------------------------------------------------------------
def conv_layer(p, x_nhwc, mdef, residual_raw=None):
    k = mdef['size']
    s = mdef['stride']
    pad = (k - 1) // 2 if mdef['pad'] else 0
    leaky = mdef['activation'] == 'leaky'
    cout = mdef['filters']

    N, H, W, C = x_nhwc.shape
    cin_p = p['w'].shape[1]
    coutp = p['w'].shape[2]
    if C < cin_p:  # pad input channels once to the weight's contraction width
        x_nhwc = jnp.pad(x_nhwc, ((0, 0), (0, 0), (0, 0), (0, cin_p - C)))
        C = cin_p

    OH = (H + 2 * pad - k) // s + 1
    OW = (W + 2 * pad - k) // s + 1
    OWp = max(_round_up(OW, 8), 8)          # sublane-aligned working width
    M = OH * OWp

    # Zero-pad so every tap's (OH, OWp) window stays in bounds, then split the
    # stride phases into a leading dim (space-to-depth) so the in-kernel tap
    # slices are contiguous and stride-free.
    dmax = (k - 1) // s
    hreq, wreq = dmax + OH, dmax + OWp
    hpad = max(s * hreq, -(-(H + 2 * pad) // s) * s)
    wpad = max(s * wreq, -(-(W + 2 * pad) // s) * s)
    xp = jnp.pad(x_nhwc, ((0, 0), (pad, hpad - H - pad), (pad, wpad - W - pad), (0, 0)))
    xk = xp.reshape(N, hpad // s, s, wpad // s, s, C)
    xk = xk.transpose(0, 2, 4, 1, 3, 5).reshape(N, s * s, hpad // s, wpad // s, C)

    # tap (kh, kw) -> (phase, row offset, col offset) in the phase planes
    taps = tuple(((kh % s) * s + (kw % s), kh // s, kw // s)
                 for kh in range(k) for kw in range(k))

    fused = (residual_raw is not None
             and tuple(residual_raw.shape) == (N, M, coutp))
    args = [xk, p['w'], p['shift']]
    in_specs = [
        pl.BlockSpec((1,) + xk.shape[1:], lambda n: (n, 0, 0, 0, 0)),
        pl.BlockSpec(p['w'].shape, lambda n: (0, 0, 0)),
        pl.BlockSpec(p['shift'].shape, lambda n: (0, 0)),
    ]
    if fused:
        args.append(residual_raw)
        in_specs.append(pl.BlockSpec((1, M, coutp), lambda n: (n, 0, 0)))

    raw = pl.pallas_call(
        functools.partial(_conv_kernel, taps=taps, oh=OH, ow=OWp,
                          leaky=leaky, has_res=fused),
        grid=(N,),
        in_specs=in_specs,
        out_specs=pl.BlockSpec((1, M, coutp), lambda n: (n, 0, 0)),
        out_shape=jax.ShapeDtypeStruct((N, M, coutp), jnp.float32),
        compiler_params=_PARALLEL,
    )(*args)

    y = raw.reshape(N, OH, OWp, coutp)[:, :, :OW, :cout]
    return y, raw, fused


def yolo_head_layer(p, x_nhwc, conv_mdef, yolo_mdef, img_size, pre_pool=False):
    """One pallas_call: (optional maxpool) + 1x1 conv + bias + YOLO decode.

    Returns (io, p_out) matching the PyTorch eval path:
      io   : (bs, na*ny*nx, no)   decoded boxes
      p_out: (bs, na, ny, nx, no) raw logits
    """
    assert (conv_mdef['size'] == 1 and conv_mdef['stride'] == 1
            and conv_mdef['bn'] == 0 and conv_mdef['activation'] == 'linear')
    N, H, W, C = x_nhwc.shape
    cin_p = p['w'].shape[1]
    coutp = p['w'].shape[2]

    OH, OW = H, W            # 1x1/s1 conv; maxpool(k2,s1, zero-pad (0,1,0,1)) keeps H,W
    OWp = max(_round_up(OW, 8), 8)
    M = OH * OWp
    e = 1 if pre_pool else 0
    xp = jnp.pad(x_nhwc,
                 ((0, 0), (0, OH + e - H), (0, OWp + e - W), (0, cin_p - C)))

    anchors = np.asarray(yolo_mdef['anchors'], np.float32)
    na, nc = anchors.shape[0], yolo_mdef['classes']
    no = nc + 5
    stride = float(max(img_size)) / float(max(OH, OW))

    # arc='default' decode as   io = sigmul*sigmoid(y) + expmul*exp(y) + add
    # with compile-time constants (k = lane % no, valid lanes = [0, na*no)):
    #   k in {0,1}: (sigmoid + grid_{x,y}) * stride -> sigmul=stride, add=grid*stride
    #   k in {2,3}: exp * anchor_vec * stride       -> expmul=anchors[a, k-2]
    #   k >= 4   : sigmoid                           -> sigmul=1
    cidx = np.arange(coutp)
    k_of_c = cidx % no
    valid = (cidx < na * no).astype(np.float32)
    sigmul = np.where(k_of_c < 2, stride, np.where(k_of_c < 4, 0.0, 1.0)) * valid
    expmul = np.zeros((coutp,), np.float32)
    for a in range(na):
        expmul[a * no + 2] = anchors[a, 0]
        expmul[a * no + 3] = anchors[a, 1]
    oy = np.arange(OH, dtype=np.float32)[:, None, None]
    ox = np.arange(OWp, dtype=np.float32)[None, :, None]
    add = (ox * (k_of_c == 0) + oy * (k_of_c == 1)) * stride * valid
    add = np.asarray(add, np.float32).reshape(M, coutp)

    sigmul = jnp.asarray(sigmul.reshape(1, coutp), jnp.float32)
    expmul = jnp.asarray(expmul.reshape(1, coutp), jnp.float32)
    add = jnp.asarray(add, jnp.float32)

    raw, dec = pl.pallas_call(
        functools.partial(_yolo_head_kernel, oh=OH, ow=OWp, pre_pool=pre_pool),
        grid=(N,),
        in_specs=[
            pl.BlockSpec((1,) + xp.shape[1:], lambda n: (n, 0, 0, 0)),
            pl.BlockSpec(p['w'].shape, lambda n: (0, 0, 0)),
            pl.BlockSpec(p['shift'].shape, lambda n: (0, 0)),
            pl.BlockSpec((1, coutp), lambda n: (0, 0)),
            pl.BlockSpec((1, coutp), lambda n: (0, 0)),
            pl.BlockSpec((M, coutp), lambda n: (0, 0)),
        ],
        out_specs=(pl.BlockSpec((1, M, coutp), lambda n: (n, 0, 0)),
                   pl.BlockSpec((1, M, coutp), lambda n: (n, 0, 0))),
        out_shape=(jax.ShapeDtypeStruct((N, M, coutp), jnp.float32),
                   jax.ShapeDtypeStruct((N, M, coutp), jnp.float32)),
        compiler_params=_PARALLEL,
    )(xp, p['w'], p['shift'], sigmul, expmul, add)

    def to5d(t):
        return t.reshape(N, OH, OWp, coutp)[:, :, :OW, :na * no] \
                .reshape(N, OH, OW, na, no)

    p_out = jnp.transpose(to5d(raw), (0, 3, 1, 2, 4))                   # (bs,na,ny,nx,no)
    io = jnp.transpose(to5d(dec), (0, 3, 1, 2, 4)).reshape(N, -1, no)   # (bs,na*ny*nx,no)
    return io, p_out


def maxpool_2x2_s1(x_nhwc):
    # Fallback (not hit with this cfg): ZeroPad2d((0,1,0,1)) + MaxPool2d(k=2, s=1).
    N, H, W, C = x_nhwc.shape
    xp = jnp.pad(x_nhwc, ((0, 0), (0, 1), (0, 1), (0, 0)))
    return pl.pallas_call(
        _maxpool_kernel,
        grid=(N,),
        in_specs=[pl.BlockSpec((1, H + 1, W + 1, C), lambda n: (n, 0, 0, 0))],
        out_specs=pl.BlockSpec((1, H, W, C), lambda n: (n, 0, 0, 0)),
        out_shape=jax.ShapeDtypeStruct((N, H, W, C), jnp.float32),
        compiler_params=_PARALLEL,
    )(xp)


# -----------------------------------------------------------------------------
# Parameter init (deterministic, mirrors create_modules bookkeeping)
# -----------------------------------------------------------------------------
def init_params(key):
    params = []
    out_filters = [MODULE_DEFS[0]['channels']]
    defs = MODULE_DEFS[1:]
    for i, mdef in enumerate(defs):
        p = None
        filters = out_filters[-1]
        t = mdef['type']
        if t == 'convolutional':
            cin = out_filters[-1]
            filters = mdef['filters']
            k = mdef['size']
            key, k_w, k_b, k_g, k_m = jax.random.split(key, 5)
            w = jax.random.normal(k_w, (filters, cin, k, k), jnp.float32) * (
                0.3 / math.sqrt(cin * k * k))
            if mdef['bn']:
                # eval-mode BatchNorm (running stats, eps=1e-5) folded into a
                # per-channel scale (-> weights) and shift (-> kernel epilogue)
                gamma = 1.0 + 0.1 * jax.random.normal(k_g, (filters,), jnp.float32)
                beta = 0.1 * jax.random.normal(k_b, (filters,), jnp.float32)
                rmean = 0.05 * jax.random.normal(k_m, (filters,), jnp.float32)
                rvar = jnp.ones((filters,), jnp.float32)
                scale = gamma / jnp.sqrt(rvar + 1e-5)
                shift = beta - rmean * scale
            else:
                bias = 0.1 * jax.random.normal(k_b, (filters,), jnp.float32)
                # YOLO-head bias adjustment from create_modules (arc='default': b=[-5,-5])
                if i + 1 < len(defs) and defs[i + 1]['type'] == 'yolo':
                    na = len(defs[i + 1]['anchors'])
                    no_ = filters // na
                    b2 = bias.reshape(na, no_)
                    b2 = b2.at[:, 4].add(-5.0 - jnp.mean(b2[:, 4]))
                    b2 = b2.at[:, 5:].add(-5.0 - jnp.mean(b2[:, 5:]))
                    bias = b2.reshape(-1)
                scale = jnp.ones((filters,), jnp.float32)
                shift = bias
            cin_p = _round_up(cin, 8)
            coutp = _round_up(filters, 128)
            # (Cout, Cin, KH, KW) -> (KH*KW, Cin, Cout): BN scale folded in,
            # padded ONCE to contraction-/lane-friendly shapes.
            w_taps = jnp.transpose(w, (2, 3, 1, 0)).reshape(k * k, cin, filters)
            w_taps = w_taps * scale[None, None, :]
            w_taps = jnp.pad(w_taps, ((0, 0), (0, cin_p - cin), (0, coutp - filters)))
            shift_p = jnp.pad(shift.reshape(1, filters), ((0, 0), (0, coutp - filters)))
            p = {'w': w_taps, 'shift': shift_p}
        elif t == 'route':
            filters = sum(out_filters[l + 1 if l > 0 else l] for l in mdef['layers'])
        elif t == 'shortcut':
            filters = out_filters[mdef['from']]
        params.append(p)
        out_filters.append(filters)
    return params


# -----------------------------------------------------------------------------
# Darknet forward (eval-mode semantics)
# -----------------------------------------------------------------------------
def darknet_forward(params, x_nchw):
    img_size = x_nchw.shape[-2:]
    defs = MODULE_DEFS[1:]
    x = jnp.transpose(x_nchw, (0, 2, 3, 1))       # single NCHW->NHWC relayout
    output = []
    layer_outputs = []        # NHWC per layer (only route/shortcut sources matter)
    raw_outputs = []          # (N, OH*OWp, CoutP) lane-dense conv outputs (or None)
    fused_done = set()        # layer indices whose work was folded into an earlier kernel
    pre_pool = False          # maxpool folded into the upcoming YOLO-head conv
    for i, mdef in enumerate(defs):
        t = mdef['type']
        raw = None
        if i in fused_done:
            pass  # shortcut add / yolo decode already produced by a fused kernel
        elif t == 'convolutional':
            nxt = defs[i + 1]['type'] if i + 1 < len(defs) else None
            if nxt == 'yolo':
                io_p = yolo_head_layer(params[i], x, mdef, defs[i + 1], img_size,
                                       pre_pool=pre_pool)
                output.append(io_p)
                fused_done.add(i + 1)
                pre_pool = False
                # x left unchanged: YOLO-head conv outputs are never routed in this cfg.
            else:
                res = None
                if nxt == 'shortcut':
                    frm = defs[i + 1]['from']
                    src = i + 1 + frm if frm < 0 else frm
                    if 0 <= src < len(raw_outputs) and raw_outputs[src] is not None:
                        res = raw_outputs[src]
                x, raw, fused = conv_layer(params[i], x, mdef, res)
                if fused:
                    fused_done.add(i + 1)
        elif t == 'upsample':
            f = mdef['stride']
            x = jnp.repeat(jnp.repeat(x, f, axis=1), f, axis=2)    # nearest
        elif t == 'maxpool':
            if (mdef['size'] == 2 and mdef['stride'] == 1 and i + 2 < len(defs)
                    and defs[i + 1]['type'] == 'convolutional'
                    and defs[i + 1]['size'] == 1
                    and defs[i + 2]['type'] == 'yolo'):
                # Folded into the next conv's kernel (maxpool outputs are never
                # routed in this cfg, so layer_outputs keeps the un-pooled x).
                pre_pool = True
            else:
                x = maxpool_2x2_s1(x)
        elif t == 'route':
            layers = mdef['layers']
            if len(layers) == 1:
                x = layer_outputs[layers[0]]
            else:
                x = jnp.concatenate([layer_outputs[l] for l in layers], axis=-1)
        elif t == 'shortcut':
            # only reached when the add was NOT fused into the preceding conv
            frm = mdef['from']
            src = i + frm if frm < 0 else frm
            x = x + layer_outputs[src]
        elif t == 'yolo':
            # TODO(synk): standalone yolo (not preceded by a linear 1x1 conv) is
            # never produced by Darknet cfgs; only the fused conv+decode path exists.
            raise NotImplementedError("standalone yolo layer")
        layer_outputs.append(x)
        raw_outputs.append(raw)
    io, p = zip(*output)
    return jnp.concatenate(io, axis=1), p


if __name__ == "__main__":
    key = jax.random.PRNGKey(0)
    kp, kx = jax.random.split(key)
    params = init_params(kp)
    x = jax.random.normal(kx, (2, 4, 16, 16), jnp.float32)  # NCHW, like PyTorch

    fwd = jax.jit(darknet_forward)
    io, p = fwd(params, x)
    jax.block_until_ready((io, p))

    assert io.shape == (2, 3 * 4 * 4 + 3 * 8 * 8, 7), io.shape
    assert p[0].shape == (2, 3, 4, 4, 7) and p[1].shape == (2, 3, 8, 8, 7)
    assert bool(jnp.all(jnp.isfinite(io)))
    print("KERNEL_OK")
</pallas_src>

<mosaic_0001>
module attributes {stable_mosaic.version = 11 : i64} {
  func.func @_conv_kernel(%arg0: i32, %arg1: memref<1x1x18x18x8xf32, #tpu.memory_space<vmem>>, %arg2: memref<9x8x128xf32, #tpu.memory_space<vmem>>, %arg3: memref<1x128xf32, #tpu.memory_space<vmem>>, %arg4: memref<1x256x128xf32, #tpu.memory_space<vmem>>) attributes {dimension_semantics = [#tpu.dimension_semantics<parallel>], iteration_bounds = array<i64: 2>, scalar_prefetch = 0 : i64, scratch_operands = 0 : i64, tpu.core_type = #tpu.core_type<tc>, window_params = [{transform_indices = @transform_0, window_bounds = array<i64: 1, 1, 18, 18, 8>}, {pipeline_mode = #tpu.pipeline_mode<synchronous>, transform_indices = @transform_1, window_bounds = array<i64: 9, 8, 128>}, {pipeline_mode = #tpu.pipeline_mode<synchronous>, transform_indices = @transform_2, window_bounds = array<i64: 1, 128>}, {transform_indices = @transform_3, window_bounds = array<i64: 1, 256, 128>}]} {
    %cst = arith.constant 0.000000e+00 : f32
    %0 = vector.broadcast %cst : f32 to vector<256x128xf32>
    %c0 = arith.constant 0 : index
    %c0_0 = arith.constant 0 : index
    %c0_1 = arith.constant 0 : index
    %c0_2 = arith.constant 0 : index
    %c0_3 = arith.constant 0 : index
    %1 = vector.load %arg1[%c0, %c0_0, %c0_1, %c0_2, %c0_3] : memref<1x1x18x18x8xf32, #tpu.memory_space<vmem>>, vector<1x1x16x16x8xf32>
    %2 = vector.shape_cast %1 : vector<1x1x16x16x8xf32> to vector<16x16x8xf32>
    %3 = vector.shape_cast %2 : vector<16x16x8xf32> to vector<256x8xf32>
    %c0_4 = arith.constant 0 : index
    %c0_5 = arith.constant 0 : index
    %c0_6 = arith.constant 0 : index
    %4 = vector.load %arg2[%c0_4, %c0_5, %c0_6] : memref<9x8x128xf32, #tpu.memory_space<vmem>>, vector<1x8x128xf32>
    %5 = vector.shape_cast %4 : vector<1x8x128xf32> to vector<8x128xf32>
    %cst_7 = arith.constant dense<0.000000e+00> : vector<256x128xf32>
    %6 = tpu.matmul %3, %5, %cst_7 {dimension_numbers = #tpu.dot_dimension_numbers<[1], [0], [0], [1], [0, 0, 1, 1], [], []>} : vector<256x8xf32>, vector<8x128xf32>, vector<256x128xf32> -> vector<256x128xf32>
    %7 = arith.addf %0, %6 : vector<256x128xf32>
    %c0_8 = arith.constant 0 : index
    %c0_9 = arith.constant 0 : index
    %c0_10 = arith.constant 0 : index
    %c1 = arith.constant 1 : index
    %c0_11 = arith.constant 0 : index
    %8 = vector.load %arg1[%c0_8, %c0_9, %c0_10, %c1, %c0_11] : memref<1x1x18x18x8xf32, #tpu.memory_space<vmem>>, vector<1x1x16x16x8xf32>
    %9 = vector.shape_cast %8 : vector<1x1x16x16x8xf32> to vector<16x16x8xf32>
    %10 = vector.shape_cast %9 : vector<16x16x8xf32> to vector<256x8xf32>
    %c1_12 = arith.constant 1 : index
    %c0_13 = arith.constant 0 : index
    %c0_14 = arith.constant 0 : index
    %11 = vector.load %arg2[%c1_12, %c0_13, %c0_14] : memref<9x8x128xf32, #tpu.memory_space<vmem>>, vector<1x8x128xf32>
    %12 = vector.shape_cast %11 : vector<1x8x128xf32> to vector<8x128xf32>
    %cst_15 = arith.constant dense<0.000000e+00> : vector<256x128xf32>
    %13 = tpu.matmul %10, %12, %cst_15 {dimension_numbers = #tpu.dot_dimension_numbers<[1], [0], [0], [1], [0, 0, 1, 1], [], []>} : vector<256x8xf32>, vector<8x128xf32>, vector<256x128xf32> -> vector<256x128xf32>
    %14 = arith.addf %7, %13 : vector<256x128xf32>
    %c0_16 = arith.constant 0 : index
    %c0_17 = arith.constant 0 : index
    %c0_18 = arith.constant 0 : index
    %c2 = arith.constant 2 : index
    %c0_19 = arith.constant 0 : index
    %15 = vector.load %arg1[%c0_16, %c0_17, %c0_18, %c2, %c0_19] : memref<1x1x18x18x8xf32, #tpu.memory_space<vmem>>, vector<1x1x16x16x8xf32>
    %16 = vector.shape_cast %15 : vector<1x1x16x16x8xf32> to vector<16x16x8xf32>
    %17 = vector.shape_cast %16 : vector<16x16x8xf32> to vector<256x8xf32>
    %c2_20 = arith.constant 2 : index
    %c0_21 = arith.constant 0 : index
    %c0_22 = arith.constant 0 : index
    %18 = vector.load %arg2[%c2_20, %c0_21, %c0_22] : memref<9x8x128xf32, #tpu.memory_space<vmem>>, vector<1x8x128xf32>
    %19 = vector.shape_cast %18 : vector<1x8x128xf32> to vector<8x128xf32>
    %cst_23 = arith.constant dense<0.000000e+00> : vector<256x128xf32>
    %20 = tpu.matmul %17, %19, %cst_23 {dimension_numbers = #tpu.dot_dimension_numbers<[1], [0], [0], [1], [0, 0, 1, 1], [], []>} : vector<256x8xf32>, vector<8x128xf32>, vector<256x128xf32> -> vector<256x128xf32>
    %21 = arith.addf %14, %20 : vector<256x128xf32>
    %c0_24 = arith.constant 0 : index
    %c0_25 = arith.constant 0 : index
    %c1_26 = arith.constant 1 : index
    %c0_27 = arith.constant 0 : index
    %c0_28 = arith.constant 0 : index
    %22 = vector.load %arg1[%c0_24, %c0_25, %c1_26, %c0_27, %c0_28] : memref<1x1x18x18x8xf32, #tpu.memory_space<vmem>>, vector<1x1x16x16x8xf32>
    %23 = vector.shape_cast %22 : vector<1x1x16x16x8xf32> to vector<16x16x8xf32>
    %24 = vector.shape_cast %23 : vector<16x16x8xf32> to vector<256x8xf32>
    %c3 = arith.constant 3 : index
    %c0_29 = arith.constant 0 : index
    %c0_30 = arith.constant 0 : index
    %25 = vector.load %arg2[%c3, %c0_29, %c0_30] : memref<9x8x128xf32, #tpu.memory_space<vmem>>, vector<1x8x128xf32>
    %26 = vector.shape_cast %25 : vector<1x8x128xf32> to vector<8x128xf32>
    %cst_31 = arith.constant dense<0.000000e+00> : vector<256x128xf32>
    %27 = tpu.matmul %24, %26, %cst_31 {dimension_numbers = #tpu.dot_dimension_numbers<[1], [0], [0], [1], [0, 0, 1, 1], [], []>} : vector<256x8xf32>, vector<8x128xf32>, vector<256x128xf32> -> vector<256x128xf32>
    %28 = arith.addf %21, %27 : vector<256x128xf32>
    %c0_32 = arith.constant 0 : index
    %c0_33 = arith.constant 0 : index
    %c1_34 = arith.constant 1 : index
    %c1_35 = arith.constant 1 : index
    %c0_36 = arith.constant 0 : index
    %29 = vector.load %arg1[%c0_32, %c0_33, %c1_34, %c1_35, %c0_36] : memref<1x1x18x18x8xf32, #tpu.memory_space<vmem>>, vector<1x1x16x16x8xf32>
    %30 = vector.shape_cast %29 : vector<1x1x16x16x8xf32> to vector<16x16x8xf32>
    %31 = vector.shape_cast %30 : vector<16x16x8xf32> to vector<256x8xf32>
    %c4 = arith.constant 4 : index
    %c0_37 = arith.constant 0 : index
    %c0_38 = arith.constant 0 : index
    %32 = vector.load %arg2[%c4, %c0_37, %c0_38] : memref<9x8x128xf32, #tpu.memory_space<vmem>>, vector<1x8x128xf32>
    %33 = vector.shape_cast %32 : vector<1x8x128xf32> to vector<8x128xf32>
    %cst_39 = arith.constant dense<0.000000e+00> : vector<256x128xf32>
    %34 = tpu.matmul %31, %33, %cst_39 {dimension_numbers = #tpu.dot_dimension_numbers<[1], [0], [0], [1], [0, 0, 1, 1], [], []>} : vector<256x8xf32>, vector<8x128xf32>, vector<256x128xf32> -> vector<256x128xf32>
    %35 = arith.addf %28, %34 : vector<256x128xf32>
    %c0_40 = arith.constant 0 : index
    %c0_41 = arith.constant 0 : index
    %c1_42 = arith.constant 1 : index
    %c2_43 = arith.constant 2 : index
    %c0_44 = arith.constant 0 : index
    %36 = vector.load %arg1[%c0_40, %c0_41, %c1_42, %c2_43, %c0_44] : memref<1x1x18x18x8xf32, #tpu.memory_space<vmem>>, vector<1x1x16x16x8xf32>
    %37 = vector.shape_cast %36 : vector<1x1x16x16x8xf32> to vector<16x16x8xf32>
    %38 = vector.shape_cast %37 : vector<16x16x8xf32> to vector<256x8xf32>
    %c5 = arith.constant 5 : index
    %c0_45 = arith.constant 0 : index
    %c0_46 = arith.constant 0 : index
    %39 = vector.load %arg2[%c5, %c0_45, %c0_46] : memref<9x8x128xf32, #tpu.memory_space<vmem>>, vector<1x8x128xf32>
    %40 = vector.shape_cast %39 : vector<1x8x128xf32> to vector<8x128xf32>
    %cst_47 = arith.constant dense<0.000000e+00> : vector<256x128xf32>
    %41 = tpu.matmul %38, %40, %cst_47 {dimension_numbers = #tpu.dot_dimension_numbers<[1], [0], [0], [1], [0, 0, 1, 1], [], []>} : vector<256x8xf32>, vector<8x128xf32>, vector<256x128xf32> -> vector<256x128xf32>
    %42 = arith.addf %35, %41 : vector<256x128xf32>
    %c0_48 = arith.constant 0 : index
    %c0_49 = arith.constant 0 : index
    %c2_50 = arith.constant 2 : index
    %c0_51 = arith.constant 0 : index
    %c0_52 = arith.constant 0 : index
    %43 = vector.load %arg1[%c0_48, %c0_49, %c2_50, %c0_51, %c0_52] : memref<1x1x18x18x8xf32, #tpu.memory_space<vmem>>, vector<1x1x16x16x8xf32>
    %44 = vector.shape_cast %43 : vector<1x1x16x16x8xf32> to vector<16x16x8xf32>
    %45 = vector.shape_cast %44 : vector<16x16x8xf32> to vector<256x8xf32>
    %c6 = arith.constant 6 : index
    %c0_53 = arith.constant 0 : index
    %c0_54 = arith.constant 0 : index
    %46 = vector.load %arg2[%c6, %c0_53, %c0_54] : memref<9x8x128xf32, #tpu.memory_space<vmem>>, vector<1x8x128xf32>
    %47 = vector.shape_cast %46 : vector<1x8x128xf32> to vector<8x128xf32>
    %cst_55 = arith.constant dense<0.000000e+00> : vector<256x128xf32>
    %48 = tpu.matmul %45, %47, %cst_55 {dimension_numbers = #tpu.dot_dimension_numbers<[1], [0], [0], [1], [0, 0, 1, 1], [], []>} : vector<256x8xf32>, vector<8x128xf32>, vector<256x128xf32> -> vector<256x128xf32>
    %49 = arith.addf %42, %48 : vector<256x128xf32>
    %c0_56 = arith.constant 0 : index
    %c0_57 = arith.constant 0 : index
    %c2_58 = arith.constant 2 : index
    %c1_59 = arith.constant 1 : index
    %c0_60 = arith.constant 0 : index
    %50 = vector.load %arg1[%c0_56, %c0_57, %c2_58, %c1_59, %c0_60] : memref<1x1x18x18x8xf32, #tpu.memory_space<vmem>>, vector<1x1x16x16x8xf32>
    %51 = vector.shape_cast %50 : vector<1x1x16x16x8xf32> to vector<16x16x8xf32>
    %52 = vector.shape_cast %51 : vector<16x16x8xf32> to vector<256x8xf32>
    %c7 = arith.constant 7 : index
    %c0_61 = arith.constant 0 : index
    %c0_62 = arith.constant 0 : index
    %53 = vector.load %arg2[%c7, %c0_61, %c0_62] : memref<9x8x128xf32, #tpu.memory_space<vmem>>, vector<1x8x128xf32>
    %54 = vector.shape_cast %53 : vector<1x8x128xf32> to vector<8x128xf32>
    %cst_63 = arith.constant dense<0.000000e+00> : vector<256x128xf32>
    %55 = tpu.matmul %52, %54, %cst_63 {dimension_numbers = #tpu.dot_dimension_numbers<[1], [0], [0], [1], [0, 0, 1, 1], [], []>} : vector<256x8xf32>, vector<8x128xf32>, vector<256x128xf32> -> vector<256x128xf32>
    %56 = arith.addf %49, %55 : vector<256x128xf32>
    %c0_64 = arith.constant 0 : index
    %c0_65 = arith.constant 0 : index
    %c2_66 = arith.constant 2 : index
    %c2_67 = arith.constant 2 : index
    %c0_68 = arith.constant 0 : index
    %57 = vector.load %arg1[%c0_64, %c0_65, %c2_66, %c2_67, %c0_68] : memref<1x1x18x18x8xf32, #tpu.memory_space<vmem>>, vector<1x1x16x16x8xf32>
    %58 = vector.shape_cast %57 : vector<1x1x16x16x8xf32> to vector<16x16x8xf32>
    %59 = vector.shape_cast %58 : vector<16x16x8xf32> to vector<256x8xf32>
    %c8 = arith.constant 8 : index
    %c0_69 = arith.constant 0 : index
    %c0_70 = arith.constant 0 : index
    %60 = vector.load %arg2[%c8, %c0_69, %c0_70] : memref<9x8x128xf32, #tpu.memory_space<vmem>>, vector<1x8x128xf32>
    %61 = vector.shape_cast %60 : vector<1x8x128xf32> to vector<8x128xf32>
    %cst_71 = arith.constant dense<0.000000e+00> : vector<256x128xf32>
    %62 = tpu.matmul %59, %61, %cst_71 {dimension_numbers = #tpu.dot_dimension_numbers<[1], [0], [0], [1], [0, 0, 1, 1], [], []>} : vector<256x8xf32>, vector<8x128xf32>, vector<256x128xf32> -> vector<256x128xf32>
    %63 = arith.addf %56, %62 : vector<256x128xf32>
    %c0_72 = arith.constant 0 : index
    %c0_73 = arith.constant 0 : index
    %64 = vector.load %arg3[%c0_72, %c0_73] : memref<1x128xf32, #tpu.memory_space<vmem>>, vector<1x128xf32>
    %65 = vector.broadcast %64 : vector<1x128xf32> to vector<256x128xf32>
    %66 = arith.addf %63, %65 : vector<256x128xf32>
    %cst_74 = arith.constant 0.000000e+00 : f32
    %67 = vector.broadcast %cst_74 : f32 to vector<256x128xf32>
    %68 = arith.cmpf ogt, %66, %67 : vector<256x128xf32>
    %cst_75 = arith.constant 1.000000e-01 : f32
    %69 = vector.broadcast %cst_75 : f32 to vector<256x128xf32>
    %70 = arith.mulf %69, %66 : vector<256x128xf32>
    %71 = arith.select %68, %66, %70 : vector<256x128xi1>, vector<256x128xf32>
    %c0_76 = arith.constant 0 : index
    %c0_77 = arith.constant 0 : index
    %c0_78 = arith.constant 0 : index
    %72 = vector.load %arg4[%c0_76, %c0_77, %c0_78] : memref<1x256x128xf32, #tpu.memory_space<vmem>>, vector<1x256x128xf32>
    %73 = vector.shape_cast %72 : vector<1x256x128xf32> to vector<256x128xf32>
    %74 = vector.shape_cast %71 : vector<256x128xf32> to vector<1x256x128xf32>
    tpu.vector_store %arg4[%c0_76, %c0_77, %c0_78], %74 {strides = array<i32>} : memref<1x256x128xf32, #tpu.memory_space<vmem>>, vector<1x256x128xf32>,
    return
  }
  func.func @transform_0(%arg0: i32) -> (i32, i32, i32, i32, i32) {
    %c0_i32 = arith.constant 0 : i32
    %c0_i32_0 = arith.constant 0 : i32
    %c0_i32_1 = arith.constant 0 : i32
    %c0_i32_2 = arith.constant 0 : i32
    %c0_i32_3 = arith.constant 0 : i32
    return %arg0, %c0_i32, %c0_i32_0, %c0_i32_1, %c0_i32_2 : i32, i32, i32, i32, i32
  }
  func.func @transform_1(%arg0: i32) -> (i32, i32, i32) {
    %c0_i32 = arith.constant 0 : i32
    %c0_i32_0 = arith.constant 0 : i32
    %c0_i32_1 = arith.constant 0 : i32
    %c0_i32_2 = arith.constant 0 : i32
    return %c0_i32, %c0_i32_0, %c0_i32_1 : i32, i32, i32
  }
  func.func @transform_2(%arg0: i32) -> (i32, i32) {
    %c0_i32 = arith.constant 0 : i32
    %c0_i32_0 = arith.constant 0 : i32
    %c0_i32_1 = arith.constant 0 : i32
    return %c0_i32, %c0_i32_0 : i32, i32
  }
  func.func @transform_3(%arg0: i32) -> (i32, i32, i32) {
    %c0_i32 = arith.constant 0 : i32
    %c0_i32_0 = arith.constant 0 : i32
    %c0_i32_1 = arith.constant 0 : i32
    return %arg0, %c0_i32, %c0_i32_0 : i32, i32, i32
  }
}

module attributes {stable_mosaic.version = 11 : i64} {
  func.func @_conv_kernel(%arg0: i32, %arg1: memref<1x4x9x9x8xf32, #tpu.memory_space<vmem>>, %arg2: memref<9x8x128xf32, #tpu.memory_space<vmem>>, %arg3: memref<1x128xf32, #tpu.memory_space<vmem>>, %arg4: memref<1x64x128xf32, #tpu.memory_space<vmem>>) attributes {dimension_semantics = [#tpu.dimension_semantics<parallel>], iteration_bounds = array<i64: 2>, scalar_prefetch = 0 : i64, scratch_operands = 0 : i64, tpu.core_type = #tpu.core_type<tc>, window_params = [{transform_indices = @transform_0, window_bounds = array<i64: 1, 4, 9, 9, 8>}, {pipeline_mode = #tpu.pipeline_mode<synchronous>, transform_indices = @transform_1, window_bounds = array<i64: 9, 8, 128>}, {pipeline_mode = #tpu.pipeline_mode<synchronous>, transform_indices = @transform_2, window_bounds = array<i64: 1, 128>}, {transform_indices = @transform_3, window_bounds = array<i64: 1, 64, 128>}]} {
    %cst = arith.constant 0.000000e+00 : f32
    %0 = vector.broadcast %cst : f32 to vector<64x128xf32>
    %c0 = arith.constant 0 : index
    %c0_0 = arith.constant 0 : index
    %c0_1 = arith.constant 0 : index
    %c0_2 = arith.constant 0 : index
    %c0_3 = arith.constant 0 : index
    %1 = vector.load %arg1[%c0, %c0_0, %c0_1, %c0_2, %c0_3] : memref<1x4x9x9x8xf32, #tpu.memory_space<vmem>>, vector<1x1x8x8x8xf32>
    %2 = vector.shape_cast %1 : vector<1x1x8x8x8xf32> to vector<8x8x8xf32>
    %3 = vector.shape_cast %2 : vector<8x8x8xf32> to vector<64x8xf32>
    %c0_4 = arith.constant 0 : index
    %c0_5 = arith.constant 0 : index
    %c0_6 = arith.constant 0 : index
    %4 = vector.load %arg2[%c0_4, %c0_5, %c0_6] : memref<9x8x128xf32, #tpu.memory_space<vmem>>, vector<1x8x128xf32>
    %5 = vector.shape_cast %4 : vector<1x8x128xf32> to vector<8x128xf32>
    %cst_7 = arith.constant dense<0.000000e+00> : vector<64x128xf32>
    %6 = tpu.matmul %3, %5, %cst_7 {dimension_numbers = #tpu.dot_dimension_numbers<[1], [0], [0], [1], [0, 0, 1, 1], [], []>} : vector<64x8xf32>, vector<8x128xf32>, vector<64x128xf32> -> vector<64x128xf32>
    %7 = arith.addf %0, %6 : vector<64x128xf32>
    %c0_8 = arith.constant 0 : index
    %c1 = arith.constant 1 : index
    %c0_9 = arith.constant 0 : index
    %c0_10 = arith.constant 0 : index
    %c0_11 = arith.constant 0 : index
    %8 = vector.load %arg1[%c0_8, %c1, %c0_9, %c0_10, %c0_11] : memref<1x4x9x9x8xf32, #tpu.memory_space<vmem>>, vector<1x1x8x8x8xf32>
    %9 = vector.shape_cast %8 : vector<1x1x8x8x8xf32> to vector<8x8x8xf32>
    %10 = vector.shape_cast %9 : vector<8x8x8xf32> to vector<64x8xf32>
    %c1_12 = arith.constant 1 : index
    %c0_13 = arith.constant 0 : index
    %c0_14 = arith.constant 0 : index
    %11 = vector.load %arg2[%c1_12, %c0_13, %c0_14] : memref<9x8x128xf32, #tpu.memory_space<vmem>>, vector<1x8x128xf32>
    %12 = vector.shape_cast %11 : vector<1x8x128xf32> to vector<8x128xf32>
    %cst_15 = arith.constant dense<0.000000e+00> : vector<64x128xf32>
    %13 = tpu.matmul %10, %12, %cst_15 {dimension_numbers = #tpu.dot_dimension_numbers<[1], [0], [0], [1], [0, 0, 1, 1], [], []>} : vector<64x8xf32>, vector<8x128xf32>, vector<64x128xf32> -> vector<64x128xf32>
    %14 = arith.addf %7, %13 : vector<64x128xf32>
    %c0_16 = arith.constant 0 : index
    %c0_17 = arith.constant 0 : index
    %c0_18 = arith.constant 0 : index
    %c1_19 = arith.constant 1 : index
    %c0_20 = arith.constant 0 : index
    %15 = vector.load %arg1[%c0_16, %c0_17, %c0_18, %c1_19, %c0_20] : memref<1x4x9x9x8xf32, #tpu.memory_space<vmem>>, vector<1x1x8x8x8xf32>
    %16 = vector.shape_cast %15 : vector<1x1x8x8x8xf32> to vector<8x8x8xf32>
    %17 = vector.shape_cast %16 : vector<8x8x8xf32> to vector<64x8xf32>
    %c2 = arith.constant 2 : index
    %c0_21 = arith.constant 0 : index
    %c0_22 = arith.constant 0 : index
    %18 = vector.load %arg2[%c2, %c0_21, %c0_22] : memref<9x8x128xf32, #tpu.memory_space<vmem>>, vector<1x8x128xf32>
    %19 = vector.shape_cast %18 : vector<1x8x128xf32> to vector<8x128xf32>
    %cst_23 = arith.constant dense<0.000000e+00> : vector<64x128xf32>
    %20 = tpu.matmul %17, %19, %cst_23 {dimension_numbers = #tpu.dot_dimension_numbers<[1], [0], [0], [1], [0, 0, 1, 1], [], []>} : vector<64x8xf32>, vector<8x128xf32>, vector<64x128xf32> -> vector<64x128xf32>
    %21 = arith.addf %14, %20 : vector<64x128xf32>
    %c0_24 = arith.constant 0 : index
    %c2_25 = arith.constant 2 : index
    %c0_26 = arith.constant 0 : index
    %c0_27 = arith.constant 0 : index
    %c0_28 = arith.constant 0 : index
    %22 = vector.load %arg1[%c0_24, %c2_25, %c0_26, %c0_27, %c0_28] : memref<1x4x9x9x8xf32, #tpu.memory_space<vmem>>, vector<1x1x8x8x8xf32>
    %23 = vector.shape_cast %22 : vector<1x1x8x8x8xf32> to vector<8x8x8xf32>
    %24 = vector.shape_cast %23 : vector<8x8x8xf32> to vector<64x8xf32>
    %c3 = arith.constant 3 : index
    %c0_29 = arith.constant 0 : index
    %c0_30 = arith.constant 0 : index
    %25 = vector.load %arg2[%c3, %c0_29, %c0_30] : memref<9x8x128xf32, #tpu.memory_space<vmem>>, vector<1x8x128xf32>
    %26 = vector.shape_cast %25 : vector<1x8x128xf32> to vector<8x128xf32>
    %cst_31 = arith.constant dense<0.000000e+00> : vector<64x128xf32>
    %27 = tpu.matmul %24, %26, %cst_31 {dimension_numbers = #tpu.dot_dimension_numbers<[1], [0], [0], [1], [0, 0, 1, 1], [], []>} : vector<64x8xf32>, vector<8x128xf32>, vector<64x128xf32> -> vector<64x128xf32>
    %28 = arith.addf %21, %27 : vector<64x128xf32>
    %c0_32 = arith.constant 0 : index
    %c3_33 = arith.constant 3 : index
    %c0_34 = arith.constant 0 : index
    %c0_35 = arith.constant 0 : index
    %c0_36 = arith.constant 0 : index
    %29 = vector.load %arg1[%c0_32, %c3_33, %c0_34, %c0_35, %c0_36] : memref<1x4x9x9x8xf32, #tpu.memory_space<vmem>>, vector<1x1x8x8x8xf32>
    %30 = vector.shape_cast %29 : vector<1x1x8x8x8xf32> to vector<8x8x8xf32>
    %31 = vector.shape_cast %30 : vector<8x8x8xf32> to vector<64x8xf32>
    %c4 = arith.constant 4 : index
    %c0_37 = arith.constant 0 : index
    %c0_38 = arith.constant 0 : index
    %32 = vector.load %arg2[%c4, %c0_37, %c0_38] : memref<9x8x128xf32, #tpu.memory_space<vmem>>, vector<1x8x128xf32>
    %33 = vector.shape_cast %32 : vector<1x8x128xf32> to vector<8x128xf32>
    %cst_39 = arith.constant dense<0.000000e+00> : vector<64x128xf32>
    %34 = tpu.matmul %31, %33, %cst_39 {dimension_numbers = #tpu.dot_dimension_numbers<[1], [0], [0], [1], [0, 0, 1, 1], [], []>} : vector<64x8xf32>, vector<8x128xf32>, vector<64x128xf32> -> vector<64x128xf32>
    %35 = arith.addf %28, %34 : vector<64x128xf32>
    %c0_40 = arith.constant 0 : index
    %c2_41 = arith.constant 2 : index
    %c0_42 = arith.constant 0 : index
    %c1_43 = arith.constant 1 : index
    %c0_44 = arith.constant 0 : index
    %36 = vector.load %arg1[%c0_40, %c2_41, %c0_42, %c1_43, %c0_44] : memref<1x4x9x9x8xf32, #tpu.memory_space<vmem>>, vector<1x1x8x8x8xf32>
    %37 = vector.shape_cast %36 : vector<1x1x8x8x8xf32> to vector<8x8x8xf32>
    %38 = vector.shape_cast %37 : vector<8x8x8xf32> to vector<64x8xf32>
    %c5 = arith.constant 5 : index
    %c0_45 = arith.constant 0 : index
    %c0_46 = arith.constant 0 : index
    %39 = vector.load %arg2[%c5, %c0_45, %c0_46] : memref<9x8x128xf32, #tpu.memory_space<vmem>>, vector<1x8x128xf32>
    %40 = vector.shape_cast %39 : vector<1x8x128xf32> to vector<8x128xf32>
    %cst_47 = arith.constant dense<0.000000e+00> : vector<64x128xf32>
    %41 = tpu.matmul %38, %40, %cst_47 {dimension_numbers = #tpu.dot_dimension_numbers<[1], [0], [0], [1], [0, 0, 1, 1], [], []>} : vector<64x8xf32>, vector<8x128xf32>, vector<64x128xf32> -> vector<64x128xf32>
    %42 = arith.addf %35, %41 : vector<64x128xf32>
    %c0_48 = arith.constant 0 : index
    %c0_49 = arith.constant 0 : index
    %c1_50 = arith.constant 1 : index
    %c0_51 = arith.constant 0 : index
    %c0_52 = arith.constant 0 : index
    %43 = vector.load %arg1[%c0_48, %c0_49, %c1_50, %c0_51, %c0_52] : memref<1x4x9x9x8xf32, #tpu.memory_space<vmem>>, vector<1x1x8x8x8xf32>
    %44 = vector.shape_cast %43 : vector<1x1x8x8x8xf32> to vector<8x8x8xf32>
    %45 = vector.shape_cast %44 : vector<8x8x8xf32> to vector<64x8xf32>
    %c6 = arith.constant 6 : index
    %c0_53 = arith.constant 0 : index
    %c0_54 = arith.constant 0 : index
    %46 = vector.load %arg2[%c6, %c0_53, %c0_54] : memref<9x8x128xf32, #tpu.memory_space<vmem>>, vector<1x8x128xf32>
    %47 = vector.shape_cast %46 : vector<1x8x128xf32> to vector<8x128xf32>
    %cst_55 = arith.constant dense<0.000000e+00> : vector<64x128xf32>
    %48 = tpu.matmul %45, %47, %cst_55 {dimension_numbers = #tpu.dot_dimension_numbers<[1], [0], [0], [1], [0, 0, 1, 1], [], []>} : vector<64x8xf32>, vector<8x128xf32>, vector<64x128xf32> -> vector<64x128xf32>
    %49 = arith.addf %42, %48 : vector<64x128xf32>
    %c0_56 = arith.constant 0 : index
    %c1_57 = arith.constant 1 : index
    %c1_58 = arith.constant 1 : index
    %c0_59 = arith.constant 0 : index
    %c0_60 = arith.constant 0 : index
    %50 = vector.load %arg1[%c0_56, %c1_57, %c1_58, %c0_59, %c0_60] : memref<1x4x9x9x8xf32, #tpu.memory_space<vmem>>, vector<1x1x8x8x8xf32>
    %51 = vector.shape_cast %50 : vector<1x1x8x8x8xf32> to vector<8x8x8xf32>
    %52 = vector.shape_cast %51 : vector<8x8x8xf32> to vector<64x8xf32>
    %c7 = arith.constant 7 : index
    %c0_61 = arith.constant 0 : index
    %c0_62 = arith.constant 0 : index
    %53 = vector.load %arg2[%c7, %c0_61, %c0_62] : memref<9x8x128xf32, #tpu.memory_space<vmem>>, vector<1x8x128xf32>
    %54 = vector.shape_cast %53 : vector<1x8x128xf32> to vector<8x128xf32>
    %cst_63 = arith.constant dense<0.000000e+00> : vector<64x128xf32>
    %55 = tpu.matmul %52, %54, %cst_63 {dimension_numbers = #tpu.dot_dimension_numbers<[1], [0], [0], [1], [0, 0, 1, 1], [], []>} : vector<64x8xf32>, vector<8x128xf32>, vector<64x128xf32> -> vector<64x128xf32>
    %56 = arith.addf %49, %55 : vector<64x128xf32>
    %c0_64 = arith.constant 0 : index
    %c0_65 = arith.constant 0 : index
    %c1_66 = arith.constant 1 : index
    %c1_67 = arith.constant 1 : index
    %c0_68 = arith.constant 0 : index
    %57 = vector.load %arg1[%c0_64, %c0_65, %c1_66, %c1_67, %c0_68] : memref<1x4x9x9x8xf32, #tpu.memory_space<vmem>>, vector<1x1x8x8x8xf32>
    %58 = vector.shape_cast %57 : vector<1x1x8x8x8xf32> to vector<8x8x8xf32>
    %59 = vector.shape_cast %58 : vector<8x8x8xf32> to vector<64x8xf32>
    %c8 = arith.constant 8 : index
    %c0_69 = arith.constant 0 : index
    %c0_70 = arith.constant 0 : index
    %60 = vector.load %arg2[%c8, %c0_69, %c0_70] : memref<9x8x128xf32, #tpu.memory_space<vmem>>, vector<1x8x128xf32>
    %61 = vector.shape_cast %60 : vector<1x8x128xf32> to vector<8x128xf32>
    %cst_71 = arith.constant dense<0.000000e+00> : vector<64x128xf32>
    %62 = tpu.matmul %59, %61, %cst_71 {dimension_numbers = #tpu.dot_dimension_numbers<[1], [0], [0], [1], [0, 0, 1, 1], [], []>} : vector<64x8xf32>, vector<8x128xf32>, vector<64x128xf32> -> vector<64x128xf32>
    %63 = arith.addf %56, %62 : vector<64x128xf32>
    %c0_72 = arith.constant 0 : index
    %c0_73 = arith.constant 0 : index
    %64 = vector.load %arg3[%c0_72, %c0_73] : memref<1x128xf32, #tpu.memory_space<vmem>>, vector<1x128xf32>
    %65 = vector.broadcast %64 : vector<1x128xf32> to vector<64x128xf32>
    %66 = arith.addf %63, %65 : vector<64x128xf32>
    %cst_74 = arith.constant 0.000000e+00 : f32
    %67 = vector.broadcast %cst_74 : f32 to vector<64x128xf32>
    %68 = arith.cmpf ogt, %66, %67 : vector<64x128xf32>
    %cst_75 = arith.constant 1.000000e-01 : f32
    %69 = vector.broadcast %cst_75 : f32 to vector<64x128xf32>
    %70 = arith.mulf %69, %66 : vector<64x128xf32>
    %71 = arith.select %68, %66, %70 : vector<64x128xi1>, vector<64x128xf32>
    %c0_76 = arith.constant 0 : index
    %c0_77 = arith.constant 0 : index
    %c0_78 = arith.constant 0 : index
    %72 = vector.load %arg4[%c0_76, %c0_77, %c0_78] : memref<1x64x128xf32, #tpu.memory_space<vmem>>, vector<1x64x128xf32>
    %73 = vector.shape_cast %72 : vector<1x64x128xf32> to vector<64x128xf32>
    %74 = vector.shape_cast %71 : vector<64x128xf32> to vector<1x64x128xf32>
    tpu.vector_store %arg4[%c0_76, %c0_77, %c0_78], %74 {strides = array<i32>} : memref<1x64x128xf32, #tpu.memory_space<vmem>>, vector<1x64x128xf32>,
    return
  }
  func.func @transform_0(%arg0: i32) -> (i32, i32, i32, i32, i32) {
    %c0_i32 = arith.constant 0 : i32
    %c0_i32_0 = arith.constant 0 : i32
    %c0_i32_1 = arith.constant 0 : i32
    %c0_i32_2 = arith.constant 0 : i32
    %c0_i32_3 = arith.constant 0 : i32
    return %arg0, %c0_i32, %c0_i32_0, %c0_i32_1, %c0_i32_2 : i32, i32, i32, i32, i32
  }
  func.func @transform_1(%arg0: i32) -> (i32, i32, i32) {
    %c0_i32 = arith.constant 0 : i32
    %c0_i32_0 = arith.constant 0 : i32
    %c0_i32_1 = arith.constant 0 : i32
    %c0_i32_2 = arith.constant 0 : i32
    return %c0_i32, %c0_i32_0, %c0_i32_1 : i32, i32, i32
  }
  func.func @transform_2(%arg0: i32) -> (i32, i32) {
    %c0_i32 = arith.constant 0 : i32
    %c0_i32_0 = arith.constant 0 : i32
    %c0_i32_1 = arith.constant 0 : i32
    return %c0_i32, %c0_i32_0 : i32, i32
  }
  func.func @transform_3(%arg0: i32) -> (i32, i32, i32) {
    %c0_i32 = arith.constant 0 : i32
    %c0_i32_0 = arith.constant 0 : i32
    %c0_i32_1 = arith.constant 0 : i32
    return %arg0, %c0_i32, %c0_i32_0 : i32, i32, i32
  }
}

module attributes {stable_mosaic.version = 11 : i64} {
  func.func @_conv_kernel(%arg0: i32, %arg1: memref<1x1x8x8x16xf32, #tpu.memory_space<vmem>>, %arg2: memref<1x16x128xf32, #tpu.memory_space<vmem>>, %arg3: memref<1x128xf32, #tpu.memory_space<vmem>>, %arg4: memref<1x64x128xf32, #tpu.memory_space<vmem>>, %arg5: memref<1x64x128xf32, #tpu.memory_space<vmem>>) attributes {dimension_semantics = [#tpu.dimension_semantics<parallel>], iteration_bounds = array<i64: 2>, scalar_prefetch = 0 : i64, scratch_operands = 0 : i64, tpu.core_type = #tpu.core_type<tc>, window_params = [{transform_indices = @transform_0, window_bounds = array<i64: 1, 1, 8, 8, 16>}, {pipeline_mode = #tpu.pipeline_mode<synchronous>, transform_indices = @transform_1, window_bounds = array<i64: 1, 16, 128>}, {pipeline_mode = #tpu.pipeline_mode<synchronous>, transform_indices = @transform_2, window_bounds = array<i64: 1, 128>}, {transform_indices = @transform_3, window_bounds = array<i64: 1, 64, 128>}, {transform_indices = @transform_4, window_bounds = array<i64: 1, 64, 128>}]} {
    %cst = arith.constant 0.000000e+00 : f32
    %0 = vector.broadcast %cst : f32 to vector<64x128xf32>
    %c0 = arith.constant 0 : index
    %c0_0 = arith.constant 0 : index
    %c0_1 = arith.constant 0 : index
    %c0_2 = arith.constant 0 : index
    %c0_3 = arith.constant 0 : index
    %1 = vector.load %arg1[%c0, %c0_0, %c0_1, %c0_2, %c0_3] : memref<1x1x8x8x16xf32, #tpu.memory_space<vmem>>, vector<1x1x8x8x16xf32>
    %2 = vector.shape_cast %1 : vector<1x1x8x8x16xf32> to vector<8x8x16xf32>
    %3 = vector.shape_cast %2 : vector<8x8x16xf32> to vector<64x16xf32>
    %c0_4 = arith.constant 0 : index
    %c0_5 = arith.constant 0 : index
    %c0_6 = arith.constant 0 : index
    %4 = vector.load %arg2[%c0_4, %c0_5, %c0_6] : memref<1x16x128xf32, #tpu.memory_space<vmem>>, vector<1x16x128xf32>
    %5 = vector.shape_cast %4 : vector<1x16x128xf32> to vector<16x128xf32>
    %cst_7 = arith.constant dense<0.000000e+00> : vector<64x128xf32>
    %6 = tpu.matmul %3, %5, %cst_7 {dimension_numbers = #tpu.dot_dimension_numbers<[1], [0], [0], [1], [0, 0, 1, 1], [], []>} : vector<64x16xf32>, vector<16x128xf32>, vector<64x128xf32> -> vector<64x128xf32>
    %7 = arith.addf %0, %6 : vector<64x128xf32>
    %c0_8 = arith.constant 0 : index
    %c0_9 = arith.constant 0 : index
    %8 = vector.load %arg3[%c0_8, %c0_9] : memref<1x128xf32, #tpu.memory_space<vmem>>, vector<1x128xf32>
    %9 = vector.broadcast %8 : vector<1x128xf32> to vector<64x128xf32>
    %10 = arith.addf %7, %9 : vector<64x128xf32>
    %cst_10 = arith.constant 0.000000e+00 : f32
    %11 = vector.broadcast %cst_10 : f32 to vector<64x128xf32>
    %12 = arith.cmpf ogt, %10, %11 : vector<64x128xf32>
    %cst_11 = arith.constant 1.000000e-01 : f32
    %13 = vector.broadcast %cst_11 : f32 to vector<64x128xf32>
    %14 = arith.mulf %13, %10 : vector<64x128xf32>
    %15 = arith.select %12, %10, %14 : vector<64x128xi1>, vector<64x128xf32>
    %c0_12 = arith.constant 0 : index
    %c0_13 = arith.constant 0 : index
    %c0_14 = arith.constant 0 : index
    %16 = vector.load %arg4[%c0_12, %c0_13, %c0_14] : memref<1x64x128xf32, #tpu.memory_space<vmem>>, vector<1x64x128xf32>
    %17 = vector.shape_cast %16 : vector<1x64x128xf32> to vector<64x128xf32>
    %18 = arith.addf %15, %17 : vector<64x128xf32>
    %c0_15 = arith.constant 0 : index
    %c0_16 = arith.constant 0 : index
    %c0_17 = arith.constant 0 : index
    %19 = vector.load %arg5[%c0_15, %c0_16, %c0_17] : memref<1x64x128xf32, #tpu.memory_space<vmem>>, vector<1x64x128xf32>
    %20 = vector.shape_cast %19 : vector<1x64x128xf32> to vector<64x128xf32>
    %21 = vector.shape_cast %18 : vector<64x128xf32> to vector<1x64x128xf32>
    tpu.vector_store %arg5[%c0_15, %c0_16, %c0_17], %21 {strides = array<i32>} : memref<1x64x128xf32, #tpu.memory_space<vmem>>, vector<1x64x128xf32>,
    return
  }
  func.func @transform_0(%arg0: i32) -> (i32, i32, i32, i32, i32) {
    %c0_i32 = arith.constant 0 : i32
    %c0_i32_0 = arith.constant 0 : i32
    %c0_i32_1 = arith.constant 0 : i32
    %c0_i32_2 = arith.constant 0 : i32
    %c0_i32_3 = arith.constant 0 : i32
    return %arg0, %c0_i32, %c0_i32_0, %c0_i32_1, %c0_i32_2 : i32, i32, i32, i32, i32
  }
  func.func @transform_1(%arg0: i32) -> (i32, i32, i32) {
    %c0_i32 = arith.constant 0 : i32
    %c0_i32_0 = arith.constant 0 : i32
    %c0_i32_1 = arith.constant 0 : i32
    %c0_i32_2 = arith.constant 0 : i32
    return %c0_i32, %c0_i32_0, %c0_i32_1 : i32, i32, i32
  }
  func.func @transform_2(%arg0: i32) -> (i32, i32) {
    %c0_i32 = arith.constant 0 : i32
    %c0_i32_0 = arith.constant 0 : i32
    %c0_i32_1 = arith.constant 0 : i32
    return %c0_i32, %c0_i32_0 : i32, i32
  }
  func.func @transform_3(%arg0: i32) -> (i32, i32, i32) {
    %c0_i32 = arith.constant 0 : i32
    %c0_i32_0 = arith.constant 0 : i32
    %c0_i32_1 = arith.constant 0 : i32
    return %arg0, %c0_i32, %c0_i32_0 : i32, i32, i32
  }
  func.func @transform_4(%arg0: i32) -> (i32, i32, i32) {
    %c0_i32 = arith.constant 0 : i32
    %c0_i32_0 = arith.constant 0 : i32
    %c0_i32_1 = arith.constant 0 : i32
    return %arg0, %c0_i32, %c0_i32_0 : i32, i32, i32
  }
}

module attributes {stable_mosaic.version = 11 : i64} {
  func.func @_conv_kernel(%arg0: i32, %arg1: memref<1x4x5x9x16xf32, #tpu.memory_space<vmem>>, %arg2: memref<9x16x128xf32, #tpu.memory_space<vmem>>, %arg3: memref<1x128xf32, #tpu.memory_space<vmem>>, %arg4: memref<1x32x128xf32, #tpu.memory_space<vmem>>) attributes {dimension_semantics = [#tpu.dimension_semantics<parallel>], iteration_bounds = array<i64: 2>, scalar_prefetch = 0 : i64, scratch_operands = 0 : i64, tpu.core_type = #tpu.core_type<tc>, window_params = [{transform_indices = @transform_0, window_bounds = array<i64: 1, 4, 5, 9, 16>}, {pipeline_mode = #tpu.pipeline_mode<synchronous>, transform_indices = @transform_1, window_bounds = array<i64: 9, 16, 128>}, {pipeline_mode = #tpu.pipeline_mode<synchronous>, transform_indices = @transform_2, window_bounds = array<i64: 1, 128>}, {transform_indices = @transform_3, window_bounds = array<i64: 1, 32, 128>}]} {
    %cst = arith.constant 0.000000e+00 : f32
    %0 = vector.broadcast %cst : f32 to vector<32x128xf32>
    %c0 = arith.constant 0 : index
    %c0_0 = arith.constant 0 : index
    %c0_1 = arith.constant 0 : index
    %c0_2 = arith.constant 0 : index
    %c0_3 = arith.constant 0 : index
    %1 = vector.load %arg1[%c0, %c0_0, %c0_1, %c0_2, %c0_3] : memref<1x4x5x9x16xf32, #tpu.memory_space<vmem>>, vector<1x1x4x8x16xf32>
    %2 = vector.shape_cast %1 : vector<1x1x4x8x16xf32> to vector<4x8x16xf32>
    %3 = vector.shape_cast %2 : vector<4x8x16xf32> to vector<32x16xf32>
    %c0_4 = arith.constant 0 : index
    %c0_5 = arith.constant 0 : index
    %c0_6 = arith.constant 0 : index
    %4 = vector.load %arg2[%c0_4, %c0_5, %c0_6] : memref<9x16x128xf32, #tpu.memory_space<vmem>>, vector<1x16x128xf32>
    %5 = vector.shape_cast %4 : vector<1x16x128xf32> to vector<16x128xf32>
    %cst_7 = arith.constant dense<0.000000e+00> : vector<32x128xf32>
    %6 = tpu.matmul %3, %5, %cst_7 {dimension_numbers = #tpu.dot_dimension_numbers<[1], [0], [0], [1], [0, 0, 1, 1], [], []>} : vector<32x16xf32>, vector<16x128xf32>, vector<32x128xf32> -> vector<32x128xf32>
    %7 = arith.addf %0, %6 : vector<32x128xf32>
    %c0_8 = arith.constant 0 : index
    %c1 = arith.constant 1 : index
    %c0_9 = arith.constant 0 : index
    %c0_10 = arith.constant 0 : index
    %c0_11 = arith.constant 0 : index
    %8 = vector.load %arg1[%c0_8, %c1, %c0_9, %c0_10, %c0_11] : memref<1x4x5x9x16xf32, #tpu.memory_space<vmem>>, vector<1x1x4x8x16xf32>
    %9 = vector.shape_cast %8 : vector<1x1x4x8x16xf32> to vector<4x8x16xf32>
    %10 = vector.shape_cast %9 : vector<4x8x16xf32> to vector<32x16xf32>
    %c1_12 = arith.constant 1 : index
    %c0_13 = arith.constant 0 : index
    %c0_14 = arith.constant 0 : index
    %11 = vector.load %arg2[%c1_12, %c0_13, %c0_14] : memref<9x16x128xf32, #tpu.memory_space<vmem>>, vector<1x16x128xf32>
    %12 = vector.shape_cast %11 : vector<1x16x128xf32> to vector<16x128xf32>
    %cst_15 = arith.constant dense<0.000000e+00> : vector<32x128xf32>
    %13 = tpu.matmul %10, %12, %cst_15 {dimension_numbers = #tpu.dot_dimension_numbers<[1], [0], [0], [1], [0, 0, 1, 1], [], []>} : vector<32x16xf32>, vector<16x128xf32>, vector<32x128xf32> -> vector<32x128xf32>
    %14 = arith.addf %7, %13 : vector<32x128xf32>
    %c0_16 = arith.constant 0 : index
    %c0_17 = arith.constant 0 : index
    %c0_18 = arith.constant 0 : index
    %c1_19 = arith.constant 1 : index
    %c0_20 = arith.constant 0 : index
    %15 = vector.load %arg1[%c0_16, %c0_17, %c0_18, %c1_19, %c0_20] : memref<1x4x5x9x16xf32, #tpu.memory_space<vmem>>, vector<1x1x4x8x16xf32>
    %16 = vector.shape_cast %15 : vector<1x1x4x8x16xf32> to vector<4x8x16xf32>
    %17 = vector.shape_cast %16 : vector<4x8x16xf32> to vector<32x16xf32>
    %c2 = arith.constant 2 : index
    %c0_21 = arith.constant 0 : index
    %c0_22 = arith.constant 0 : index
    %18 = vector.load %arg2[%c2, %c0_21, %c0_22] : memref<9x16x128xf32, #tpu.memory_space<vmem>>, vector<1x16x128xf32>
    %19 = vector.shape_cast %18 : vector<1x16x128xf32> to vector<16x128xf32>
    %cst_23 = arith.constant dense<0.000000e+00> : vector<32x128xf32>
    %20 = tpu.matmul %17, %19, %cst_23 {dimension_numbers = #tpu.dot_dimension_numbers<[1], [0], [0], [1], [0, 0, 1, 1], [], []>} : vector<32x16xf32>, vector<16x128xf32>, vector<32x128xf32> -> vector<32x128xf32>
    %21 = arith.addf %14, %20 : vector<32x128xf32>
    %c0_24 = arith.constant 0 : index
    %c2_25 = arith.constant 2 : index
    %c0_26 = arith.constant 0 : index
    %c0_27 = arith.constant 0 : index
    %c0_28 = arith.constant 0 : index
    %22 = vector.load %arg1[%c0_24, %c2_25, %c0_26, %c0_27, %c0_28] : memref<1x4x5x9x16xf32, #tpu.memory_space<vmem>>, vector<1x1x4x8x16xf32>
    %23 = vector.shape_cast %22 : vector<1x1x4x8x16xf32> to vector<4x8x16xf32>
    %24 = vector.shape_cast %23 : vector<4x8x16xf32> to vector<32x16xf32>
    %c3 = arith.constant 3 : index
    %c0_29 = arith.constant 0 : index
    %c0_30 = arith.constant 0 : index
    %25 = vector.load %arg2[%c3, %c0_29, %c0_30] : memref<9x16x128xf32, #tpu.memory_space<vmem>>, vector<1x16x128xf32>
    %26 = vector.shape_cast %25 : vector<1x16x128xf32> to vector<16x128xf32>
    %cst_31 = arith.constant dense<0.000000e+00> : vector<32x128xf32>
    %27 = tpu.matmul %24, %26, %cst_31 {dimension_numbers = #tpu.dot_dimension_numbers<[1], [0], [0], [1], [0, 0, 1, 1], [], []>} : vector<32x16xf32>, vector<16x128xf32>, vector<32x128xf32> -> vector<32x128xf32>
    %28 = arith.addf %21, %27 : vector<32x128xf32>
    %c0_32 = arith.constant 0 : index
    %c3_33 = arith.constant 3 : index
    %c0_34 = arith.constant 0 : index
    %c0_35 = arith.constant 0 : index
    %c0_36 = arith.constant 0 : index
    %29 = vector.load %arg1[%c0_32, %c3_33, %c0_34, %c0_35, %c0_36] : memref<1x4x5x9x16xf32, #tpu.memory_space<vmem>>, vector<1x1x4x8x16xf32>
    %30 = vector.shape_cast %29 : vector<1x1x4x8x16xf32> to vector<4x8x16xf32>
    %31 = vector.shape_cast %30 : vector<4x8x16xf32> to vector<32x16xf32>
    %c4 = arith.constant 4 : index
    %c0_37 = arith.constant 0 : index
    %c0_38 = arith.constant 0 : index
    %32 = vector.load %arg2[%c4, %c0_37, %c0_38] : memref<9x16x128xf32, #tpu.memory_space<vmem>>, vector<1x16x128xf32>
    %33 = vector.shape_cast %32 : vector<1x16x128xf32> to vector<16x128xf32>
    %cst_39 = arith.constant dense<0.000000e+00> : vector<32x128xf32>
    %34 = tpu.matmul %31, %33, %cst_39 {dimension_numbers = #tpu.dot_dimension_numbers<[1], [0], [0], [1], [0, 0, 1, 1], [], []>} : vector<32x16xf32>, vector<16x128xf32>, vector<32x128xf32> -> vector<32x128xf32>
    %35 = arith.addf %28, %34 : vector<32x128xf32>
    %c0_40 = arith.constant 0 : index
    %c2_41 = arith.constant 2 : index
    %c0_42 = arith.constant 0 : index
    %c1_43 = arith.constant 1 : index
    %c0_44 = arith.constant 0 : index
    %36 = vector.load %arg1[%c0_40, %c2_41, %c0_42, %c1_43, %c0_44] : memref<1x4x5x9x16xf32, #tpu.memory_space<vmem>>, vector<1x1x4x8x16xf32>
    %37 = vector.shape_cast %36 : vector<1x1x4x8x16xf32> to vector<4x8x16xf32>
    %38 = vector.shape_cast %37 : vector<4x8x16xf32> to vector<32x16xf32>
    %c5 = arith.constant 5 : index
    %c0_45 = arith.constant 0 : index
    %c0_46 = arith.constant 0 : index
    %39 = vector.load %arg2[%c5, %c0_45, %c0_46] : memref<9x16x128xf32, #tpu.memory_space<vmem>>, vector<1x16x128xf32>
    %40 = vector.shape_cast %39 : vector<1x16x128xf32> to vector<16x128xf32>
    %cst_47 = arith.constant dense<0.000000e+00> : vector<32x128xf32>
    %41 = tpu.matmul %38, %40, %cst_47 {dimension_numbers = #tpu.dot_dimension_numbers<[1], [0], [0], [1], [0, 0, 1, 1], [], []>} : vector<32x16xf32>, vector<16x128xf32>, vector<32x128xf32> -> vector<32x128xf32>
    %42 = arith.addf %35, %41 : vector<32x128xf32>
    %c0_48 = arith.constant 0 : index
    %c0_49 = arith.constant 0 : index
    %c1_50 = arith.constant 1 : index
    %c0_51 = arith.constant 0 : index
    %c0_52 = arith.constant 0 : index
    %43 = vector.load %arg1[%c0_48, %c0_49, %c1_50, %c0_51, %c0_52] : memref<1x4x5x9x16xf32, #tpu.memory_space<vmem>>, vector<1x1x4x8x16xf32>
    %44 = vector.shape_cast %43 : vector<1x1x4x8x16xf32> to vector<4x8x16xf32>
    %45 = vector.shape_cast %44 : vector<4x8x16xf32> to vector<32x16xf32>
    %c6 = arith.constant 6 : index
    %c0_53 = arith.constant 0 : index
    %c0_54 = arith.constant 0 : index
    %46 = vector.load %arg2[%c6, %c0_53, %c0_54] : memref<9x16x128xf32, #tpu.memory_space<vmem>>, vector<1x16x128xf32>
    %47 = vector.shape_cast %46 : vector<1x16x128xf32> to vector<16x128xf32>
    %cst_55 = arith.constant dense<0.000000e+00> : vector<32x128xf32>
    %48 = tpu.matmul %45, %47, %cst_55 {dimension_numbers = #tpu.dot_dimension_numbers<[1], [0], [0], [1], [0, 0, 1, 1], [], []>} : vector<32x16xf32>, vector<16x128xf32>, vector<32x128xf32> -> vector<32x128xf32>
    %49 = arith.addf %42, %48 : vector<32x128xf32>
    %c0_56 = arith.constant 0 : index
    %c1_57 = arith.constant 1 : index
    %c1_58 = arith.constant 1 : index
    %c0_59 = arith.constant 0 : index
    %c0_60 = arith.constant 0 : index
    %50 = vector.load %arg1[%c0_56, %c1_57, %c1_58, %c0_59, %c0_60] : memref<1x4x5x9x16xf32, #tpu.memory_space<vmem>>, vector<1x1x4x8x16xf32>
    %51 = vector.shape_cast %50 : vector<1x1x4x8x16xf32> to vector<4x8x16xf32>
    %52 = vector.shape_cast %51 : vector<4x8x16xf32> to vector<32x16xf32>
    %c7 = arith.constant 7 : index
    %c0_61 = arith.constant 0 : index
    %c0_62 = arith.constant 0 : index
    %53 = vector.load %arg2[%c7, %c0_61, %c0_62] : memref<9x16x128xf32, #tpu.memory_space<vmem>>, vector<1x16x128xf32>
    %54 = vector.shape_cast %53 : vector<1x16x128xf32> to vector<16x128xf32>
    %cst_63 = arith.constant dense<0.000000e+00> : vector<32x128xf32>
    %55 = tpu.matmul %52, %54, %cst_63 {dimension_numbers = #tpu.dot_dimension_numbers<[1], [0], [0], [1], [0, 0, 1, 1], [], []>} : vector<32x16xf32>, vector<16x128xf32>, vector<32x128xf32> -> vector<32x128xf32>
    %56 = arith.addf %49, %55 : vector<32x128xf32>
    %c0_64 = arith.constant 0 : index
    %c0_65 = arith.constant 0 : index
    %c1_66 = arith.constant 1 : index
    %c1_67 = arith.constant 1 : index
    %c0_68 = arith.constant 0 : index
    %57 = vector.load %arg1[%c0_64, %c0_65, %c1_66, %c1_67, %c0_68] : memref<1x4x5x9x16xf32, #tpu.memory_space<vmem>>, vector<1x1x4x8x16xf32>
    %58 = vector.shape_cast %57 : vector<1x1x4x8x16xf32> to vector<4x8x16xf32>
    %59 = vector.shape_cast %58 : vector<4x8x16xf32> to vector<32x16xf32>
    %c8 = arith.constant 8 : index
    %c0_69 = arith.constant 0 : index
    %c0_70 = arith.constant 0 : index
    %60 = vector.load %arg2[%c8, %c0_69, %c0_70] : memref<9x16x128xf32, #tpu.memory_space<vmem>>, vector<1x16x128xf32>
    %61 = vector.shape_cast %60 : vector<1x16x128xf32> to vector<16x128xf32>
    %cst_71 = arith.constant dense<0.000000e+00> : vector<32x128xf32>
    %62 = tpu.matmul %59, %61, %cst_71 {dimension_numbers = #tpu.dot_dimension_numbers<[1], [0], [0], [1], [0, 0, 1, 1], [], []>} : vector<32x16xf32>, vector<16x128xf32>, vector<32x128xf32> -> vector<32x128xf32>
    %63 = arith.addf %56, %62 : vector<32x128xf32>
    %c0_72 = arith.constant 0 : index
    %c0_73 = arith.constant 0 : index
    %64 = vector.load %arg3[%c0_72, %c0_73] : memref<1x128xf32, #tpu.memory_space<vmem>>, vector<1x128xf32>
    %65 = vector.broadcast %64 : vector<1x128xf32> to vector<32x128xf32>
    %66 = arith.addf %63, %65 : vector<32x128xf32>
    %cst_74 = arith.constant 0.000000e+00 : f32
    %67 = vector.broadcast %cst_74 : f32 to vector<32x128xf32>
    %68 = arith.cmpf ogt, %66, %67 : vector<32x128xf32>
    %cst_75 = arith.constant 1.000000e-01 : f32
    %69 = vector.broadcast %cst_75 : f32 to vector<32x128xf32>
    %70 = arith.mulf %69, %66 : vector<32x128xf32>
    %71 = arith.select %68, %66, %70 : vector<32x128xi1>, vector<32x128xf32>
    %c0_76 = arith.constant 0 : index
    %c0_77 = arith.constant 0 : index
    %c0_78 = arith.constant 0 : index
    %72 = vector.load %arg4[%c0_76, %c0_77, %c0_78] : memref<1x32x128xf32, #tpu.memory_space<vmem>>, vector<1x32x128xf32>
    %73 = vector.shape_cast %72 : vector<1x32x128xf32> to vector<32x128xf32>
    %74 = vector.shape_cast %71 : vector<32x128xf32> to vector<1x32x128xf32>
    tpu.vector_store %arg4[%c0_76, %c0_77, %c0_78], %74 {strides = array<i32>} : memref<1x32x128xf32, #tpu.memory_space<vmem>>, vector<1x32x128xf32>,
    return
  }
  func.func @transform_0(%arg0: i32) -> (i32, i32, i32, i32, i32) {
    %c0_i32 = arith.constant 0 : i32
    %c0_i32_0 = arith.constant 0 : i32
    %c0_i32_1 = arith.constant 0 : i32
    %c0_i32_2 = arith.constant 0 : i32
    %c0_i32_3 = arith.constant 0 : i32
    return %arg0, %c0_i32, %c0_i32_0, %c0_i32_1, %c0_i32_2 : i32, i32, i32, i32, i32
  }
  func.func @transform_1(%arg0: i32) -> (i32, i32, i32) {
    %c0_i32 = arith.constant 0 : i32
    %c0_i32_0 = arith.constant 0 : i32
    %c0_i32_1 = arith.constant 0 : i32
    %c0_i32_2 = arith.constant 0 : i32
    return %c0_i32, %c0_i32_0, %c0_i32_1 : i32, i32, i32
  }
  func.func @transform_2(%arg0: i32) -> (i32, i32) {
    %c0_i32 = arith.constant 0 : i32
    %c0_i32_0 = arith.constant 0 : i32
    %c0_i32_1 = arith.constant 0 : i32
    return %c0_i32, %c0_i32_0 : i32, i32
  }
  func.func @transform_3(%arg0: i32) -> (i32, i32, i32) {
    %c0_i32 = arith.constant 0 : i32
    %c0_i32_0 = arith.constant 0 : i32
    %c0_i32_1 = arith.constant 0 : i32
    return %arg0, %c0_i32, %c0_i32_0 : i32, i32, i32
  }
}

module attributes {stable_mosaic.version = 11 : i64} {
  func.func @_yolo_head_kernel(%arg0: i32, %arg1: memref<1x4x8x32xf32, #tpu.memory_space<vmem>>, %arg2: memref<1x32x128xf32, #tpu.memory_space<vmem>>, %arg3: memref<1x128xf32, #tpu.memory_space<vmem>>, %arg4: memref<1x128xf32, #tpu.memory_space<vmem>>, %arg5: memref<1x128xf32, #tpu.memory_space<vmem>>, %arg6: memref<32x128xf32, #tpu.memory_space<vmem>>, %arg7: memref<1x32x128xf32, #tpu.memory_space<vmem>>, %arg8: memref<1x32x128xf32, #tpu.memory_space<vmem>>) attributes {dimension_semantics = [#tpu.dimension_semantics<parallel>], iteration_bounds = array<i64: 2>, scalar_prefetch = 0 : i64, scratch_operands = 0 : i64, tpu.core_type = #tpu.core_type<tc>, window_params = [{transform_indices = @transform_0, window_bounds = array<i64: 1, 4, 8, 32>}, {pipeline_mode = #tpu.pipeline_mode<synchronous>, transform_indices = @transform_1, window_bounds = array<i64: 1, 32, 128>}, {pipeline_mode = #tpu.pipeline_mode<synchronous>, transform_indices = @transform_2, window_bounds = array<i64: 1, 128>}, {pipeline_mode = #tpu.pipeline_mode<synchronous>, transform_indices = @transform_3, window_bounds = array<i64: 1, 128>}, {pipeline_mode = #tpu.pipeline_mode<synchronous>, transform_indices = @transform_4, window_bounds = array<i64: 1, 128>}, {pipeline_mode = #tpu.pipeline_mode<synchronous>, transform_indices = @transform_5, window_bounds = array<i64: 32, 128>}, {transform_indices = @transform_6, window_bounds = array<i64: 1, 32, 128>}, {transform_indices = @transform_7, window_bounds = array<i64: 1, 32, 128>}]} {
    %c0 = arith.constant 0 : index
    %c0_0 = arith.constant 0 : index
    %c0_1 = arith.constant 0 : index
    %c0_2 = arith.constant 0 : index
    %0 = vector.load %arg1[%c0, %c0_0, %c0_1, %c0_2] : memref<1x4x8x32xf32, #tpu.memory_space<vmem>>, vector<1x4x8x32xf32>
    %1 = vector.shape_cast %0 : vector<1x4x8x32xf32> to vector<4x8x32xf32>
    %2 = vector.shape_cast %1 : vector<4x8x32xf32> to vector<32x32xf32>
    %c0_3 = arith.constant 0 : index
    %c0_4 = arith.constant 0 : index
    %c0_5 = arith.constant 0 : index
    %3 = vector.load %arg2[%c0_3, %c0_4, %c0_5] : memref<1x32x128xf32, #tpu.memory_space<vmem>>, vector<1x32x128xf32>
    %4 = vector.shape_cast %3 : vector<1x32x128xf32> to vector<32x128xf32>
    %cst = arith.constant dense<0.000000e+00> : vector<32x128xf32>
    %5 = tpu.matmul %2, %4, %cst {dimension_numbers = #tpu.dot_dimension_numbers<[1], [0], [0], [1], [0, 0, 1, 1], [], []>} : vector<32x32xf32>, vector<32x128xf32>, vector<32x128xf32> -> vector<32x128xf32>
    %c0_6 = arith.constant 0 : index
    %c0_7 = arith.constant 0 : index
    %6 = vector.load %arg3[%c0_6, %c0_7] : memref<1x128xf32, #tpu.memory_space<vmem>>, vector<1x128xf32>
    %7 = vector.broadcast %6 : vector<1x128xf32> to vector<32x128xf32>
    %8 = arith.addf %5, %7 : vector<32x128xf32>
    %c0_8 = arith.constant 0 : index
    %c0_9 = arith.constant 0 : index
    %c0_10 = arith.constant 0 : index
    %9 = vector.load %arg7[%c0_8, %c0_9, %c0_10] : memref<1x32x128xf32, #tpu.memory_space<vmem>>, vector<1x32x128xf32>
    %10 = vector.shape_cast %9 : vector<1x32x128xf32> to vector<32x128xf32>
    %11 = vector.shape_cast %8 : vector<32x128xf32> to vector<1x32x128xf32>
    tpu.vector_store %arg7[%c0_8, %c0_9, %c0_10], %11 {strides = array<i32>} : memref<1x32x128xf32, #tpu.memory_space<vmem>>, vector<1x32x128xf32>,
    %12 = math.exp %8 : vector<32x128xf32>
    %cst_11 = arith.constant 1.000000e+00 : f32
    %13 = vector.broadcast %cst_11 : f32 to vector<32x128xf32>
    %14 = arith.addf %13, %12 : vector<32x128xf32>
    %15 = tpu.reciprocal %14 {approx = true} : vector<32x128xf32> -> vector<32x128xf32>
    %cst_12 = arith.constant 1.000000e+00 : f32
    %16 = vector.broadcast %cst_12 : f32 to vector<32x128xf32>
    %17 = arith.subf %16, %15 : vector<32x128xf32>
    %c0_13 = arith.constant 0 : index
    %c0_14 = arith.constant 0 : index
    %18 = vector.load %arg4[%c0_13, %c0_14] : memref<1x128xf32, #tpu.memory_space<vmem>>, vector<1x128xf32>
    %19 = vector.broadcast %18 : vector<1x128xf32> to vector<32x128xf32>
    %20 = arith.mulf %19, %17 : vector<32x128xf32>
    %c0_15 = arith.constant 0 : index
    %c0_16 = arith.constant 0 : index
    %21 = vector.load %arg5[%c0_15, %c0_16] : memref<1x128xf32, #tpu.memory_space<vmem>>, vector<1x128xf32>
    %22 = vector.broadcast %21 : vector<1x128xf32> to vector<32x128xf32>
    %23 = arith.mulf %22, %12 : vector<32x128xf32>
    %24 = arith.addf %20, %23 : vector<32x128xf32>
    %c0_17 = arith.constant 0 : index
    %c0_18 = arith.constant 0 : index
    %25 = vector.load %arg6[%c0_17, %c0_18] : memref<32x128xf32, #tpu.memory_space<vmem>>, vector<32x128xf32>
    %26 = arith.addf %24, %25 : vector<32x128xf32>
    %c0_19 = arith.constant 0 : index
    %c0_20 = arith.constant 0 : index
    %c0_21 = arith.constant 0 : index
    %27 = vector.load %arg8[%c0_19, %c0_20, %c0_21] : memref<1x32x128xf32, #tpu.memory_space<vmem>>, vector<1x32x128xf32>
    %28 = vector.shape_cast %27 : vector<1x32x128xf32> to vector<32x128xf32>
    %29 = vector.shape_cast %26 : vector<32x128xf32> to vector<1x32x128xf32>
    tpu.vector_store %arg8[%c0_19, %c0_20, %c0_21], %29 {strides = array<i32>} : memref<1x32x128xf32, #tpu.memory_space<vmem>>, vector<1x32x128xf32>,
    return
  }
  func.func @transform_0(%arg0: i32) -> (i32, i32, i32, i32) {
    %c0_i32 = arith.constant 0 : i32
    %c0_i32_0 = arith.constant 0 : i32
    %c0_i32_1 = arith.constant 0 : i32
    %c0_i32_2 = arith.constant 0 : i32
    return %arg0, %c0_i32, %c0_i32_0, %c0_i32_1 : i32, i32, i32, i32
  }
  func.func @transform_1(%arg0: i32) -> (i32, i32, i32) {
    %c0_i32 = arith.constant 0 : i32
    %c0_i32_0 = arith.constant 0 : i32
    %c0_i32_1 = arith.constant 0 : i32
    %c0_i32_2 = arith.constant 0 : i32
    return %c0_i32, %c0_i32_0, %c0_i32_1 : i32, i32, i32
  }
  func.func @transform_2(%arg0: i32) -> (i32, i32) {
    %c0_i32 = arith.constant 0 : i32
    %c0_i32_0 = arith.constant 0 : i32
    %c0_i32_1 = arith.constant 0 : i32
    return %c0_i32, %c0_i32_0 : i32, i32
  }
  func.func @transform_3(%arg0: i32) -> (i32, i32) {
    %c0_i32 = arith.constant 0 : i32
    %c0_i32_0 = arith.constant 0 : i32
    %c0_i32_1 = arith.constant 0 : i32
    return %c0_i32, %c0_i32_0 : i32, i32
  }
  func.func @transform_4(%arg0: i32) -> (i32, i32) {
    %c0_i32 = arith.constant 0 : i32
    %c0_i32_0 = arith.constant 0 : i32
    %c0_i32_1 = arith.constant 0 : i32
    return %c0_i32, %c0_i32_0 : i32, i32
  }
  func.func @transform_5(%arg0: i32) -> (i32, i32) {
    %c0_i32 = arith.constant 0 : i32
    %c0_i32_0 = arith.constant 0 : i32
    %c0_i32_1 = arith.constant 0 : i32
    return %c0_i32, %c0_i32_0 : i32, i32
  }
  func.func @transform_6(%arg0: i32) -> (i32, i32, i32) {
    %c0_i32 = arith.constant 0 : i32
    %c0_i32_0 = arith.constant 0 : i32
    %c0_i32_1 = arith.constant 0 : i32
    return %arg0, %c0_i32, %c0_i32_0 : i32, i32, i32
  }
  func.func @transform_7(%arg0: i32) -> (i32, i32, i32) {
    %c0_i32 = arith.constant 0 : i32
    %c0_i32_0 = arith.constant 0 : i32
    %c0_i32_1 = arith.constant 0 : i32
    return %arg0, %c0_i32, %c0_i32_0 : i32, i32, i32
  }
}

module attributes {stable_mosaic.version = 11 : i64} {
  func.func @_yolo_head_kernel(%arg0: i32, %arg1: memref<1x9x9x48xf32, #tpu.memory_space<vmem>>, %arg2: memref<1x48x128xf32, #tpu.memory_space<vmem>>, %arg3: memref<1x128xf32, #tpu.memory_space<vmem>>, %arg4: memref<1x128xf32, #tpu.memory_space<vmem>>, %arg5: memref<1x128xf32, #tpu.memory_space<vmem>>, %arg6: memref<64x128xf32, #tpu.memory_space<vmem>>, %arg7: memref<1x64x128xf32, #tpu.memory_space<vmem>>, %arg8: memref<1x64x128xf32, #tpu.memory_space<vmem>>) attributes {dimension_semantics = [#tpu.dimension_semantics<parallel>], iteration_bounds = array<i64: 2>, scalar_prefetch = 0 : i64, scratch_operands = 0 : i64, tpu.core_type = #tpu.core_type<tc>, window_params = [{transform_indices = @transform_0, window_bounds = array<i64: 1, 9, 9, 48>}, {pipeline_mode = #tpu.pipeline_mode<synchronous>, transform_indices = @transform_1, window_bounds = array<i64: 1, 48, 128>}, {pipeline_mode = #tpu.pipeline_mode<synchronous>, transform_indices = @transform_2, window_bounds = array<i64: 1, 128>}, {pipeline_mode = #tpu.pipeline_mode<synchronous>, transform_indices = @transform_3, window_bounds = array<i64: 1, 128>}, {pipeline_mode = #tpu.pipeline_mode<synchronous>, transform_indices = @transform_4, window_bounds = array<i64: 1, 128>}, {pipeline_mode = #tpu.pipeline_mode<synchronous>, transform_indices = @transform_5, window_bounds = array<i64: 64, 128>}, {transform_indices = @transform_6, window_bounds = array<i64: 1, 64, 128>}, {transform_indices = @transform_7, window_bounds = array<i64: 1, 64, 128>}]} {
    %c0 = arith.constant 0 : index
    %c0_0 = arith.constant 0 : index
    %c0_1 = arith.constant 0 : index
    %c0_2 = arith.constant 0 : index
    %0 = vector.load %arg1[%c0, %c0_0, %c0_1, %c0_2] : memref<1x9x9x48xf32, #tpu.memory_space<vmem>>, vector<1x8x8x48xf32>
    %1 = vector.shape_cast %0 : vector<1x8x8x48xf32> to vector<8x8x48xf32>
    %c0_3 = arith.constant 0 : index
    %c0_4 = arith.constant 0 : index
    %c1 = arith.constant 1 : index
    %c0_5 = arith.constant 0 : index
    %2 = vector.load %arg1[%c0_3, %c0_4, %c1, %c0_5] : memref<1x9x9x48xf32, #tpu.memory_space<vmem>>, vector<1x8x8x48xf32>
    %3 = vector.shape_cast %2 : vector<1x8x8x48xf32> to vector<8x8x48xf32>
    %c0_6 = arith.constant 0 : index
    %c1_7 = arith.constant 1 : index
    %c0_8 = arith.constant 0 : index
    %c0_9 = arith.constant 0 : index
    %4 = vector.load %arg1[%c0_6, %c1_7, %c0_8, %c0_9] : memref<1x9x9x48xf32, #tpu.memory_space<vmem>>, vector<1x8x8x48xf32>
    %5 = vector.shape_cast %4 : vector<1x8x8x48xf32> to vector<8x8x48xf32>
    %c0_10 = arith.constant 0 : index
    %c1_11 = arith.constant 1 : index
    %c1_12 = arith.constant 1 : index
    %c0_13 = arith.constant 0 : index
    %6 = vector.load %arg1[%c0_10, %c1_11, %c1_12, %c0_13] : memref<1x9x9x48xf32, #tpu.memory_space<vmem>>, vector<1x8x8x48xf32>
    %7 = vector.shape_cast %6 : vector<1x8x8x48xf32> to vector<8x8x48xf32>
    %8 = arith.maximumf %1, %3 : vector<8x8x48xf32>
    %9 = arith.maximumf %5, %7 : vector<8x8x48xf32>
    %10 = arith.maximumf %8, %9 : vector<8x8x48xf32>
    %11 = vector.shape_cast %10 : vector<8x8x48xf32> to vector<64x48xf32>
    %c0_14 = arith.constant 0 : index
    %c0_15 = arith.constant 0 : index
    %c0_16 = arith.constant 0 : index
    %12 = vector.load %arg2[%c0_14, %c0_15, %c0_16] : memref<1x48x128xf32, #tpu.memory_space<vmem>>, vector<1x48x128xf32>
    %13 = vector.shape_cast %12 : vector<1x48x128xf32> to vector<48x128xf32>
    %cst = arith.constant dense<0.000000e+00> : vector<64x128xf32>
    %14 = tpu.matmul %11, %13, %cst {dimension_numbers = #tpu.dot_dimension_numbers<[1], [0], [0], [1], [0, 0, 1, 1], [], []>} : vector<64x48xf32>, vector<48x128xf32>, vector<64x128xf32> -> vector<64x128xf32>
    %c0_17 = arith.constant 0 : index
    %c0_18 = arith.constant 0 : index
    %15 = vector.load %arg3[%c0_17, %c0_18] : memref<1x128xf32, #tpu.memory_space<vmem>>, vector<1x128xf32>
    %16 = vector.broadcast %15 : vector<1x128xf32> to vector<64x128xf32>
    %17 = arith.addf %14, %16 : vector<64x128xf32>
    %c0_19 = arith.constant 0 : index
    %c0_20 = arith.constant 0 : index
    %c0_21 = arith.constant 0 : index
    %18 = vector.load %arg7[%c0_19, %c0_20, %c0_21] : memref<1x64x128xf32, #tpu.memory_space<vmem>>, vector<1x64x128xf32>
    %19 = vector.shape_cast %18 : vector<1x64x128xf32> to vector<64x128xf32>
    %20 = vector.shape_cast %17 : vector<64x128xf32> to vector<1x64x128xf32>
    tpu.vector_store %arg7[%c0_19, %c0_20, %c0_21], %20 {strides = array<i32>} : memref<1x64x128xf32, #tpu.memory_space<vmem>>, vector<1x64x128xf32>,
    %21 = math.exp %17 : vector<64x128xf32>
    %cst_22 = arith.constant 1.000000e+00 : f32
    %22 = vector.broadcast %cst_22 : f32 to vector<64x128xf32>
    %23 = arith.addf %22, %21 : vector<64x128xf32>
    %24 = tpu.reciprocal %23 {approx = true} : vector<64x128xf32> -> vector<64x128xf32>
    %cst_23 = arith.constant 1.000000e+00 : f32
    %25 = vector.broadcast %cst_23 : f32 to vector<64x128xf32>
    %26 = arith.subf %25, %24 : vector<64x128xf32>
    %c0_24 = arith.constant 0 : index
    %c0_25 = arith.constant 0 : index
    %27 = vector.load %arg4[%c0_24, %c0_25] : memref<1x128xf32, #tpu.memory_space<vmem>>, vector<1x128xf32>
    %28 = vector.broadcast %27 : vector<1x128xf32> to vector<64x128xf32>
    %29 = arith.mulf %28, %26 : vector<64x128xf32>
    %c0_26 = arith.constant 0 : index
    %c0_27 = arith.constant 0 : index
    %30 = vector.load %arg5[%c0_26, %c0_27] : memref<1x128xf32, #tpu.memory_space<vmem>>, vector<1x128xf32>
    %31 = vector.broadcast %30 : vector<1x128xf32> to vector<64x128xf32>
    %32 = arith.mulf %31, %21 : vector<64x128xf32>
    %33 = arith.addf %29, %32 : vector<64x128xf32>
    %c0_28 = arith.constant 0 : index
    %c0_29 = arith.constant 0 : index
    %34 = vector.load %arg6[%c0_28, %c0_29] : memref<64x128xf32, #tpu.memory_space<vmem>>, vector<64x128xf32>
    %35 = arith.addf %33, %34 : vector<64x128xf32>
    %c0_30 = arith.constant 0 : index
    %c0_31 = arith.constant 0 : index
    %c0_32 = arith.constant 0 : index
    %36 = vector.load %arg8[%c0_30, %c0_31, %c0_32] : memref<1x64x128xf32, #tpu.memory_space<vmem>>, vector<1x64x128xf32>
    %37 = vector.shape_cast %36 : vector<1x64x128xf32> to vector<64x128xf32>
    %38 = vector.shape_cast %35 : vector<64x128xf32> to vector<1x64x128xf32>
    tpu.vector_store %arg8[%c0_30, %c0_31, %c0_32], %38 {strides = array<i32>} : memref<1x64x128xf32, #tpu.memory_space<vmem>>, vector<1x64x128xf32>,
    return
  }
  func.func @transform_0(%arg0: i32) -> (i32, i32, i32, i32) {
    %c0_i32 = arith.constant 0 : i32
    %c0_i32_0 = arith.constant 0 : i32
    %c0_i32_1 = arith.constant 0 : i32
    %c0_i32_2 = arith.constant 0 : i32
    return %arg0, %c0_i32, %c0_i32_0, %c0_i32_1 : i32, i32, i32, i32
  }
  func.func @transform_1(%arg0: i32) -> (i32, i32, i32) {
    %c0_i32 = arith.constant 0 : i32
    %c0_i32_0 = arith.constant 0 : i32
    %c0_i32_1 = arith.constant 0 : i32
    %c0_i32_2 = arith.constant 0 : i32
    return %c0_i32, %c0_i32_0, %c0_i32_1 : i32, i32, i32
  }
  func.func @transform_2(%arg0: i32) -> (i32, i32) {
    %c0_i32 = arith.constant 0 : i32
    %c0_i32_0 = arith.constant 0 : i32
    %c0_i32_1 = arith.constant 0 : i32
    return %c0_i32, %c0_i32_0 : i32, i32
  }
  func.func @transform_3(%arg0: i32) -> (i32, i32) {
    %c0_i32 = arith.constant 0 : i32
    %c0_i32_0 = arith.constant 0 : i32
    %c0_i32_1 = arith.constant 0 : i32
    return %c0_i32, %c0_i32_0 : i32, i32
  }
  func.func @transform_4(%arg0: i32) -> (i32, i32) {
    %c0_i32 = arith.constant 0 : i32
    %c0_i32_0 = arith.constant 0 : i32
    %c0_i32_1 = arith.constant 0 : i32
    return %c0_i32, %c0_i32_0 : i32, i32
  }
  func.func @transform_5(%arg0: i32) -> (i32, i32) {
    %c0_i32 = arith.constant 0 : i32
    %c0_i32_0 = arith.constant 0 : i32
    %c0_i32_1 = arith.constant 0 : i32
    return %c0_i32, %c0_i32_0 : i32, i32
  }
  func.func @transform_6(%arg0: i32) -> (i32, i32, i32) {
    %c0_i32 = arith.constant 0 : i32
    %c0_i32_0 = arith.constant 0 : i32
    %c0_i32_1 = arith.constant 0 : i32
    return %arg0, %c0_i32, %c0_i32_0 : i32, i32, i32
  }
  func.func @transform_7(%arg0: i32) -> (i32, i32, i32) {
    %c0_i32 = arith.constant 0 : i32
    %c0_i32_0 = arith.constant 0 : i32
    %c0_i32_1 = arith.constant 0 : i32
    return %arg0, %c0_i32, %c0_i32_0 : i32, i32, i32
  }
}

</mosaic_0001>

<bundles_post_ra>
// kernel: darknet_forward.8
= control target key start
LH: loop header
LB: loop body
LE: loop exit
PB: predicated region body
PF: predicated region fallthrough
CT: control target
= control target key end

     0   :  { %s578_s15 = smov 0   ;;  %s640_s0 = inlined_call_operand.vmem [shape: f32[2,1,8,8,16], index: 0, kind: input, shape index: {}]   ;;  %s641_s1 = inlined_call_operand.vmem [shape: f32[1,16,128], index: 1, kind: input, shape index: {}]   ;;  %s642_s2 = inlined_call_operand.vmem [shape: f32[1,128], index: 2, kind: input, shape index: {}]   ;;  %s643_s3 = inlined_call_operand.vmem [shape: f32[2,64,128], index: 3, kind: input, shape index: {}]   ;;  %s644_s4 = inlined_call_operand.vmem [shape: f32[2,64,128], index: 4, kind: output, shape index: {}]  }
   0x1 LB: > { %s480_s16 = sadd.s32 4294967295, %s551_s15   ;;  %p484_p0 = scmp.ge.s32.totalorder %s551_s15, 1  ;;  %s551_s15 = sphi %s578_s15, %s14_s15  }
   0x2   : > { %p172_p1 = scmp.lt.s32.totalorder %s551_s15, 3 }
   0x4   : > { %p173_p2 = pnand %p484_p0, %p172_p1 }
   0x5   : > { %v226_v0 = vld [vmem:[%s641_s1] sm:$0xff] (!%p173_p2)  ;;  %v227_v1 = vld [vmem:[%s641_s1 + $0x8] sm:$0xff] (!%p173_p2)  ;;  %p203_p3 = scmp.lt.s32.totalorder (!%p173_p2), %s480_s16, 1  ;;  %vm235_vm0 = vcmask (!%p173_p2), 130048  }
   0x6   : > { %176 = sbr.rel (%p173_p2) target bundleno = 246 (0xf6), region = 36  ;;  %v531_v2 = vpack.c.bf16 (!%p173_p2), %v227_v1, %v226_v0  ;;  %v491_v11 = vld [vmem:[%s642_s2] ss:$0 sm:$0xff] (!%p173_p2) }
   0x8   : > { %532 = vmatprep.subr.bf16.mxu0 (!%p173_p2), %v531_v2  ;;  %535 = vmatprep.subr.bf16.mxu1 (!%p173_p2), %v531_v2 }
   0x9   : > { %534 = vmatpush3.bf16.msra.mxu0 (!%p173_p2), %v531_v2  ;;  %536 = vmatpush3.bf16.msra.mxu1 (!%p173_p2), %v531_v2 }
   0xd   : > { %s646_s16 = smov (!%p203_p3, %s480_s16), 1 }
   0xe   : > { %s592_s21 = sshll.u32 %s646_s16, 6 }
   0xf   : > { %s207_s24 = scalar_lea.vmem %s640_s0, %s592_s21  ;;  %s610_s27 = scalar_lea.vmem %s643_s3, %s592_s21 }
  0x10   : > { %v218_v3 = vld [vmem:[%s207_s24] sm:$0xff]  ;;  %v219_v5 = vld [vmem:[%s207_s24 + $0x8] sm:$0xff]  ;;  %v220_v7 = vld [vmem:[%s207_s24 + $0x10] sm:$0xff]  ;;  %s623_s6 = scalar_lea.vmem %s644_s4, %s592_s21 }
  0x11   : > { %v222_v4 = vld [vmem:[%s207_s24 + $0x20] sm:$0xff]  ;;  %519 = vmatprep.mubr.msk.f32.mxu0 %vm235_vm0, %v218_v3  ;;  %v223_v6 = vld [vmem:[%s207_s24 + $0x28] sm:$0xff]  ;;  %v224_v8 = vld [vmem:[%s207_s24 + $0x30] sm:$0xff] }
  0x12   : > { %525 = vmatprep.mubr.msk.f32.mxu1 %vm235_vm0, %v222_v4  ;;  %520 = vmatmul.mubr.msk.f32.vlgmr.msra.gmra.mrb[0].mxu0 %vm235_vm0, %v219_v5  ;;  %v221_v9 = vld [vmem:[%s207_s24 + $0x18] sm:$0xff]  ;;  %v390_v15 = vld [vmem:[%s610_s27 + $0x8] sm:$0xff]  ;;  %v389_v21 = vld [vmem:[%s610_s27] sm:$0xff] }
  0x13   : > { %526 = vmatmul.mubr.msk.f32.vlgmr.msra.gmra.mrb[0].mxu1 %vm235_vm0, %v223_v6  ;;  %522 = vmatprep.mubr.msk.f32.mxu0 %vm235_vm0, %v220_v7  ;;  %v225_v10 = vld [vmem:[%s207_s24 + $0x38] sm:$0xff]  ;;  %v394_v19 = vld [vmem:[%s610_s27 + $0x28] sm:$0xff]  ;;  %v393_v23 = vld [vmem:[%s610_s27 + $0x20] sm:$0xff] }
  0x14   : > { %528 = vmatprep.mubr.msk.f32.mxu1 %vm235_vm0, %v224_v8  ;;  %v392_v41 = vld [vmem:[%s610_s27 + $0x18] sm:$0xff]  ;;  %v391_v45 = vld [vmem:[%s610_s27 + $0x10] sm:$0xff] }
  0x15   : > { %v396_v43 = vld [vmem:[%s610_s27 + $0x38] sm:$0xff]  ;;  %v395_v47 = vld [vmem:[%s610_s27 + $0x30] sm:$0xff] }
  0x16   : > { %523 = vmatmul.mubr.msk.f32.gmra.mrb[2].mxu0 %vm235_vm0, %v221_v9 }
  0x17   : > { %529 = vmatmul.mubr.msk.f32.gmra.mrb[2].mxu1 %vm235_vm0, %v225_v10 }
  0xe5   : > { %v521_v12 = vpop.f32.mrb[0].mxu0 }
  0xe6   : > { %v527_v13 = vpop.f32.mrb[0].mxu1  ;;  %v332_v14 = vadd.f32 %v521_v12, %v491_v11  ;;  %v326_v17 = vpop.f32.mrb[1].mxu0 }
  0xe7   : > { %v352_v16 = vadd.f32 %v527_v13, %v491_v11  ;;  %v346_v18 = vpop.f32.mrb[1].mxu1  ;;  %v327_v20 = vadd.f32 %v491_v11, %v326_v17 }
  0xe8   : > { %v347_v22 = vadd.f32 %v491_v11, %v346_v18  ;;  %vm366_vm1 = vcmp.gt.f32.partialorder %v332_v14, 0.0  ;;  %v374_v24 = vmul.f32 0.1, %v332_v14 }
  0xe9   : > { %vm370_vm2 = vcmp.gt.f32.partialorder %v352_v16, 0.0  ;;  %v378_v25 = vmul.f32 0.1, %v352_v16  ;;  %vm365_vm3 = vcmp.gt.f32.partialorder %v327_v20, 0.0  ;;  %v373_v26 = vmul.f32 0.1, %v327_v20 }
  0xea   : > { %vm369_vm4 = vcmp.gt.f32.partialorder %v347_v22, 0.0  ;;  %v377_v27 = vmul.f32 0.1, %v347_v22  ;;  %v382_v28 = vsel %vm366_vm1, %v332_v14, %v374_v24  ;;  %v524_v30 = vpop.f32.mrb[2].mxu0  ;;  %v530_v31 = vpop.f32.mrb[2].mxu1 }
  0xeb   : > { %v386_v29 = vsel %vm370_vm2, %v352_v16, %v378_v25  ;;  %v398_v32 = vadd.f32 %v390_v15, %v382_v28  ;;  %v381_v34 = vsel %vm365_vm3, %v327_v20, %v373_v26  ;;  %v336_v36 = vpop.f32.mrb[3].mxu0  ;;  %v356_v37 = vpop.f32.mrb[3].mxu1  ;;  %v342_v40 = vadd.f32 %v524_v30, %v491_v11 }
  0xec   : > { %v402_v33 = vadd.f32 %v394_v19, %v386_v29  ;;  %v385_v35 = vsel %vm369_vm4, %v347_v22, %v377_v27  ;;  %v397_v38 = vadd.f32 %v389_v21, %v381_v34  ;;  %v362_v42 = vadd.f32 %v530_v31, %v491_v11 }
  0xed   : > { %v401_v39 = vadd.f32 %v393_v23, %v385_v35  ;;  %406 = vst [vmem:[%s623_s6 + $0x8] sm:$0xff] %v398_v32  ;;  %v337_v44 = vadd.f32 %v491_v11, %v336_v36  ;;  %v357_v46 = vadd.f32 %v491_v11, %v356_v37  ;;  %vm368_vm5 = vcmp.gt.f32.partialorder %v342_v40, 0.0 }
  0xee   : > { %410 = vst [vmem:[%s623_s6 + $0x28] sm:$0xff] %v402_v33  ;;  %405 = vst [vmem:[%s623_s6] sm:$0xff] %v397_v38  ;;  %v376_v48 = vmul.f32 0.1, %v342_v40  ;;  %vm372_vm6 = vcmp.gt.f32.partialorder %v362_v42, 0.0  ;;  %v380_v49 = vmul.f32 0.1, %v362_v42 }
  0xef   : > { %409 = vst [vmem:[%s623_s6 + $0x20] sm:$0xff] %v401_v39  ;;  %vm367_vm7 = vcmp.gt.f32.partialorder %v337_v44, 0.0  ;;  %v375_v50 = vmul.f32 0.1, %v337_v44  ;;  %vm371_vm8 = vcmp.gt.f32.partialorder %v357_v46, 0.0 }
  0xf0   : > { %v379_v51 = vmul.f32 0.1, %v357_v46  ;;  %v384_v52 = vsel %vm368_vm5, %v342_v40, %v376_v48  ;;  %v388_v53 = vsel %vm372_vm6, %v362_v42, %v380_v49 }
  0xf1   : > { %v400_v54 = vadd.f32 %v392_v41, %v384_v52  ;;  %v404_v55 = vadd.f32 %v396_v43, %v388_v53  ;;  %v383_v56 = vsel %vm367_vm7, %v337_v44, %v375_v50 }
  0xf2   : > { %v387_v57 = vsel %vm371_vm8, %v357_v46, %v379_v51  ;;  %v399_v58 = vadd.f32 %v391_v45, %v383_v56 }
  0xf3   : > { %v403_v59 = vadd.f32 %v395_v47, %v387_v57  ;;  %408 = vst [vmem:[%s623_s6 + $0x18] sm:$0xff] %v400_v54  ;;  %412 = vst [vmem:[%s623_s6 + $0x38] sm:$0xff] %v404_v55 }
  0xf4   : > { %407 = vst [vmem:[%s623_s6 + $0x10] sm:$0xff] %v399_v58 }
  0xf5   : > { %411 = vst [vmem:[%s623_s6 + $0x30] sm:$0xff] %v403_v59 }
  0xf6 PF: > { %s14_s15 = sadd.s32 1, %s551_s15  }
  0xf7   : > { %p11_p4 = scmp.ge.s32.totalorder %s14_s15, 4  }
  0xf9   :  { %13 = sbr.rel (!%p11_p4) target bundleno = 1 (0x1), region = 69 }

// kernel: darknet_forward.7
= control target key start
LH: loop header
LB: loop body
LE: loop exit
PB: predicated region body
PF: predicated region fallthrough
CT: control target
= control target key end

     0   :  { %s2043_s12 = smov 0   ;;  %s2263_s0 = inlined_call_operand.vmem [shape: f32[2,4,9,9,8], index: 0, kind: input, shape index: {}]   ;;  %s2264_s1 = inlined_call_operand.vmem [shape: f32[9,8,128], index: 1, kind: input, shape index: {}]   ;;  %s2265_s2 = inlined_call_operand.vmem [shape: f32[1,128], index: 2, kind: input, shape index: {}]   ;;  %s2266_s3 = inlined_call_operand.vmem [shape: f32[2,64,128], index: 3, kind: output, shape index: {}]  }
   0x1 LB: > { %s1585_s13 = sadd.s32 4294967295, %s2021_s12   ;;  %p1589_p0 = scmp.ge.s32.totalorder %s2021_s12, 1  ;;  %s2021_s12 = sphi %s2043_s12, %s13_s12  }
   0x2   : > { %p137_p1 = scmp.lt.s32.totalorder %s2021_s12, 3 }
   0x4   : > { %p138_p2 = pnand %p1589_p0, %p137_p1 }
   0x5   : > { %v1601_v0 = vld [vmem:[%s2264_s1 + $0x8] sm:$0xff] (!%p138_p2)  ;;  %v2057_v1 = vld [vmem:[%s2264_s1 + $0x20] sm:$0xff] (!%p138_p2)  ;;  %p161_p3 = scmp.lt.s32.totalorder (!%p138_p2), %s1585_s13, 1  ;;  %vm191_vm0 = vcmask (!%p138_p2), 64512   ;;  %v1686_v10 = vld [vmem:[%s2264_s1 + $0x30] sm:$0xff] (!%p138_p2) }
   0x6   : > { %141 = sbr.rel (%p138_p2) target bundleno = 309 (0x135), region = 32  ;;  %v179_v2 = vld [vmem:[%s2264_s1] sm:$0xff] (!%p138_p2)  ;;  %1814 = vmatprep.subr.mxu1 (!%p138_p2), %v1601_v0  ;;  %1870 = vmatprep.subr.mxu0 (!%p138_p2), %v2057_v1  ;;  %v1669_v3 = vld [vmem:[%s2264_s1 + $0x28] sm:$0xff] (!%p138_p2)  ;;  %v1618_v11 = vld [vmem:[%s2264_s1 + $0x10] sm:$0xff] (!%p138_p2) }
   0x7   : > { %1815 = vmatpush3.msra.mxu1 (!%p138_p2), %v1601_v0  ;;  %1871 = vmatpush3.msra.mxu0 (!%p138_p2), %v2057_v1  ;;  %v1703_v20 = vld [vmem:[%s2264_s1 + $0x38] sm:$0xff] (!%p138_p2)  ;;  %v1720_v35 = vld [vmem:[%s2264_s1 + $0x40] sm:$0xff] (!%p138_p2) }
   0x8   : > { %1828 = vmatprep.subr.mxu1 (!%p138_p2), %v179_v2  ;;  %1884 = vmatprep.subr.mxu0 (!%p138_p2), %v1669_v3  ;;  %v1635_v29 = vld [vmem:[%s2264_s1 + $0x18] sm:$0xff] (!%p138_p2) }
   0xd   : > { %s2268_s13 = smov (!%p161_p3, %s1585_s13), 1 }
   0xe   : > { %s2006_s22 = smul.u32 576, %s2268_s13  ;;  %s1732_s11 = sshll.u32 %s2268_s13, 6 }
   0xf   : > { %s2250_s16 = scalar_lea.vmem %s2266_s3, %s1732_s11 }
  0x10   : > { %s2073_s25 = scalar_lea.vmem %s2263_s0, %s2006_s22 }
  0x11   : > { %v1593_v4 = vld [vmem:[%s2073_s25 + $0x90] sm:$0xff]  ;;  %v2078_v6 = vld [vmem:[%s2073_s25 + $0xa0] sm:$0xff] }
  0x12   : > { %v1644_v5 = vld [vmem:[%s2073_s25 + $0x1b0] sm:$0xff]  ;;  %1816 = vmatprep.mubr.msk.f32.mxu1 %vm191_vm0, %v1593_v4  ;;  %v1645_v7 = vld [vmem:[%s2073_s25 + $0x1c0] sm:$0xff] }
  0x13   : > { %1872 = vmatprep.mubr.msk.f32.mxu0 %vm191_vm0, %v1644_v5  ;;  %v2084_v8 = vld [vmem:[%s2073_s25 + $0xb0] sm:$0xff]  ;;  %1817 = vmatmul.mubr.msk.f32.vlgmr.msra.gmra.mrb[0].mxu1 %vm191_vm0, %v2078_v6  ;;  %v2097_v12 = vld [vmem:[%s2073_s25 + $0xc0] sm:$0xff] }
  0x14   : > { %v1646_v9 = vld [vmem:[%s2073_s25 + $0x1d0] sm:$0xff]  ;;  %1873 = vmatmul.mubr.msk.f32.vlgmr.msra.gmra.mrb[0].mxu0 %vm191_vm0, %v1645_v7  ;;  %1829 = vmatpush3.msra.mxu1 %v179_v2  ;;  %v1647_v13 = vld [vmem:[%s2073_s25 + $0x1e0] sm:$0xff] }
  0x15   : > { %1885 = vmatpush3.msra.mxu0 %v1669_v3  ;;  %1819 = vmatprep.mubr.msk.f32.mxu1 %vm191_vm0, %v2084_v8  ;;  %v2104_v14 = vld [vmem:[%s2073_s25 + $0xd0] sm:$0xff]  ;;  %v1661_v15 = vld [vmem:[%s2073_s25 + $0x121] sm:$0xff] }
  0x16   : > { %1875 = vmatprep.mubr.msk.f32.mxu0 %vm191_vm0, %v1646_v9  ;;  %1898 = vmatprep.subr.mxu0 %v1686_v10  ;;  %v2114_v16 = vld [vmem:[%s2073_s25 + $0xe0] sm:$0xff]  ;;  %v1662_v17 = vld [vmem:[%s2073_s25 + $0x131] sm:$0xff] }
  0x17   : > { %1842 = vmatprep.subr.mxu1 %v1618_v11  ;;  %1820 = vmatmul.mubr.msk.f32.gmra.mrb[2].mxu1 %vm191_vm0, %v2097_v12  ;;  %v2118_v18 = vld [vmem:[%s2073_s25 + $0xf0] sm:$0xff]  ;;  %v1663_v19 = vld [vmem:[%s2073_s25 + $0x141] sm:$0xff] }
  0x18   : > { %1876 = vmatmul.mubr.msk.f32.gmra.mrb[2].mxu0 %vm191_vm0, %v1647_v13  ;;  %1822 = vmatprep.mubr.msk.f32.mxu1 %vm191_vm0, %v2104_v14  ;;  %v2130_v21 = vld [vmem:[%s2073_s25 + $0x100] sm:$0xff]  ;;  %v1664_v22 = vld [vmem:[%s2073_s25 + $0x151] sm:$0xff] }
  0x19   : > { %1886 = vmatprep.mubr.msk.f32.mxu0 %vm191_vm0, %v1661_v15  ;;  %v171_v23 = vld [vmem:[%s2073_s25] sm:$0xff]  ;;  %v172_v25 = vld [vmem:[%s2073_s25 + $0x10] sm:$0xff] }
  0x1a   : > { %v1665_v24 = vld [vmem:[%s2073_s25 + $0x161] sm:$0xff]  ;;  %v1666_v26 = vld [vmem:[%s2073_s25 + $0x171] sm:$0xff] }
  0x1b   : > { %1823 = vmatmul.mubr.msk.f32.gmra.mrb[4].mxu1 %vm191_vm0, %v2114_v16  ;;  %v173_v27 = vld [vmem:[%s2073_s25 + $0x20] sm:$0xff]  ;;  %v174_v30 = vld [vmem:[%s2073_s25 + $0x30] sm:$0xff] }
  0x1c   : > { %1887 = vmatmul.mubr.msk.f32.vlgmr.msra.gmra.mrb[0].mxu0 %vm191_vm0, %v1662_v17  ;;  %1825 = vmatprep.mubr.msk.f32.mxu1 %vm191_vm0, %v2118_v18  ;;  %v1667_v28 = vld [vmem:[%s2073_s25 + $0x181] sm:$0xff]  ;;  %v1668_v31 = vld [vmem:[%s2073_s25 + $0x191] sm:$0xff] }
  0x1d   : > { %1899 = vmatpush3.msra.mxu0 %v1686_v10  ;;  %1889 = vmatprep.mubr.msk.f32.mxu0 %vm191_vm0, %v1663_v19  ;;  %v175_v32 = vld [vmem:[%s2073_s25 + $0x40] sm:$0xff]  ;;  %v176_v33 = vld [vmem:[%s2073_s25 + $0x50] sm:$0xff] }
  0x1e   : > { %1912 = vmatprep.subr.mxu0 %v1703_v20  ;;  %v177_v34 = vld [vmem:[%s2073_s25 + $0x60] sm:$0xff]  ;;  %v178_v36 = vld [vmem:[%s2073_s25 + $0x70] sm:$0xff] }
  0x1f   : > { %1826 = vmatmul.mubr.msk.f32.gmra.mrb[6].mxu1 %vm191_vm0, %v2130_v21  ;;  %v450_v37 = vld [vmem:[%s2073_s25 + $0x1] sm:$0xff]  ;;  %v451_v38 = vld [vmem:[%s2073_s25 + $0x11] sm:$0xff] }
  0x20   : > { %1890 = vmatmul.mubr.msk.f32.gmra.mrb[2].mxu0 %vm191_vm0, %v1664_v22  ;;  %1830 = vmatprep.mubr.msk.f32.mxu1 %vm191_vm0, %v171_v23  ;;  %v452_v39 = vld [vmem:[%s2073_s25 + $0x21] sm:$0xff]  ;;  %v453_v40 = vld [vmem:[%s2073_s25 + $0x31] sm:$0xff] }
  0x21   : > { %1892 = vmatprep.mubr.msk.f32.mxu0 %vm191_vm0, %v1665_v24  ;;  %v1685_v41 = vld [vmem:[%s2073_s25 + $0x80] sm:$0xff]  ;;  %v455_v43 = vld [vmem:[%s2073_s25 + $0x51] sm:$0xff] }
  0x22   : > { %v454_v42 = vld [vmem:[%s2073_s25 + $0x41] sm:$0xff]  ;;  %v457_v45 = vld [vmem:[%s2073_s25 + $0x71] sm:$0xff] }
  0x23   : > { %1831 = vmatmul.mubr.msk.f32.vlgmr.msra.gmra.mrb[0].mxu1 %vm191_vm0, %v172_v25  ;;  %v456_v44 = vld [vmem:[%s2073_s25 + $0x61] sm:$0xff]  ;;  %v1628_v47 = vld [vmem:[%s2073_s25 + $0x130] sm:$0xff] }
  0x24   : > { %1893 = vmatmul.mubr.msk.f32.gmra.mrb[4].mxu0 %vm191_vm0, %v1666_v26  ;;  %1843 = vmatpush3.msra.mxu1 %v1618_v11  ;;  %v1627_v46 = vld [vmem:[%s2073_s25 + $0x120] sm:$0xff]  ;;  %v1630_v49 = vld [vmem:[%s2073_s25 + $0x150] sm:$0xff] }
  0x25   : > { %1833 = vmatprep.mubr.msk.f32.mxu1 %vm191_vm0, %v173_v27  ;;  %1895 = vmatprep.mubr.msk.f32.mxu0 %vm191_vm0, %v1667_v28  ;;  %v1629_v48 = vld [vmem:[%s2073_s25 + $0x140] sm:$0xff]  ;;  %v1702_v50 = vld [vmem:[%s2073_s25 + $0x110] sm:$0xff] }
  0x26   : > { %1856 = vmatprep.subr.mxu1 %v1635_v29  ;;  %v1631_v51 = vld [vmem:[%s2073_s25 + $0x160] sm:$0xff]  ;;  %v1632_v52 = vld [vmem:[%s2073_s25 + $0x170] sm:$0xff] }
  0x27   : > { %1834 = vmatmul.mubr.msk.f32.gmra.mrb[2].mxu1 %vm191_vm0, %v174_v30  ;;  %v1633_v53 = vld [vmem:[%s2073_s25 + $0x180] sm:$0xff]  ;;  %v1634_v54 = vld [vmem:[%s2073_s25 + $0x190] sm:$0xff] }
  0x28   : > { %1896 = vmatmul.mubr.msk.f32.gmra.mrb[6].mxu0 %vm191_vm0, %v1668_v31  ;;  %1836 = vmatprep.mubr.msk.f32.mxu1 %vm191_vm0, %v175_v32  ;;  %v1648_v55 = vld [vmem:[%s2073_s25 + $0x1f0] sm:$0xff]  ;;  %v1649_v56 = vld [vmem:[%s2073_s25 + $0x200] sm:$0xff] }
  0x29   : > { %1900 = vmatprep.mubr.msk.f32.mxu0 %vm191_vm0, %v172_v25  ;;  %v1650_v57 = vld [vmem:[%s2073_s25 + $0x210] sm:$0xff]  ;;  %v1651_v58 = vld [vmem:[%s2073_s25 + $0x220] sm:$0xff] }
  0x2a   : > { %v1719_v59 = vld [vmem:[%s2073_s25 + $0x81] sm:$0xff] }
  0x2b   : > { %1837 = vmatmul.mubr.msk.f32.gmra.mrb[4].mxu1 %vm191_vm0, %v176_v33 }
  0x2c   : > { %1901 = vmatmul.mubr.msk.f32.vlgmr.msra.gmra.mrb[0].mxu0 %vm191_vm0, %v173_v27  ;;  %1839 = vmatprep.mubr.msk.f32.mxu1 %vm191_vm0, %v177_v34 }
  0x2d   : > { %1913 = vmatpush3.msra.mxu0 %v1703_v20  ;;  %1903 = vmatprep.mubr.msk.f32.mxu0 %vm191_vm0, %v174_v30 }
  0x2e   : > { %1926 = vmatprep.subr.mxu0 %v1720_v35 }
  0x2f   : > { %1840 = vmatmul.mubr.msk.f32.gmra.mrb[6].mxu1 %vm191_vm0, %v178_v36 }
  0x30   : > { %1904 = vmatmul.mubr.msk.f32.gmra.mrb[2].mxu0 %vm191_vm0, %v175_v32  ;;  %1844 = vmatprep.mubr.msk.f32.mxu1 %vm191_vm0, %v450_v37 }
  0x31   : > { %1906 = vmatprep.mubr.msk.f32.mxu0 %vm191_vm0, %v176_v33 }
  0x33   : > { %1845 = vmatmul.mubr.msk.f32.vlgmr.msra.gmra.mrb[0].mxu1 %vm191_vm0, %v451_v38 }
  0x34   : > { %1907 = vmatmul.mubr.msk.f32.gmra.mrb[4].mxu0 %vm191_vm0, %v177_v34  ;;  %1857 = vmatpush3.msra.mxu1 %v1635_v29 }
  0x35   : > { %1847 = vmatprep.mubr.msk.f32.mxu1 %vm191_vm0, %v452_v39  ;;  %1909 = vmatprep.mubr.msk.f32.mxu0 %vm191_vm0, %v178_v36 }
  0x36   : > { %1940 = vmatprep.subr.mxu1 %v2057_v1 }
  0x37   : > { %1848 = vmatmul.mubr.msk.f32.gmra.mrb[2].mxu1 %vm191_vm0, %v453_v40 }
  0x38   : > { %1910 = vmatmul.mubr.msk.f32.gmra.mrb[6].mxu0 %vm191_vm0, %v1685_v41  ;;  %1850 = vmatprep.mubr.msk.f32.mxu1 %vm191_vm0, %v454_v42 }
  0x39   : > { %1914 = vmatprep.mubr.msk.f32.mxu0 %vm191_vm0, %v2078_v6 }
  0x3b   : > { %1851 = vmatmul.mubr.msk.f32.gmra.mrb[4].mxu1 %vm191_vm0, %v455_v43 }
  0x3c   : > { %1915 = vmatmul.mubr.msk.f32.vlgmr.msra.gmra.mrb[0].mxu0 %vm191_vm0, %v2084_v8  ;;  %1853 = vmatprep.mubr.msk.f32.mxu1 %vm191_vm0, %v456_v44 }
  0x3d   : > { %1927 = vmatpush3.msra.mxu0 %v1720_v35  ;;  %1917 = vmatprep.mubr.msk.f32.mxu0 %vm191_vm0, %v2097_v12 }
  0x3f   : > { %1854 = vmatmul.mubr.msk.f32.gmra.mrb[6].mxu1 %vm191_vm0, %v457_v45 }
  0x40   : > { %1918 = vmatmul.mubr.msk.f32.gmra.mrb[2].mxu0 %vm191_vm0, %v2104_v14  ;;  %1858 = vmatprep.mubr.msk.f32.mxu1 %vm191_vm0, %v1627_v46 }
  0x41   : > { %1920 = vmatprep.mubr.msk.f32.mxu0 %vm191_vm0, %v2114_v16 }
  0x43   : > { %1859 = vmatmul.mubr.msk.f32.vlgmr.msra.gmra.mrb[0].mxu1 %vm191_vm0, %v1628_v47 }
  0x44   : > { %1921 = vmatmul.mubr.msk.f32.gmra.mrb[4].mxu0 %vm191_vm0, %v2118_v18  ;;  %1941 = vmatpush3.msra.mxu1 %v2057_v1  ;;  %v1729_v1 = vld [vmem:[%s2265_s2] ss:$0 sm:$0xff] }
  0x45   : > { %1861 = vmatprep.mubr.msk.f32.mxu1 %vm191_vm0, %v1629_v48  ;;  %1923 = vmatprep.mubr.msk.f32.mxu0 %vm191_vm0, %v2130_v21 }
  0x47   : > { %1862 = vmatmul.mubr.msk.f32.gmra.mrb[2].mxu1 %vm191_vm0, %v1630_v49 }
  0x48   : > { %1924 = vmatmul.mubr.msk.f32.gmra.mrb[6].mxu0 %vm191_vm0, %v1702_v50  ;;  %1864 = vmatprep.mubr.msk.f32.mxu1 %vm191_vm0, %v1631_v51 }
  0x49   : > { %1928 = vmatprep.mubr.msk.f32.mxu0 %vm191_vm0, %v451_v38 }
  0x4b   : > { %1865 = vmatmul.mubr.msk.f32.gmra.mrb[4].mxu1 %vm191_vm0, %v1632_v52 }
  0x4c   : > { %1929 = vmatmul.mubr.msk.f32.vlgmr.msra.gmra.mrb[0].mxu0 %vm191_vm0, %v452_v39  ;;  %1867 = vmatprep.mubr.msk.f32.mxu1 %vm191_vm0, %v1633_v53 }
  0x4d   : > { %1931 = vmatprep.mubr.msk.f32.mxu0 %vm191_vm0, %v453_v40 }
  0x4f   : > { %1868 = vmatmul.mubr.msk.f32.gmra.mrb[6].mxu1 %vm191_vm0, %v1634_v54 }
  0x50   : > { %1932 = vmatmul.mubr.msk.f32.gmra.mrb[2].mxu0 %vm191_vm0, %v454_v42  ;;  %1878 = vmatprep.mubr.msk.f32.mxu1 %vm191_vm0, %v1648_v55 }
  0x51   : > { %1934 = vmatprep.mubr.msk.f32.mxu0 %vm191_vm0, %v455_v43 }
  0x53   : > { %1879 = vmatmul.mubr.msk.f32.vlgmr.msra.gmra.mrb[4].mxu1 %vm191_vm0, %v1649_v56 }
  0x54   : > { %1935 = vmatmul.mubr.msk.f32.gmra.mrb[4].mxu0 %vm191_vm0, %v456_v44  ;;  %1881 = vmatprep.mubr.msk.f32.mxu1 %vm191_vm0, %v1650_v57 }
  0x55   : > { %1937 = vmatprep.mubr.msk.f32.mxu0 %vm191_vm0, %v457_v45 }
  0x57   : > { %1882 = vmatmul.mubr.msk.f32.gmra.mrb[6].mxu1 %vm191_vm0, %v1651_v58 }
  0x58   : > { %1938 = vmatmul.mubr.msk.f32.gmra.mrb[6].mxu0 %vm191_vm0, %v1719_v59 }
 0x116   : > { %v1860_v60 = vpop.f32.mrb[0].mxu1 }
 0x117   : > { %v698_v61 = vpop.f32.mrb[1].mxu1 }
 0x11a   : > { %v1863_v62 = vpop.f32.mrb[2].mxu1 }
 0x11b   : > { %v708_v63 = vpop.f32.mrb[3].mxu1 }
 0x11f   : > { %v1930_v0 = vpop.f32.mrb[0].mxu0 }
 0x120   : > { %v1942_v2 = vadd.f32 %v1930_v0, %v1860_v60  ;;  %v1436_v3 = vpop.f32.mrb[1].mxu0 }
 0x121   : > { %v1943_v4 = vadd.f32 %v1436_v3, %v698_v61 }
 0x122   : > { %v1491_v5 = vadd.f32 %v1942_v2, %v1729_v1 }
 0x123   : > { %v1490_v6 = vadd.f32 %v1943_v4, %v1729_v1  ;;  %v1933_v7 = vpop.f32.mrb[2].mxu0 }
 0x124   : > { %vm1499_vm1 = vcmp.gt.f32.partialorder %v1491_v5, 0.0  ;;  %v1507_v8 = vmul.f32 0.1, %v1491_v5  ;;  %v1944_v9 = vadd.f32 %v1933_v7, %v1863_v62  ;;  %v1446_v10 = vpop.f32.mrb[3].mxu0 }
 0x125   : > { %vm1498_vm2 = vcmp.gt.f32.partialorder %v1490_v6, 0.0  ;;  %v1506_v11 = vmul.f32 0.1, %v1490_v6  ;;  %v1945_v12 = vadd.f32 %v1446_v10, %v708_v63 }
 0x126   : > { %v1515_v13 = vsel %vm1499_vm1, %v1491_v5, %v1507_v8  ;;  %v1493_v14 = vadd.f32 %v1944_v9, %v1729_v1  ;;  %v1880_v17 = vpop.f32.mrb[4].mxu1 }
 0x127   : > { %1523 = vst [vmem:[%s2250_s16 + $0x8] sm:$0xff] %v1515_v13  ;;  %v1514_v15 = vsel %vm1498_vm2, %v1490_v6, %v1506_v11  ;;  %v1492_v16 = vadd.f32 %v1945_v12, %v1729_v1  ;;  %v1936_v18 = vpop.f32.mrb[4].mxu0  ;;  %v866_v21 = vpop.f32.mrb[5].mxu1 }
 0x128   : > { %1522 = vst [vmem:[%s2250_s16] sm:$0xff] %v1514_v15  ;;  %vm1501_vm3 = vcmp.gt.f32.partialorder %v1493_v14, 0.0  ;;  %v1509_v19 = vmul.f32 0.1, %v1493_v14  ;;  %v1946_v20 = vadd.f32 %v1936_v18, %v1880_v17  ;;  %v1456_v22 = vpop.f32.mrb[5].mxu0 }
 0x129   : > { %vm1500_vm4 = vcmp.gt.f32.partialorder %v1492_v16, 0.0  ;;  %v1508_v23 = vmul.f32 0.1, %v1492_v16  ;;  %v1947_v24 = vadd.f32 %v1456_v22, %v866_v21 }
 0x12a   : > { %v1517_v25 = vsel %vm1501_vm3, %v1493_v14, %v1509_v19  ;;  %v1495_v26 = vadd.f32 %v1946_v20, %v1729_v1  ;;  %v1883_v29 = vpop.f32.mrb[6].mxu1 }
 0x12b   : > { %1525 = vst [vmem:[%s2250_s16 + $0x18] sm:$0xff] %v1517_v25  ;;  %v1516_v27 = vsel %vm1500_vm4, %v1492_v16, %v1508_v23  ;;  %v1494_v28 = vadd.f32 %v1947_v24, %v1729_v1  ;;  %v1939_v30 = vpop.f32.mrb[6].mxu0  ;;  %v876_v33 = vpop.f32.mrb[7].mxu1 }
 0x12c   : > { %1524 = vst [vmem:[%s2250_s16 + $0x10] sm:$0xff] %v1516_v27  ;;  %vm1503_vm5 = vcmp.gt.f32.partialorder %v1495_v26, 0.0  ;;  %v1511_v31 = vmul.f32 0.1, %v1495_v26  ;;  %v1948_v32 = vadd.f32 %v1939_v30, %v1883_v29  ;;  %v1466_v34 = vpop.f32.mrb[7].mxu0 }
 0x12d   : > { %vm1502_vm6 = vcmp.gt.f32.partialorder %v1494_v28, 0.0  ;;  %v1510_v35 = vmul.f32 0.1, %v1494_v28  ;;  %v1949_v36 = vadd.f32 %v1466_v34, %v876_v33 }
 0x12e   : > { %v1519_v37 = vsel %vm1503_vm5, %v1495_v26, %v1511_v31  ;;  %v1497_v38 = vadd.f32 %v1948_v32, %v1729_v1 }
 0x12f   : > { %1527 = vst [vmem:[%s2250_s16 + $0x28] sm:$0xff] %v1519_v37  ;;  %v1518_v39 = vsel %vm1502_vm6, %v1494_v28, %v1510_v35  ;;  %v1496_v40 = vadd.f32 %v1949_v36, %v1729_v1 }
 0x130   : > { %1526 = vst [vmem:[%s2250_s16 + $0x20] sm:$0xff] %v1518_v39  ;;  %vm1505_vm7 = vcmp.gt.f32.partialorder %v1497_v38, 0.0  ;;  %v1513_v41 = vmul.f32 0.1, %v1497_v38 }
 0x131   : > { %vm1504_vm8 = vcmp.gt.f32.partialorder %v1496_v40, 0.0  ;;  %v1512_v42 = vmul.f32 0.1, %v1496_v40 }
 0x132   : > { %v1521_v43 = vsel %vm1505_vm7, %v1497_v38, %v1513_v41 }
 0x133   : > { %1529 = vst [vmem:[%s2250_s16 + $0x38] sm:$0xff] %v1521_v43  ;;  %v1520_v44 = vsel %vm1504_vm8, %v1496_v40, %v1512_v42 }
 0x134   : > { %1528 = vst [vmem:[%s2250_s16 + $0x30] sm:$0xff] %v1520_v44 }
 0x135 PF: > { %s13_s12 = sadd.s32 1, %s2021_s12  }
 0x136   : > { %p10_p4 = scmp.ge.s32.totalorder %s13_s12, 4  }
 0x138   :  { %12 = sbr.rel (!%p10_p4) target bundleno = 1 (0x1), region = 75 }

// kernel: darknet_forward.6
= control target key start
LH: loop header
LB: loop body
LE: loop exit
PB: predicated region body
PF: predicated region fallthrough
CT: control target
= control target key end

     0   :  { %s5356_s12 = smov 0   ;;  %s6376_s0 = inlined_call_operand.vmem [shape: f32[2,1,18,18,8], index: 0, kind: input, shape index: {}]   ;;  %s6377_s1 = inlined_call_operand.vmem [shape: f32[9,8,128], index: 1, kind: input, shape index: {}]   ;;  %s6378_s2 = inlined_call_operand.vmem [shape: f32[1,128], index: 2, kind: input, shape index: {}]   ;;  %s6379_s3 = inlined_call_operand.vmem [shape: f32[2,256,128], index: 3, kind: output, shape index: {}]  }
   0x1 LB: > { %s3814_s13 = sadd.s32 4294967295, %s5334_s12   ;;  %p3818_p0 = scmp.ge.s32.totalorder %s5334_s12, 1  ;;  %s5334_s12 = sphi %s5356_s12, %s13_s12  }
   0x2   : > { %p137_p1 = scmp.lt.s32.totalorder %s5334_s12, 3 }
   0x4   : > { %p138_p2 = pnand %p3818_p0, %p137_p1 }
   0x6   : > { %141 = sbr.rel (%p138_p2) target bundleno = 526 (0x20e), region = 32 }
   0xd   : > { %v3822_v0 = vld [vmem:[%s6377_s1 + $0x8] sm:$0xff]  ;;  %v5370_v1 = vld [vmem:[%s6377_s1 + $0x20] sm:$0xff]  ;;  %p161_p3 = scmp.lt.s32.totalorder %s3814_s13, 1  ;;  %vm238_vm0 = vcmask 64512   ;;  %v4147_v9 = vld [vmem:[%s6377_s1 + $0x30] sm:$0xff] }
   0xe   : > { %v203_v2 = vld [vmem:[%s6377_s1] sm:$0xff]  ;;  %4611 = vmatprep.subr.mxu1 %v3822_v0  ;;  %4811 = vmatprep.subr.mxu0 %v5370_v1  ;;  %v4082_v3 = vld [vmem:[%s6377_s1 + $0x28] sm:$0xff]  ;;  %v5405_v10 = vld [vmem:[%s6377_s1 + $0x10] sm:$0xff] }
   0xf   : > { %4612 = vmatpush3.msra.mxu1 %v3822_v0  ;;  %4812 = vmatpush3.msra.mxu0 %v5370_v1  ;;  %s6490_s13 = smov (!%p161_p3, %s3814_s13), 1  ;;  %v5520_v28 = vld [vmem:[%s6377_s1 + $0x38] sm:$0xff] }
  0x10   : > { %4661 = vmatprep.subr.mxu1 %v203_v2  ;;  %4861 = vmatprep.subr.mxu0 %v4082_v3  ;;  %s5319_s22 = smul.u32 432, %s6490_s13  ;;  %v5681_v61 = vld [vmem:[%s6377_s1 + $0x18] sm:$0xff]  ;;  %s4313_s11 = sshll.u32 %s6490_s13, 8 }
  0x11   : > { %s6302_s16 = scalar_lea.vmem %s6379_s3, %s4313_s11 }
  0x12   : > { %s5386_s25 = scalar_lea.vmem %s6376_s0, %s5319_s22 }
  0x13   : > { %v204_v4 = vld [vmem:[%s5386_s25 + $0x1] sm:$0xff]  ;;  %v3985_v5 = vld [vmem:[%s5386_s25 + $0x19] sm:$0xff]  ;;  %v205_v6 = vld [vmem:[%s5386_s25 + $0x9] sm:$0xff] }
  0x14   : > { %4613 = vmatprep.mubr.msk.f32.mxu1 %vm238_vm0, %v204_v4  ;;  %4813 = vmatprep.mubr.msk.f32.mxu0 %vm238_vm0, %v3985_v5  ;;  %v3986_v7 = vld [vmem:[%s5386_s25 + $0x21] sm:$0xff]  ;;  %v5395_v8 = vld [vmem:[%s5386_s25 + $0x31] sm:$0xff]  ;;  %v5408_v11 = vld [vmem:[%s5386_s25 + $0x39] sm:$0xff] }
  0x15   : > { %4614 = vmatmul.mubr.msk.f32.vlgmr.msra.gmra.mrb[0].mxu1 %vm238_vm0, %v205_v6  ;;  %4814 = vmatmul.mubr.msk.f32.vlgmr.msra.gmra.mrb[0].mxu0 %vm238_vm0, %v3986_v7  ;;  %v5414_v12 = vld [vmem:[%s5386_s25 + $0x49] sm:$0xff]  ;;  %v5425_v13 = vld [vmem:[%s5386_s25 + $0x51] sm:$0xff]  ;;  %v5428_v14 = vld [vmem:[%s5386_s25 + $0x61] sm:$0xff] }
  0x16   : > { %4662 = vmatpush3.msra.mxu1 %v203_v2  ;;  %4862 = vmatpush3.msra.mxu0 %v4082_v3  ;;  %v5439_v15 = vld [vmem:[%s5386_s25 + $0x69] sm:$0xff]  ;;  %v5442_v16 = vld [vmem:[%s5386_s25 + $0x79] sm:$0xff]  ;;  %v5453_v17 = vld [vmem:[%s5386_s25 + $0x81] sm:$0xff] }
  0x17   : > { %4616 = vmatprep.mubr.msk.f32.mxu1 %vm238_vm0, %v3985_v5  ;;  %4816 = vmatprep.mubr.msk.f32.mxu0 %vm238_vm0, %v5395_v8  ;;  %v5456_v18 = vld [vmem:[%s5386_s25 + $0x91] sm:$0xff]  ;;  %v5467_v19 = vld [vmem:[%s5386_s25 + $0x99] sm:$0xff]  ;;  %v5470_v20 = vld [vmem:[%s5386_s25 + $0xa9] sm:$0xff] }
  0x18   : > { %4911 = vmatprep.subr.mxu0 %v4147_v9  ;;  %4711 = vmatprep.subr.mxu1 %v5405_v10  ;;  %v5481_v21 = vld [vmem:[%s5386_s25 + $0xb1] sm:$0xff]  ;;  %v5484_v22 = vld [vmem:[%s5386_s25 + $0xc1] sm:$0xff]  ;;  %v5495_v23 = vld [vmem:[%s5386_s25 + $0xc9] sm:$0xff] }
  0x19   : > { %4617 = vmatmul.mubr.msk.f32.gmra.mrb[2].mxu1 %vm238_vm0, %v3986_v7  ;;  %4817 = vmatmul.mubr.msk.f32.gmra.mrb[2].mxu0 %vm238_vm0, %v5408_v11  ;;  %v5498_v24 = vld [vmem:[%s5386_s25 + $0x1a] sm:$0xff]  ;;  %v5509_v25 = vld [vmem:[%s5386_s25 + $0x22] sm:$0xff]  ;;  %v5515_v27 = vld [vmem:[%s5386_s25 + $0x32] sm:$0xff] }
  0x1a   : > { %4619 = vmatprep.mubr.msk.f32.mxu1 %vm238_vm0, %v5395_v8  ;;  %4819 = vmatprep.mubr.msk.f32.mxu0 %vm238_vm0, %v5414_v12  ;;  %v5512_v26 = vld [vmem:[%s5386_s25 + $0xd9] sm:$0xff]  ;;  %v5529_v29 = vld [vmem:[%s5386_s25 + $0xe1] sm:$0xff]  ;;  %v5537_v31 = vld [vmem:[%s5386_s25 + $0xf1] sm:$0xff] }
  0x1b   : > { %6425 = vst [vmem:[#allocation2_spill] sm:$0xff] %v5529_v29  ;;  %v5532_v30 = vld [vmem:[%s5386_s25 + $0x3a] sm:$0xff]  ;;  %6426 = vst [vmem:[#allocation3_spill] sm:$0xff] %v5537_v31  ;;  %v5540_v32 = vld [vmem:[%s5386_s25 + $0x4a] sm:$0xff] }
  0x1c   : > { %v5552_v33 = vld [vmem:[%s5386_s25 + $0xf9] sm:$0xff]  ;;  %v5558_v35 = vld [vmem:[%s5386_s25 + $0x109] sm:$0xff]  ;;  %v5572_v37 = vld [vmem:[%s5386_s25 + $0x111] sm:$0xff] }
  0x1d   : > { %4620 = vmatmul.mubr.msk.f32.gmra.mrb[4].mxu1 %vm238_vm0, %v5408_v11  ;;  %4820 = vmatmul.mubr.msk.f32.gmra.mrb[4].mxu0 %vm238_vm0, %v5425_v13  ;;  %6427 = vst [vmem:[#allocation4_spill] sm:$0xff] %v5552_v33  ;;  %v5555_v34 = vld [vmem:[%s5386_s25 + $0x52] sm:$0xff]  ;;  %6428 = vst [vmem:[#allocation5_spill] sm:$0xff] %v5558_v35  ;;  %v5561_v36 = vld [vmem:[%s5386_s25 + $0x62] sm:$0xff] }
  0x1e   : > { %4622 = vmatprep.mubr.msk.f32.mxu1 %vm238_vm0, %v5414_v12  ;;  %4822 = vmatprep.mubr.msk.f32.mxu0 %vm238_vm0, %v5428_v14  ;;  %6429 = vst [vmem:[#allocation6_spill] sm:$0xff] %v5572_v37  ;;  %v5575_v38 = vld [vmem:[%s5386_s25 + $0x6a] sm:$0xff]  ;;  %v5578_v39 = vld [vmem:[%s5386_s25 + $0x121] sm:$0xff]  ;;  %v5598_v43 = vld [vmem:[%s5386_s25 + $0x139] sm:$0xff] }
  0x1f   : > { %6430 = vst [vmem:[#allocation7_spill] sm:$0xff] %v5578_v39  ;;  %v5581_v40 = vld [vmem:[%s5386_s25 + $0x7a] sm:$0xff]  ;;  %v5592_v41 = vld [vmem:[%s5386_s25 + $0x129] sm:$0xff]  ;;  %6432 = vst [vmem:[#allocation9_spill] sm:$0xff] %v5598_v43 }
  0x20   : > { %6431 = vst [vmem:[#allocation8_spill] sm:$0xff] %v5592_v41  ;;  %v5595_v42 = vld [vmem:[%s5386_s25 + $0x82] sm:$0xff]  ;;  %v5601_v44 = vld [vmem:[%s5386_s25 + $0x92] sm:$0xff]  ;;  %v5615_v46 = vld [vmem:[%s5386_s25 + $0x9a] sm:$0xff] }
  0x21   : > { %4623 = vmatmul.mubr.msk.f32.gmra.mrb[6].mxu1 %vm238_vm0, %v5425_v13  ;;  %4823 = vmatmul.mubr.msk.f32.gmra.mrb[6].mxu0 %vm238_vm0, %v5439_v15  ;;  %v5612_v45 = vld [vmem:[%s5386_s25 + $0x141] sm:$0xff]  ;;  %v5618_v47 = vld [vmem:[%s5386_s25 + $0x151] sm:$0xff]  ;;  %v5632_v49 = vld [vmem:[%s5386_s25 + $0x159] sm:$0xff] }
  0x22   : > { %4625 = vmatprep.mubr.msk.f32.mxu1 %vm238_vm0, %v5428_v14  ;;  %4825 = vmatprep.mubr.msk.f32.mxu0 %vm238_vm0, %v5442_v16  ;;  %6433 = vst [vmem:[#allocation10_spill] sm:$0xff] %v5612_v45  ;;  %6434 = vst [vmem:[#allocation11_spill] sm:$0xff] %v5618_v47  ;;  %v5621_v48 = vld [vmem:[%s5386_s25 + $0xaa] sm:$0xff]  ;;  %v5635_v50 = vld [vmem:[%s5386_s25 + $0xb2] sm:$0xff] }
  0x23   : > { %6435 = vst [vmem:[#allocation12_spill] sm:$0xff] %v5632_v49  ;;  %v5638_v51 = vld [vmem:[%s5386_s25 + $0x169] sm:$0xff]  ;;  %v5652_v53 = vld [vmem:[%s5386_s25 + $0x171] sm:$0xff]  ;;  %v171_v55 = vld [vmem:[%s5386_s25] sm:$0xff] }
  0x24   : > { %6436 = vst [vmem:[#allocation13_spill] sm:$0xff] %v5638_v51  ;;  %v5641_v52 = vld [vmem:[%s5386_s25 + $0xc2] sm:$0xff]  ;;  %6437 = vst [vmem:[#allocation14_spill] sm:$0xff] %v5652_v53  ;;  %v5655_v54 = vld [vmem:[%s5386_s25 + $0xca] sm:$0xff] }
  0x25   : > { %4626 = vmatmul.mubr.msk.f32.gmra.mrb[8].mxu1 %vm238_vm0, %v5439_v15  ;;  %4826 = vmatmul.mubr.msk.f32.gmra.mrb[8].mxu0 %vm238_vm0, %v5453_v17  ;;  %v5659_v56 = vld [vmem:[%s5386_s25 + $0xda] sm:$0xff]  ;;  %v172_v57 = vld [vmem:[%s5386_s25 + $0x8] sm:$0xff]  ;;  %v5676_v60 = vld [vmem:[%s5386_s25 + $0xf2] sm:$0xff] }
  0x26   : > { %4628 = vmatprep.mubr.msk.f32.mxu1 %vm238_vm0, %v5442_v16  ;;  %4828 = vmatprep.mubr.msk.f32.mxu0 %vm238_vm0, %v5456_v18  ;;  %v5670_v58 = vld [vmem:[%s5386_s25 + $0xe2] sm:$0xff]  ;;  %v5673_v59 = vld [vmem:[%s5386_s25 + $0x18] sm:$0xff]  ;;  %v5698_v0 = vld [vmem:[%s5386_s25 + $0x30] sm:$0xff] }
  0x27   : > { %6438 = vst [vmem:[#allocation15_spill] sm:$0xff] %v5673_v59  ;;  %v5690_v62 = vld [vmem:[%s5386_s25 + $0x20] sm:$0xff]  ;;  %6440 = vst [vmem:[#allocation17_spill] sm:$0xff] %v5698_v0  ;;  %v5701_v2 = vld [vmem:[%s5386_s25 + $0x10a] sm:$0xff] }
  0x28   : > { %6439 = vst [vmem:[#allocation16_spill] sm:$0xff] %v5690_v62  ;;  %v5693_v63 = vld [vmem:[%s5386_s25 + $0xfa] sm:$0xff]  ;;  %v5716_v4 = vld [vmem:[%s5386_s25 + $0x112] sm:$0xff]  ;;  %v5719_v5 = vld [vmem:[%s5386_s25 + $0x48] sm:$0xff] }
  0x29   : > { %4629 = vmatmul.mubr.msk.f32.gmra.mrb[10].mxu1 %vm238_vm0, %v5453_v17  ;;  %4829 = vmatmul.mubr.msk.f32.gmra.mrb[10].mxu0 %vm238_vm0, %v5467_v19  ;;  %v5713_v3 = vld [vmem:[%s5386_s25 + $0x38] sm:$0xff]  ;;  %6442 = vst [vmem:[#allocation19_spill] sm:$0xff] %v5719_v5  ;;  %v5722_v6 = vld [vmem:[%s5386_s25 + $0x122] sm:$0xff]  ;;  %v5733_v7 = vld [vmem:[%s5386_s25 + $0x50] sm:$0xff] }
  0x2a   : > { %4631 = vmatprep.mubr.msk.f32.mxu1 %vm238_vm0, %v5456_v18  ;;  %4831 = vmatprep.mubr.msk.f32.mxu0 %vm238_vm0, %v5470_v20  ;;  %6441 = vst [vmem:[#allocation18_spill] sm:$0xff] %v5713_v3  ;;  %6443 = vst [vmem:[#allocation20_spill] sm:$0xff] %v5733_v7 }
  0x2d   : > { %4632 = vmatmul.mubr.msk.f32.gmra.mrb[12].mxu1 %vm238_vm0, %v5467_v19  ;;  %4832 = vmatmul.mubr.msk.f32.gmra.mrb[12].mxu0 %vm238_vm0, %v5481_v21 }
  0x2e   : > { %4634 = vmatprep.mubr.msk.f32.mxu1 %vm238_vm0, %v5470_v20  ;;  %4834 = vmatprep.mubr.msk.f32.mxu0 %vm238_vm0, %v5484_v22 }
  0x31   : > { %4635 = vmatmul.mubr.msk.f32.gmra.mrb[14].mxu1 %vm238_vm0, %v5481_v21  ;;  %4835 = vmatmul.mubr.msk.f32.gmra.mrb[14].mxu0 %vm238_vm0, %v5495_v23 }
  0x32   : > { %4637 = vmatprep.mubr.msk.f32.mxu1 %vm238_vm0, %v5484_v22  ;;  %4863 = vmatprep.mubr.msk.f32.mxu0 %vm238_vm0, %v5498_v24 }
  0x35   : > { %4638 = vmatmul.mubr.msk.f32.gmra.mrb[16].mxu1 %vm238_vm0, %v5495_v23  ;;  %4864 = vmatmul.mubr.msk.f32.vlgmr.msra.gmra.mrb[0].mxu0 %vm238_vm0, %v5509_v25 }
  0x36   : > { %4912 = vmatpush3.msra.mxu0 %v4147_v9  ;;  %4640 = vmatprep.mubr.msk.f32.mxu1 %vm238_vm0, %v5512_v26  ;;  %v5736_v9 = vld [vmem:[%s5386_s25 + $0x12a] sm:$0xff] }
  0x37   : > { %4866 = vmatprep.mubr.msk.f32.mxu0 %vm238_vm0, %v5515_v27  ;;  %4961 = vmatprep.subr.mxu0 %v5520_v28 }
  0x39   : > { %4641 = vmatmul.mubr.msk.f32.gmra.mrb[18].mxu1 %vm238_vm0, %v5529_v29  ;;  %4867 = vmatmul.mubr.msk.f32.gmra.mrb[2].mxu0 %vm238_vm0, %v5532_v30  ;;  %v5833_v29 = vld [vmem:[%s5386_s25 + $0xd8] sm:$0xff] }
  0x3a   : > { %4643 = vmatprep.mubr.msk.f32.mxu1 %vm238_vm0, %v5537_v31  ;;  %4869 = vmatprep.mubr.msk.f32.mxu0 %vm238_vm0, %v5540_v32  ;;  %v5816_v31 = vld [vmem:[%s5386_s25 + $0x18a] sm:$0xff] }
  0x3b   : > { %6454 = vst [vmem:[#allocation31_spill] sm:$0xff] %v5816_v31 }
  0x3d   : > { %4644 = vmatmul.mubr.msk.f32.gmra.mrb[20].mxu1 %vm238_vm0, %v5552_v33  ;;  %4870 = vmatmul.mubr.msk.f32.gmra.mrb[4].mxu0 %vm238_vm0, %v5555_v34  ;;  %v5802_v33 = vld [vmem:[%s5386_s25 + $0x182] sm:$0xff] }
  0x3e   : > { %4646 = vmatprep.mubr.msk.f32.mxu1 %vm238_vm0, %v5558_v35  ;;  %4872 = vmatprep.mubr.msk.f32.mxu0 %vm238_vm0, %v5561_v36  ;;  %v5799_v35 = vld [vmem:[%s5386_s25 + $0xa8] sm:$0xff]  ;;  %6452 = vst [vmem:[#allocation29_spill] sm:$0xff] %v5802_v33 }
  0x3f   : > { %6451 = vst [vmem:[#allocation28_spill] sm:$0xff] %v5799_v35 }
  0x41   : > { %4647 = vmatmul.mubr.msk.f32.gmra.mrb[22].mxu1 %vm238_vm0, %v5572_v37  ;;  %4873 = vmatmul.mubr.msk.f32.gmra.mrb[6].mxu0 %vm238_vm0, %v5575_v38  ;;  %v5796_v37 = vld [vmem:[%s5386_s25 + $0x172] sm:$0xff] }
  0x42   : > { %4649 = vmatprep.mubr.msk.f32.mxu1 %vm238_vm0, %v5578_v39  ;;  %4875 = vmatprep.mubr.msk.f32.mxu0 %vm238_vm0, %v5581_v40  ;;  %v5793_v39 = vld [vmem:[%s5386_s25 + $0x98] sm:$0xff]  ;;  %6450 = vst [vmem:[#allocation27_spill] sm:$0xff] %v5796_v37 }
  0x43   : > { %6449 = vst [vmem:[#allocation26_spill] sm:$0xff] %v5793_v39 }
  0x45   : > { %4650 = vmatmul.mubr.msk.f32.gmra.mrb[24].mxu1 %vm238_vm0, %v5592_v41  ;;  %4876 = vmatmul.mubr.msk.f32.gmra.mrb[8].mxu0 %vm238_vm0, %v5595_v42  ;;  %v5782_v41 = vld [vmem:[%s5386_s25 + $0x16a] sm:$0xff] }
  0x46   : > { %4652 = vmatprep.mubr.msk.f32.mxu1 %vm238_vm0, %v5598_v43  ;;  %4878 = vmatprep.mubr.msk.f32.mxu0 %vm238_vm0, %v5601_v44  ;;  %v5779_v43 = vld [vmem:[%s5386_s25 + $0x90] sm:$0xff] }
  0x47   : > { %6448 = vst [vmem:[#allocation25_spill] sm:$0xff] %v5779_v43 }
  0x49   : > { %4653 = vmatmul.mubr.msk.f32.gmra.mrb[26].mxu1 %vm238_vm0, %v5612_v45  ;;  %4879 = vmatmul.mubr.msk.f32.gmra.mrb[10].mxu0 %vm238_vm0, %v5615_v46  ;;  %v5776_v45 = vld [vmem:[%s5386_s25 + $0x15a] sm:$0xff] }
  0x4a   : > { %4655 = vmatprep.mubr.msk.f32.mxu1 %vm238_vm0, %v5618_v47  ;;  %4881 = vmatprep.mubr.msk.f32.mxu0 %vm238_vm0, %v5621_v48  ;;  %v5773_v47 = vld [vmem:[%s5386_s25 + $0x80] sm:$0xff] }
  0x4b   : > { %6447 = vst [vmem:[#allocation24_spill] sm:$0xff] %v5773_v47 }
  0x4d   : > { %4656 = vmatmul.mubr.msk.f32.gmra.mrb[28].mxu1 %vm238_vm0, %v5632_v49  ;;  %4882 = vmatmul.mubr.msk.f32.gmra.mrb[12].mxu0 %vm238_vm0, %v5635_v50  ;;  %v5762_v49 = vld [vmem:[%s5386_s25 + $0x152] sm:$0xff] }
  0x4e   : > { %4658 = vmatprep.mubr.msk.f32.mxu1 %vm238_vm0, %v5638_v51  ;;  %4884 = vmatprep.mubr.msk.f32.mxu0 %vm238_vm0, %v5641_v52  ;;  %v5759_v51 = vld [vmem:[%s5386_s25 + $0x78] sm:$0xff] }
  0x4f   : > { %6446 = vst [vmem:[#allocation23_spill] sm:$0xff] %v5759_v51 }
  0x51   : > { %4659 = vmatmul.mubr.msk.f32.gmra.mrb[30].mxu1 %vm238_vm0, %v5652_v53  ;;  %4885 = vmatmul.mubr.msk.f32.gmra.mrb[14].mxu0 %vm238_vm0, %v5655_v54  ;;  %v5756_v53 = vld [vmem:[%s5386_s25 + $0x142] sm:$0xff] }
  0x52   : > { %4663 = vmatprep.mubr.msk.f32.mxu1 %vm238_vm0, %v171_v55  ;;  %4887 = vmatprep.mubr.msk.f32.mxu0 %vm238_vm0, %v5659_v56  ;;  %v5742_v55 = vld [vmem:[%s5386_s25 + $0x13a] sm:$0xff] }
  0x55   : > { %4664 = vmatmul.mubr.msk.f32.vlgmr.msra.gmra.mrb[0].mxu1 %vm238_vm0, %v172_v57  ;;  %4888 = vmatmul.mubr.msk.f32.gmra.mrb[16].mxu0 %vm238_vm0, %v5670_v58  ;;  %v5753_v57 = vld [vmem:[%s5386_s25 + $0x68] sm:$0xff] }
  0x56   : > { %4712 = vmatpush3.msra.mxu1 %v5405_v10  ;;  %4666 = vmatprep.mubr.msk.f32.mxu1 %vm238_vm0, %v5673_v59  ;;  %v5739_v10 = vld [vmem:[%s5386_s25 + $0x60] sm:$0xff]  ;;  %6445 = vst [vmem:[#allocation22_spill] sm:$0xff] %v5753_v57 }
  0x57   : > { %4890 = vmatprep.mubr.msk.f32.mxu0 %vm238_vm0, %v5676_v60  ;;  %4761 = vmatprep.subr.mxu1 %v5681_v61  ;;  %6444 = vst [vmem:[#allocation21_spill] sm:$0xff] %v5739_v10  ;;  %v5819_v59 = vld [vmem:[%s5386_s25 + $0xc0] sm:$0xff] }
  0x59   : > { %4667 = vmatmul.mubr.msk.f32.gmra.mrb[2].mxu1 %vm238_vm0, %v5690_v62  ;;  %4891 = vmatmul.mubr.msk.f32.gmra.mrb[18].mxu0 %vm238_vm0, %v5693_v63  ;;  %v5813_v62 = vld [vmem:[%s5386_s25 + $0xb0] sm:$0xff] }
  0x5a   : > { %4669 = vmatprep.mubr.msk.f32.mxu1 %vm238_vm0, %v5698_v0  ;;  %4893 = vmatprep.mubr.msk.f32.mxu0 %vm238_vm0, %v5701_v2  ;;  %6453 = vst [vmem:[#allocation30_spill] sm:$0xff] %v5813_v62 }
  0x5d   : > { %4670 = vmatmul.mubr.msk.f32.gmra.mrb[4].mxu1 %vm238_vm0, %v5713_v3  ;;  %4894 = vmatmul.mubr.msk.f32.gmra.mrb[20].mxu0 %vm238_vm0, %v5716_v4 }
  0x5e   : > { %4672 = vmatprep.mubr.msk.f32.mxu1 %vm238_vm0, %v5719_v5  ;;  %4896 = vmatprep.mubr.msk.f32.mxu0 %vm238_vm0, %v5722_v6 }
  0x61   : > { %4673 = vmatmul.mubr.msk.f32.gmra.mrb[6].mxu1 %vm238_vm0, %v5733_v7  ;;  %4897 = vmatmul.mubr.msk.f32.gmra.mrb[22].mxu0 %vm238_vm0, %v5736_v9 }
  0x62   : > { %4675 = vmatprep.mubr.msk.f32.mxu1 %vm238_vm0, %v5739_v10  ;;  %4899 = vmatprep.mubr.msk.f32.mxu0 %vm238_vm0, %v5742_v55 }
  0x65   : > { %4676 = vmatmul.mubr.msk.f32.gmra.mrb[8].mxu1 %vm238_vm0, %v5753_v57  ;;  %4900 = vmatmul.mubr.msk.f32.gmra.mrb[24].mxu0 %vm238_vm0, %v5756_v53 }
  0x66   : > { %4678 = vmatprep.mubr.msk.f32.mxu1 %vm238_vm0, %v5759_v51  ;;  %4902 = vmatprep.mubr.msk.f32.mxu0 %vm238_vm0, %v5762_v49 }
  0x69   : > { %4679 = vmatmul.mubr.msk.f32.gmra.mrb[10].mxu1 %vm238_vm0, %v5773_v47  ;;  %4903 = vmatmul.mubr.msk.f32.gmra.mrb[26].mxu0 %vm238_vm0, %v5776_v45 }
  0x6a   : > { %4681 = vmatprep.mubr.msk.f32.mxu1 %vm238_vm0, %v5779_v43  ;;  %4905 = vmatprep.mubr.msk.f32.mxu0 %vm238_vm0, %v5782_v41 }
  0x6d   : > { %4682 = vmatmul.mubr.msk.f32.gmra.mrb[12].mxu1 %vm238_vm0, %v5793_v39  ;;  %4906 = vmatmul.mubr.msk.f32.gmra.mrb[28].mxu0 %vm238_vm0, %v5796_v37  ;;  %v5838_v37 = vld [vmem:[%s6377_s1 + $0x40] sm:$0xff] }
  0x6e   : > { %4684 = vmatprep.mubr.msk.f32.mxu1 %vm238_vm0, %v5799_v35  ;;  %4908 = vmatprep.mubr.msk.f32.mxu0 %vm238_vm0, %v5802_v33  ;;  %v5830_v33 = vld [vmem:[%s5386_s25 + $0xc8] sm:$0xff] }
  0x6f   : > { %6455 = vst [vmem:[#allocation32_spill] sm:$0xff] %v5830_v33 }
  0x71   : > { %4685 = vmatmul.mubr.msk.f32.gmra.mrb[14].mxu1 %vm238_vm0, %v5813_v62  ;;  %4909 = vmatmul.mubr.msk.f32.gmra.mrb[30].mxu0 %vm238_vm0, %v5816_v31  ;;  %v5848_v31 = vld [vmem:[%s5386_s25 + $0xe0] sm:$0xff] }
  0x72   : > { %4687 = vmatprep.mubr.msk.f32.mxu1 %vm238_vm0, %v5819_v59  ;;  %4913 = vmatprep.mubr.msk.f32.mxu0 %vm238_vm0, %v5698_v0  ;;  %v5853_v0 = vld [vmem:[%s5386_s25 + $0xf0] sm:$0xff] }
  0x75   : > { %4688 = vmatmul.mubr.msk.f32.gmra.mrb[16].mxu1 %vm238_vm0, %v5830_v33  ;;  %4914 = vmatmul.mubr.msk.f32.vlgmr.msra.gmra.mrb[0].mxu0 %vm238_vm0, %v5713_v3  ;;  %v881_v3 = vld [vmem:[%s5386_s25 + $0x2] sm:$0xff] }
  0x76   : > { %4962 = vmatpush3.msra.mxu0 %v5520_v28  ;;  %4690 = vmatprep.mubr.msk.f32.mxu1 %vm238_vm0, %v5833_v29  ;;  %v5865_v28 = vld [vmem:[%s5386_s25 + $0xf8] sm:$0xff] }
  0x77   : > { %4916 = vmatprep.mubr.msk.f32.mxu0 %vm238_vm0, %v5719_v5  ;;  %5011 = vmatprep.subr.mxu0 %v5838_v37  ;;  %v5868_v5 = vld [vmem:[%s5386_s25 + $0x108] sm:$0xff] }
  0x79   : > { %4691 = vmatmul.mubr.msk.f32.gmra.mrb[18].mxu1 %vm238_vm0, %v5848_v31  ;;  %4917 = vmatmul.mubr.msk.f32.gmra.mrb[2].mxu0 %vm238_vm0, %v5733_v7  ;;  %v5879_v7 = vld [vmem:[%s5386_s25 + $0x110] sm:$0xff] }
  0x7a   : > { %4693 = vmatprep.mubr.msk.f32.mxu1 %vm238_vm0, %v5853_v0  ;;  %4919 = vmatprep.mubr.msk.f32.mxu0 %vm238_vm0, %v5739_v10  ;;  %v5882_v10 = vld [vmem:[%s5386_s25 + $0x120] sm:$0xff] }
  0x7d   : > { %4694 = vmatmul.mubr.msk.f32.gmra.mrb[20].mxu1 %vm238_vm0, %v5865_v28  ;;  %4920 = vmatmul.mubr.msk.f32.gmra.mrb[4].mxu0 %vm238_vm0, %v5753_v57  ;;  %v5893_v57 = vld [vmem:[%s5386_s25 + $0x128] sm:$0xff] }
  0x7e   : > { %4696 = vmatprep.mubr.msk.f32.mxu1 %vm238_vm0, %v5868_v5  ;;  %4922 = vmatprep.mubr.msk.f32.mxu0 %vm238_vm0, %v5759_v51  ;;  %v5896_v51 = vld [vmem:[%s5386_s25 + $0x138] sm:$0xff] }
  0x81   : > { %4697 = vmatmul.mubr.msk.f32.gmra.mrb[22].mxu1 %vm238_vm0, %v5879_v7  ;;  %4923 = vmatmul.mubr.msk.f32.gmra.mrb[6].mxu0 %vm238_vm0, %v5773_v47  ;;  %v5907_v47 = vld [vmem:[%s5386_s25 + $0x140] sm:$0xff] }
  0x82   : > { %4699 = vmatprep.mubr.msk.f32.mxu1 %vm238_vm0, %v5882_v10  ;;  %4925 = vmatprep.mubr.msk.f32.mxu0 %vm238_vm0, %v5779_v43  ;;  %v5910_v43 = vld [vmem:[%s5386_s25 + $0x150] sm:$0xff] }
  0x85   : > { %4700 = vmatmul.mubr.msk.f32.gmra.mrb[24].mxu1 %vm238_vm0, %v5893_v57  ;;  %4926 = vmatmul.mubr.msk.f32.gmra.mrb[8].mxu0 %vm238_vm0, %v5793_v39  ;;  %v5921_v39 = vld [vmem:[%s5386_s25 + $0x158] sm:$0xff] }
  0x86   : > { %4702 = vmatprep.mubr.msk.f32.mxu1 %vm238_vm0, %v5896_v51  ;;  %4928 = vmatprep.mubr.msk.f32.mxu0 %vm238_vm0, %v5799_v35  ;;  %v5924_v35 = vld [vmem:[%s5386_s25 + $0x168] sm:$0xff] }
  0x89   : > { %4703 = vmatmul.mubr.msk.f32.gmra.mrb[26].mxu1 %vm238_vm0, %v5907_v47  ;;  %4929 = vmatmul.mubr.msk.f32.gmra.mrb[10].mxu0 %vm238_vm0, %v5813_v62  ;;  %v5935_v62 = vld [vmem:[%s5386_s25 + $0x170] sm:$0xff] }
  0x8a   : > { %4705 = vmatprep.mubr.msk.f32.mxu1 %vm238_vm0, %v5910_v43  ;;  %4931 = vmatprep.mubr.msk.f32.mxu0 %vm238_vm0, %v5819_v59 }
  0x8d   : > { %4706 = vmatmul.mubr.msk.f32.gmra.mrb[28].mxu1 %vm238_vm0, %v5921_v39  ;;  %4932 = vmatmul.mubr.msk.f32.gmra.mrb[12].mxu0 %vm238_vm0, %v5830_v33  ;;  %v882_v33 = vld [vmem:[%s5386_s25 + $0xa] sm:$0xff] }
  0x8e   : > { %4708 = vmatprep.mubr.msk.f32.mxu1 %vm238_vm0, %v5924_v35  ;;  %4934 = vmatprep.mubr.msk.f32.mxu0 %vm238_vm0, %v5833_v29 }
  0x91   : > { %4709 = vmatmul.mubr.msk.f32.gmra.mrb[30].mxu1 %vm238_vm0, %v5935_v62  ;;  %4935 = vmatmul.mubr.msk.f32.gmra.mrb[14].mxu0 %vm238_vm0, %v5848_v31 }
  0x92   : > { %4713 = vmatprep.mubr.msk.f32.mxu1 %vm238_vm0, %v881_v3  ;;  %4937 = vmatprep.mubr.msk.f32.mxu0 %vm238_vm0, %v5853_v0  ;;  %v6472_v3 = vld [vmem:[#allocation22_spill] sm:$0xff] }
  0x95   : > { %4714 = vmatmul.mubr.msk.f32.vlgmr.msra.gmra.mrb[0].mxu1 %vm238_vm0, %v882_v33  ;;  %4938 = vmatmul.mubr.msk.f32.gmra.mrb[16].mxu0 %vm238_vm0, %v5865_v28  ;;  %v4145_v33 = vld [vmem:[%s5386_s25 + $0x198] sm:$0xff] }
  0x96   : > { %4762 = vmatpush3.msra.mxu1 %v5681_v61  ;;  %4716 = vmatprep.mubr.msk.f32.mxu1 %vm238_vm0, %v5498_v24  ;;  %v5988_v24 = vld [vmem:[%s5386_s25 + $0x180] sm:$0xff] }
  0x97   : > { %4940 = vmatprep.mubr.msk.f32.mxu0 %vm238_vm0, %v5868_v5  ;;  %5061 = vmatprep.subr.mxu1 %v5370_v1  ;;  %v4146_v61 = vld [vmem:[%s5386_s25 + $0x1a0] sm:$0xff] }
  0x99   : > { %4717 = vmatmul.mubr.msk.f32.gmra.mrb[2].mxu1 %vm238_vm0, %v5509_v25  ;;  %4941 = vmatmul.mubr.msk.f32.gmra.mrb[18].mxu0 %vm238_vm0, %v5879_v7  ;;  %v5999_v25 = vld [vmem:[%s5386_s25 + $0x188] sm:$0xff] }
  0x9a   : > { %4719 = vmatprep.mubr.msk.f32.mxu1 %vm238_vm0, %v5515_v27  ;;  %4943 = vmatprep.mubr.msk.f32.mxu0 %vm238_vm0, %v5882_v10 }
  0x9d   : > { %4720 = vmatmul.mubr.msk.f32.gmra.mrb[4].mxu1 %vm238_vm0, %v5532_v30  ;;  %4944 = vmatmul.mubr.msk.f32.gmra.mrb[20].mxu0 %vm238_vm0, %v5893_v57 }
  0x9e   : > { %4722 = vmatprep.mubr.msk.f32.mxu1 %vm238_vm0, %v5540_v32  ;;  %4946 = vmatprep.mubr.msk.f32.mxu0 %vm238_vm0, %v5896_v51 }
  0xa1   : > { %4723 = vmatmul.mubr.msk.f32.gmra.mrb[6].mxu1 %vm238_vm0, %v5555_v34  ;;  %4947 = vmatmul.mubr.msk.f32.gmra.mrb[22].mxu0 %vm238_vm0, %v5907_v47 }
  0xa2   : > { %4725 = vmatprep.mubr.msk.f32.mxu1 %vm238_vm0, %v5561_v36  ;;  %4949 = vmatprep.mubr.msk.f32.mxu0 %vm238_vm0, %v5910_v43 }
  0xa5   : > { %4726 = vmatmul.mubr.msk.f32.gmra.mrb[8].mxu1 %vm238_vm0, %v5575_v38  ;;  %4950 = vmatmul.mubr.msk.f32.gmra.mrb[24].mxu0 %vm238_vm0, %v5921_v39 }
  0xa6   : > { %4728 = vmatprep.mubr.msk.f32.mxu1 %vm238_vm0, %v5581_v40  ;;  %4952 = vmatprep.mubr.msk.f32.mxu0 %vm238_vm0, %v5924_v35 }
  0xa9   : > { %4729 = vmatmul.mubr.msk.f32.gmra.mrb[10].mxu1 %vm238_vm0, %v5595_v42  ;;  %4953 = vmatmul.mubr.msk.f32.gmra.mrb[26].mxu0 %vm238_vm0, %v5935_v62 }
  0xaa   : > { %4731 = vmatprep.mubr.msk.f32.mxu1 %vm238_vm0, %v5601_v44  ;;  %4955 = vmatprep.mubr.msk.f32.mxu0 %vm238_vm0, %v5988_v24 }
  0xad   : > { %4732 = vmatmul.mubr.msk.f32.gmra.mrb[12].mxu1 %vm238_vm0, %v5615_v46  ;;  %4956 = vmatmul.mubr.msk.f32.gmra.mrb[28].mxu0 %vm238_vm0, %v5999_v25 }
  0xae   : > { %4734 = vmatprep.mubr.msk.f32.mxu1 %vm238_vm0, %v5621_v48  ;;  %4958 = vmatprep.mubr.msk.f32.mxu0 %vm238_vm0, %v4145_v33  ;;  %v6473_v33 = vld [vmem:[#allocation10_spill] sm:$0xff] }
  0xb1   : > { %4735 = vmatmul.mubr.msk.f32.gmra.mrb[14].mxu1 %vm238_vm0, %v5635_v50  ;;  %4959 = vmatmul.mubr.msk.f32.gmra.mrb[30].mxu0 %vm238_vm0, %v4146_v61  ;;  %v6474_v61 = vld [vmem:[#allocation23_spill] sm:$0xff] }
  0xb2   : > { %4737 = vmatprep.mubr.msk.f32.mxu1 %vm238_vm0, %v5641_v52  ;;  %4963 = vmatprep.mubr.msk.f32.mxu0 %vm238_vm0, %v5395_v8  ;;  %v6456_v8 = vld [vmem:[#allocation27_spill] sm:$0xff] }
  0xb5   : > { %4738 = vmatmul.mubr.msk.f32.gmra.mrb[16].mxu1 %vm238_vm0, %v5655_v54  ;;  %4964 = vmatmul.mubr.msk.f32.vlgmr.msra.gmra.mrb[0].mxu0 %vm238_vm0, %v5408_v11  ;;  %v6457_v11 = vld [vmem:[#allocation2_spill] sm:$0xff] }
  0xb6   : > { %5012 = vmatpush3.msra.mxu0 %v5838_v37  ;;  %4740 = vmatprep.mubr.msk.f32.mxu1 %vm238_vm0, %v5659_v56  ;;  %v6471_v37 = vld [vmem:[#allocation9_spill] sm:$0xff] }
  0xb7   : > { %4966 = vmatprep.mubr.msk.f32.mxu0 %vm238_vm0, %v5414_v12  ;;  %v6458_v12 = vld [vmem:[#allocation15_spill] sm:$0xff] }
  0xb9   : > { %4741 = vmatmul.mubr.msk.f32.gmra.mrb[18].mxu1 %vm238_vm0, %v5670_v58  ;;  %4967 = vmatmul.mubr.msk.f32.gmra.mrb[2].mxu0 %vm238_vm0, %v5425_v13  ;;  %v6459_v13 = vld [vmem:[#allocation3_spill] sm:$0xff] }
  0xba   : > { %4743 = vmatprep.mubr.msk.f32.mxu1 %vm238_vm0, %v5676_v60  ;;  %4969 = vmatprep.mubr.msk.f32.mxu0 %vm238_vm0, %v5428_v14  ;;  %v6460_v14 = vld [vmem:[#allocation16_spill] sm:$0xff] }
  0xbd   : > { %4744 = vmatmul.mubr.msk.f32.gmra.mrb[20].mxu1 %vm238_vm0, %v5693_v63  ;;  %4970 = vmatmul.mubr.msk.f32.gmra.mrb[4].mxu0 %vm238_vm0, %v5439_v15  ;;  %v6461_v15 = vld [vmem:[#allocation4_spill] sm:$0xff] }
  0xbe   : > { %4746 = vmatprep.mubr.msk.f32.mxu1 %vm238_vm0, %v5701_v2  ;;  %4972 = vmatprep.mubr.msk.f32.mxu0 %vm238_vm0, %v5442_v16  ;;  %v6462_v16 = vld [vmem:[#allocation17_spill] sm:$0xff] }
  0xc1   : > { %4747 = vmatmul.mubr.msk.f32.gmra.mrb[22].mxu1 %vm238_vm0, %v5716_v4  ;;  %4973 = vmatmul.mubr.msk.f32.gmra.mrb[6].mxu0 %vm238_vm0, %v5453_v17  ;;  %v6463_v17 = vld [vmem:[#allocation5_spill] sm:$0xff] }
  0xc2   : > { %4749 = vmatprep.mubr.msk.f32.mxu1 %vm238_vm0, %v5722_v6  ;;  %4975 = vmatprep.mubr.msk.f32.mxu0 %vm238_vm0, %v5456_v18  ;;  %v6464_v18 = vld [vmem:[#allocation18_spill] sm:$0xff] }
  0xc5   : > { %4750 = vmatmul.mubr.msk.f32.gmra.mrb[24].mxu1 %vm238_vm0, %v5736_v9  ;;  %4976 = vmatmul.mubr.msk.f32.gmra.mrb[8].mxu0 %vm238_vm0, %v5467_v19  ;;  %v6465_v19 = vld [vmem:[#allocation6_spill] sm:$0xff] }
  0xc6   : > { %4752 = vmatprep.mubr.msk.f32.mxu1 %vm238_vm0, %v5742_v55  ;;  %4978 = vmatprep.mubr.msk.f32.mxu0 %vm238_vm0, %v5470_v20  ;;  %v6466_v20 = vld [vmem:[#allocation19_spill] sm:$0xff] }
  0xc9   : > { %4753 = vmatmul.mubr.msk.f32.gmra.mrb[26].mxu1 %vm238_vm0, %v5756_v53  ;;  %4979 = vmatmul.mubr.msk.f32.gmra.mrb[10].mxu0 %vm238_vm0, %v5481_v21  ;;  %v6467_v21 = vld [vmem:[#allocation7_spill] sm:$0xff] }
  0xca   : > { %4755 = vmatprep.mubr.msk.f32.mxu1 %vm238_vm0, %v5762_v49  ;;  %4981 = vmatprep.mubr.msk.f32.mxu0 %vm238_vm0, %v5484_v22  ;;  %v6469_v22 = vld [vmem:[#allocation8_spill] sm:$0xff] }
  0xcd   : > { %4756 = vmatmul.mubr.msk.f32.gmra.mrb[28].mxu1 %vm238_vm0, %v5776_v45  ;;  %4982 = vmatmul.mubr.msk.f32.gmra.mrb[12].mxu0 %vm238_vm0, %v5495_v23  ;;  %v6470_v23 = vld [vmem:[#allocation21_spill] sm:$0xff] }
  0xce   : > { %4758 = vmatprep.mubr.msk.f32.mxu1 %vm238_vm0, %v5782_v41  ;;  %4984 = vmatprep.mubr.msk.f32.mxu0 %vm238_vm0, %v5512_v26 }
  0xd1   : > { %4759 = vmatmul.mubr.msk.f32.gmra.mrb[30].mxu1 %vm238_vm0, %v6456_v8  ;;  %4985 = vmatmul.mubr.msk.f32.gmra.mrb[14].mxu0 %vm238_vm0, %v6457_v11  ;;  %v6483_v8 = vld [vmem:[#allocation30_spill] sm:$0xff] }
  0xd2   : > { %4763 = vmatprep.mubr.msk.f32.mxu1 %vm238_vm0, %v6458_v12  ;;  %4987 = vmatprep.mubr.msk.f32.mxu0 %vm238_vm0, %v6459_v13  ;;  %v6475_v12 = vld [vmem:[#allocation11_spill] sm:$0xff] }
  0xd5   : > { %4764 = vmatmul.mubr.msk.f32.vlgmr.msra.gmra.mrb[0].mxu1 %vm238_vm0, %v6460_v14  ;;  %4988 = vmatmul.mubr.msk.f32.gmra.mrb[16].mxu0 %vm238_vm0, %v6461_v15  ;;  %v6476_v14 = vld [vmem:[#allocation24_spill] sm:$0xff] }
  0xd6   : > { %5062 = vmatpush3.msra.mxu1 %v5370_v1  ;;  %4766 = vmatprep.mubr.msk.f32.mxu1 %vm238_vm0, %v6462_v16  ;;  %v6468_v1 = vld [vmem:[#allocation20_spill] sm:$0xff] }
  0xd7   : > { %4990 = vmatprep.mubr.msk.f32.mxu0 %vm238_vm0, %v6463_v17  ;;  %v6477_v16 = vld [vmem:[#allocation12_spill] sm:$0xff] }
  0xd9   : > { %4767 = vmatmul.mubr.msk.f32.gmra.mrb[2].mxu1 %vm238_vm0, %v6464_v18  ;;  %4991 = vmatmul.mubr.msk.f32.gmra.mrb[18].mxu0 %vm238_vm0, %v6465_v19  ;;  %v6478_v18 = vld [vmem:[#allocation25_spill] sm:$0xff] }
  0xda   : > { %4769 = vmatprep.mubr.msk.f32.mxu1 %vm238_vm0, %v6466_v20  ;;  %4993 = vmatprep.mubr.msk.f32.mxu0 %vm238_vm0, %v6467_v21  ;;  %v6479_v20 = vld [vmem:[#allocation13_spill] sm:$0xff] }
  0xdd   : > { %4770 = vmatmul.mubr.msk.f32.gmra.mrb[4].mxu1 %vm238_vm0, %v6468_v1  ;;  %4994 = vmatmul.mubr.msk.f32.gmra.mrb[20].mxu0 %vm238_vm0, %v6469_v22  ;;  %v6124_v1 = vld [vmem:[%s5386_s25 + $0x181] sm:$0xff] }
  0xde   : > { %4772 = vmatprep.mubr.msk.f32.mxu1 %vm238_vm0, %v6470_v23  ;;  %4996 = vmatprep.mubr.msk.f32.mxu0 %vm238_vm0, %v6471_v37  ;;  %v6480_v23 = vld [vmem:[#allocation26_spill] sm:$0xff] }
  0xe1   : > { %4773 = vmatmul.mubr.msk.f32.gmra.mrb[6].mxu1 %vm238_vm0, %v6472_v3  ;;  %4997 = vmatmul.mubr.msk.f32.gmra.mrb[22].mxu0 %vm238_vm0, %v6473_v33  ;;  %v6481_v3 = vld [vmem:[#allocation14_spill] sm:$0xff] }
  0xe2   : > { %4775 = vmatprep.mubr.msk.f32.mxu1 %vm238_vm0, %v6474_v61  ;;  %4999 = vmatprep.mubr.msk.f32.mxu0 %vm238_vm0, %v6475_v12  ;;  %v6482_v61 = vld [vmem:[#allocation28_spill] sm:$0xff] }
  0xe5   : > { %4776 = vmatmul.mubr.msk.f32.gmra.mrb[8].mxu1 %vm238_vm0, %v6476_v14  ;;  %5000 = vmatmul.mubr.msk.f32.gmra.mrb[24].mxu0 %vm238_vm0, %v6477_v16  ;;  %v6135_v14 = vld [vmem:[%s5386_s25 + $0x189] sm:$0xff] }
  0xe6   : > { %4778 = vmatprep.mubr.msk.f32.mxu1 %vm238_vm0, %v6478_v18  ;;  %5002 = vmatprep.mubr.msk.f32.mxu0 %vm238_vm0, %v6479_v20  ;;  %v4210_v18 = vld [vmem:[%s5386_s25 + $0x199] sm:$0xff] }
  0xe9   : > { %4779 = vmatmul.mubr.msk.f32.gmra.mrb[10].mxu1 %vm238_vm0, %v6480_v23  ;;  %5003 = vmatmul.mubr.msk.f32.gmra.mrb[26].mxu0 %vm238_vm0, %v6481_v3  ;;  %v4211_v23 = vld [vmem:[%s5386_s25 + $0x1a1] sm:$0xff]  ;;  %v6484_v3 = vld [vmem:[#allocation32_spill] sm:$0xff] }
  0xea   : > { %4781 = vmatprep.mubr.msk.f32.mxu1 %vm238_vm0, %v6482_v61  ;;  %5005 = vmatprep.mubr.msk.f32.mxu0 %vm238_vm0, %v6124_v1 }
  0xed   : > { %4782 = vmatmul.mubr.msk.f32.gmra.mrb[12].mxu1 %vm238_vm0, %v6483_v8  ;;  %5006 = vmatmul.mubr.msk.f32.gmra.mrb[28].mxu0 %vm238_vm0, %v6135_v14 }
  0xee   : > { %4784 = vmatprep.mubr.msk.f32.mxu1 %vm238_vm0, %v5819_v59  ;;  %5008 = vmatprep.mubr.msk.f32.mxu0 %vm238_vm0, %v4210_v18 }
  0xf1   : > { %4785 = vmatmul.mubr.msk.f32.gmra.mrb[14].mxu1 %vm238_vm0, %v6484_v3  ;;  %5009 = vmatmul.mubr.msk.f32.gmra.mrb[30].mxu0 %vm238_vm0, %v4211_v23 }
  0xf2   : > { %4787 = vmatprep.mubr.msk.f32.mxu1 %vm238_vm0, %v5833_v29  ;;  %5013 = vmatprep.mubr.msk.f32.mxu0 %vm238_vm0, %v5515_v27  ;;  %v6486_v27 = vld [vmem:[#allocation29_spill] sm:$0xff] }
  0xf3   : > { %v4275_v29 = vld [vmem:[%s5386_s25 + $0x19a] sm:$0xff] }
  0xf5   : > { %4788 = vmatmul.mubr.msk.f32.gmra.mrb[16].mxu1 %vm238_vm0, %v5848_v31  ;;  %5014 = vmatmul.mubr.msk.f32.vlgmr.msra.gmra.mrb[0].mxu0 %vm238_vm0, %v5532_v30  ;;  %v6487_v30 = vld [vmem:[#allocation14_spill] sm:$0xff]  ;;  %v6488_v31 = vld [vmem:[#allocation31_spill] sm:$0xff] }
  0xf6   : > { %4790 = vmatprep.mubr.msk.f32.mxu1 %vm238_vm0, %v5853_v0  ;;  %5016 = vmatprep.mubr.msk.f32.mxu0 %vm238_vm0, %v5540_v32  ;;  %v4276_v32 = vld [vmem:[%s5386_s25 + $0x1a2] sm:$0xff] }
  0xf9   : > { %4791 = vmatmul.mubr.msk.f32.gmra.mrb[18].mxu1 %vm238_vm0, %v5865_v28  ;;  %5017 = vmatmul.mubr.msk.f32.gmra.mrb[2].mxu0 %vm238_vm0, %v5555_v34 }
  0xfa   : > { %4793 = vmatprep.mubr.msk.f32.mxu1 %vm238_vm0, %v5868_v5  ;;  %5019 = vmatprep.mubr.msk.f32.mxu0 %vm238_vm0, %v5561_v36 }
  0xfd   : > { %4794 = vmatmul.mubr.msk.f32.gmra.mrb[20].mxu1 %vm238_vm0, %v5879_v7  ;;  %5020 = vmatmul.mubr.msk.f32.gmra.mrb[4].mxu0 %vm238_vm0, %v5575_v38 }
  0xfe   : > { %4796 = vmatprep.mubr.msk.f32.mxu1 %vm238_vm0, %v5882_v10  ;;  %5022 = vmatprep.mubr.msk.f32.mxu0 %vm238_vm0, %v5581_v40 }
 0x101   : > { %4797 = vmatmul.mubr.msk.f32.gmra.mrb[22].mxu1 %vm238_vm0, %v5893_v57  ;;  %5023 = vmatmul.mubr.msk.f32.gmra.mrb[6].mxu0 %vm238_vm0, %v5595_v42 }
 0x102   : > { %4799 = vmatprep.mubr.msk.f32.mxu1 %vm238_vm0, %v5896_v51  ;;  %5025 = vmatprep.mubr.msk.f32.mxu0 %vm238_vm0, %v5601_v44 }
 0x105   : > { %4800 = vmatmul.mubr.msk.f32.gmra.mrb[24].mxu1 %vm238_vm0, %v5907_v47  ;;  %5026 = vmatmul.mubr.msk.f32.gmra.mrb[8].mxu0 %vm238_vm0, %v5615_v46 }
 0x106   : > { %4802 = vmatprep.mubr.msk.f32.mxu1 %vm238_vm0, %v5910_v43  ;;  %5028 = vmatprep.mubr.msk.f32.mxu0 %vm238_vm0, %v5621_v48 }
 0x109   : > { %4803 = vmatmul.mubr.msk.f32.gmra.mrb[26].mxu1 %vm238_vm0, %v5921_v39  ;;  %5029 = vmatmul.mubr.msk.f32.gmra.mrb[10].mxu0 %vm238_vm0, %v5635_v50 }
 0x10a   : > { %4805 = vmatprep.mubr.msk.f32.mxu1 %vm238_vm0, %v5924_v35  ;;  %5031 = vmatprep.mubr.msk.f32.mxu0 %vm238_vm0, %v5641_v52  ;;  %v6294_v52 = vld [vmem:[%s6378_s2] ss:$0 sm:$0xff] }
 0x10d   : > { %4806 = vmatmul.mubr.msk.f32.gmra.mrb[28].mxu1 %vm238_vm0, %v5935_v62  ;;  %5032 = vmatmul.mubr.msk.f32.gmra.mrb[12].mxu0 %vm238_vm0, %v5655_v54 }
 0x10e   : > { %4808 = vmatprep.mubr.msk.f32.mxu1 %vm238_vm0, %v5988_v24  ;;  %5034 = vmatprep.mubr.msk.f32.mxu0 %vm238_vm0, %v5659_v56 }
 0x111   : > { %4809 = vmatmul.mubr.msk.f32.gmra.mrb[30].mxu1 %vm238_vm0, %v5999_v25  ;;  %5035 = vmatmul.mubr.msk.f32.gmra.mrb[14].mxu0 %vm238_vm0, %v5670_v58 }
 0x112   : > { %4837 = vmatprep.mubr.msk.f32.mxu1 %vm238_vm0, %v5512_v26  ;;  %5037 = vmatprep.mubr.msk.f32.mxu0 %vm238_vm0, %v5676_v60  ;;  %v6485_v26 = vld [vmem:[#allocation27_spill] sm:$0xff] }
 0x115   : > { %4838 = vmatmul.mubr.msk.f32.vlgmr.msra.gmra.mrb[16].mxu1 %vm238_vm0, %v6457_v11  ;;  %5038 = vmatmul.mubr.msk.f32.gmra.mrb[16].mxu0 %vm238_vm0, %v5693_v63 }
 0x116   : > { %4840 = vmatprep.mubr.msk.f32.mxu1 %vm238_vm0, %v6459_v13  ;;  %5040 = vmatprep.mubr.msk.f32.mxu0 %vm238_vm0, %v5701_v2 }
 0x119   : > { %4841 = vmatmul.mubr.msk.f32.gmra.mrb[18].mxu1 %vm238_vm0, %v6461_v15  ;;  %5041 = vmatmul.mubr.msk.f32.gmra.mrb[18].mxu0 %vm238_vm0, %v5716_v4 }
 0x11a   : > { %4843 = vmatprep.mubr.msk.f32.mxu1 %vm238_vm0, %v6463_v17  ;;  %5043 = vmatprep.mubr.msk.f32.mxu0 %vm238_vm0, %v5722_v6 }
 0x11d   : > { %4844 = vmatmul.mubr.msk.f32.gmra.mrb[20].mxu1 %vm238_vm0, %v6465_v19  ;;  %5044 = vmatmul.mubr.msk.f32.gmra.mrb[20].mxu0 %vm238_vm0, %v5736_v9 }
 0x11e   : > { %4846 = vmatprep.mubr.msk.f32.mxu1 %vm238_vm0, %v6467_v21  ;;  %5046 = vmatprep.mubr.msk.f32.mxu0 %vm238_vm0, %v5742_v55 }
 0x121   : > { %4847 = vmatmul.mubr.msk.f32.gmra.mrb[22].mxu1 %vm238_vm0, %v6469_v22  ;;  %5047 = vmatmul.mubr.msk.f32.gmra.mrb[22].mxu0 %vm238_vm0, %v5756_v53 }
 0x122   : > { %4849 = vmatprep.mubr.msk.f32.mxu1 %vm238_vm0, %v6471_v37  ;;  %5049 = vmatprep.mubr.msk.f32.mxu0 %vm238_vm0, %v5762_v49 }
 0x125   : > { %4850 = vmatmul.mubr.msk.f32.gmra.mrb[24].mxu1 %vm238_vm0, %v6473_v33  ;;  %5050 = vmatmul.mubr.msk.f32.gmra.mrb[24].mxu0 %vm238_vm0, %v5776_v45 }
 0x126   : > { %4852 = vmatprep.mubr.msk.f32.mxu1 %vm238_vm0, %v6475_v12  ;;  %5052 = vmatprep.mubr.msk.f32.mxu0 %vm238_vm0, %v5782_v41 }
 0x129   : > { %4853 = vmatmul.mubr.msk.f32.gmra.mrb[26].mxu1 %vm238_vm0, %v6477_v16  ;;  %5053 = vmatmul.mubr.msk.f32.gmra.mrb[26].mxu0 %vm238_vm0, %v6485_v26 }
 0x12a   : > { %4855 = vmatprep.mubr.msk.f32.mxu1 %vm238_vm0, %v6479_v20  ;;  %5055 = vmatprep.mubr.msk.f32.mxu0 %vm238_vm0, %v6486_v27 }
 0x12d   : > { %4856 = vmatmul.mubr.msk.f32.gmra.mrb[28].mxu1 %vm238_vm0, %v6487_v30  ;;  %5056 = vmatmul.mubr.msk.f32.gmra.mrb[28].mxu0 %vm238_vm0, %v6488_v31 }
 0x12e   : > { %4858 = vmatprep.mubr.msk.f32.mxu1 %vm238_vm0, %v6124_v1  ;;  %5058 = vmatprep.mubr.msk.f32.mxu0 %vm238_vm0, %v4275_v29 }
 0x131   : > { %4859 = vmatmul.mubr.msk.f32.gmra.mrb[30].mxu1 %vm238_vm0, %v6135_v14  ;;  %5059 = vmatmul.mubr.msk.f32.gmra.mrb[30].mxu0 %vm238_vm0, %v4276_v32 }
 0x1a8   : > { %v4765_v34 = vpop.f32.mrb[0].mxu1 }
 0x1a9   : > { %v1465_v35 = vpop.f32.mrb[1].mxu1 }
 0x1ac   : > { %v4768_v36 = vpop.f32.mrb[2].mxu1 }
 0x1ad   : > { %v1475_v38 = vpop.f32.mrb[3].mxu1 }
 0x1b0   : > { %v4771_v39 = vpop.f32.mrb[4].mxu1 }
 0x1b1   : > { %v1485_v40 = vpop.f32.mrb[5].mxu1 }
 0x1b4   : > { %v4774_v41 = vpop.f32.mrb[6].mxu1 }
 0x1b5   : > { %v1495_v42 = vpop.f32.mrb[7].mxu1 }
 0x1b8   : > { %v4777_v43 = vpop.f32.mrb[8].mxu1 }
 0x1b9   : > { %v6277_v44 = vpop.f32.mrb[9].mxu1 }
 0x1bc   : > { %v6279_v45 = vpop.f32.mrb[10].mxu1 }
 0x1bd   : > { %v6281_v46 = vpop.f32.mrb[11].mxu1 }
 0x1c0   : > { %v6283_v47 = vpop.f32.mrb[12].mxu1 }
 0x1c1   : > { %v6285_v48 = vpop.f32.mrb[13].mxu1 }
 0x1c4   : > { %v6287_v49 = vpop.f32.mrb[14].mxu1 }
 0x1c5   : > { %v6289_v50 = vpop.f32.mrb[15].mxu1 }
 0x1c8   : > { %v5015_v51 = vpop.f32.mrb[0].mxu0 }
 0x1c9   : > { %v5063_v53 = vadd.f32 %v5015_v51, %v4765_v34  ;;  %v3401_v54 = vpop.f32.mrb[1].mxu0 }
 0x1ca   : > { %v5064_v56 = vadd.f32 %v3401_v54, %v1465_v35 }
 0x1cb   : > { %v3600_v58 = vadd.f32 %v5063_v53, %v6294_v52 }
 0x1cc   : > { %v3599_v59 = vadd.f32 %v5064_v56, %v6294_v52  ;;  %v5018_v60 = vpop.f32.mrb[2].mxu0 }
 0x1cd   : > { %vm3632_vm1 = vcmp.gt.f32.partialorder %v3600_v58, 0.0  ;;  %v3664_v62 = vmul.f32 0.1, %v3600_v58  ;;  %v5065_v63 = vadd.f32 %v5018_v60, %v4768_v36  ;;  %v3411_v0 = vpop.f32.mrb[3].mxu0 }
 0x1ce   : > { %vm3631_vm2 = vcmp.gt.f32.partialorder %v3599_v59, 0.0  ;;  %v3663_v2 = vmul.f32 0.1, %v3599_v59  ;;  %v5066_v4 = vadd.f32 %v3411_v0, %v1475_v38 }
 0x1cf   : > { %v3696_v5 = vsel %vm3632_vm1, %v3600_v58, %v3664_v62  ;;  %v3602_v6 = vadd.f32 %v5065_v63, %v6294_v52 }
 0x1d0   : > { %3728 = vst [vmem:[%s6302_s16 + $0x8] sm:$0xff] %v3696_v5  ;;  %v3695_v7 = vsel %vm3631_vm2, %v3599_v59, %v3663_v2  ;;  %v3601_v9 = vadd.f32 %v5066_v4, %v6294_v52  ;;  %v5021_v10 = vpop.f32.mrb[4].mxu0 }
 0x1d1   : > { %3727 = vst [vmem:[%s6302_s16] sm:$0xff] %v3695_v7  ;;  %vm3634_vm3 = vcmp.gt.f32.partialorder %v3602_v6, 0.0  ;;  %v3666_v55 = vmul.f32 0.1, %v3602_v6  ;;  %v5067_v57 = vadd.f32 %v5021_v10, %v4771_v39  ;;  %v3421_v28 = vpop.f32.mrb[5].mxu0 }
 0x1d2   : > { %vm3633_vm4 = vcmp.gt.f32.partialorder %v3601_v9, 0.0  ;;  %v3665_v24 = vmul.f32 0.1, %v3601_v9  ;;  %v5068_v25 = vadd.f32 %v3421_v28, %v1485_v40 }
 0x1d3   : > { %v3698_v8 = vsel %vm3634_vm3, %v3602_v6, %v3666_v55  ;;  %v3604_v11 = vadd.f32 %v5067_v57, %v6294_v52 }
 0x1d4   : > { %3730 = vst [vmem:[%s6302_s16 + $0x18] sm:$0xff] %v3698_v8  ;;  %v3697_v13 = vsel %vm3633_vm4, %v3601_v9, %v3665_v24  ;;  %v3603_v15 = vadd.f32 %v5068_v25, %v6294_v52  ;;  %v5024_v17 = vpop.f32.mrb[6].mxu0 }
 0x1d5   : > { %3729 = vst [vmem:[%s6302_s16 + $0x10] sm:$0xff] %v3697_v13  ;;  %vm3636_vm5 = vcmp.gt.f32.partialorder %v3604_v11, 0.0  ;;  %v3668_v19 = vmul.f32 0.1, %v3604_v11  ;;  %v5069_v21 = vadd.f32 %v5024_v17, %v4774_v41  ;;  %v3431_v22 = vpop.f32.mrb[7].mxu0 }
 0x1d6   : > { %vm3635_vm6 = vcmp.gt.f32.partialorder %v3603_v15, 0.0  ;;  %v3667_v37 = vmul.f32 0.1, %v3603_v15  ;;  %v5070_v33 = vadd.f32 %v3431_v22, %v1495_v42 }
 0x1d7   : > { %v3700_v12 = vsel %vm3636_vm5, %v3604_v11, %v3668_v19  ;;  %v3606_v16 = vadd.f32 %v5069_v21, %v6294_v52 }
 0x1d8   : > { %3732 = vst [vmem:[%s6302_s16 + $0x28] sm:$0xff] %v3700_v12  ;;  %v3699_v20 = vsel %vm3635_vm6, %v3603_v15, %v3667_v37  ;;  %v3605_v1 = vadd.f32 %v5070_v33, %v6294_v52  ;;  %v5027_v3 = vpop.f32.mrb[8].mxu0 }
 0x1d9   : > { %3731 = vst [vmem:[%s6302_s16 + $0x20] sm:$0xff] %v3699_v20  ;;  %vm3638_vm7 = vcmp.gt.f32.partialorder %v3606_v16, 0.0  ;;  %v3670_v61 = vmul.f32 0.1, %v3606_v16  ;;  %v5071_v14 = vadd.f32 %v5027_v3, %v4777_v43  ;;  %v3441_v18 = vpop.f32.mrb[9].mxu0 }
 0x1da   : > { %vm3637_vm8 = vcmp.gt.f32.partialorder %v3605_v1, 0.0  ;;  %v3669_v23 = vmul.f32 0.1, %v3605_v1  ;;  %v5072_v26 = vadd.f32 %v3441_v18, %v6277_v44 }
 0x1db   : > { %v3702_v27 = vsel %vm3638_vm7, %v3606_v16, %v3670_v61  ;;  %v3608_v29 = vadd.f32 %v5071_v14, %v6294_v52 }
 0x1dc   : > { %3734 = vst [vmem:[%s6302_s16 + $0x38] sm:$0xff] %v3702_v27  ;;  %v3701_v30 = vsel %vm3637_vm8, %v3605_v1, %v3669_v23  ;;  %v3607_v31 = vadd.f32 %v5072_v26, %v6294_v52  ;;  %v5030_v32 = vpop.f32.mrb[10].mxu0 }
 0x1dd   : > { %3733 = vst [vmem:[%s6302_s16 + $0x30] sm:$0xff] %v3701_v30  ;;  %vm3640_vm9 = vcmp.gt.f32.partialorder %v3608_v29, 0.0  ;;  %v3672_v34 = vmul.f32 0.1, %v3608_v29  ;;  %v5073_v35 = vadd.f32 %v5030_v32, %v6279_v45  ;;  %v3451_v36 = vpop.f32.mrb[11].mxu0 }
 0x1de   : > { %vm3639_vm10 = vcmp.gt.f32.partialorder %v3607_v31, 0.0  ;;  %v3671_v38 = vmul.f32 0.1, %v3607_v31  ;;  %v5074_v39 = vadd.f32 %v3451_v36, %v6281_v46 }
 0x1df   : > { %v3704_v40 = vsel %vm3640_vm9, %v3608_v29, %v3672_v34  ;;  %v3610_v41 = vadd.f32 %v5073_v35, %v6294_v52 }
 0x1e0   : > { %3736 = vst [vmem:[%s6302_s16 + $0x48] sm:$0xff] %v3704_v40  ;;  %v3703_v42 = vsel %vm3639_vm10, %v3607_v31, %v3671_v38  ;;  %v3609_v43 = vadd.f32 %v5074_v39, %v6294_v52  ;;  %v5033_v44 = vpop.f32.mrb[12].mxu0 }
 0x1e1   : > { %3735 = vst [vmem:[%s6302_s16 + $0x40] sm:$0xff] %v3703_v42  ;;  %vm3642_vm11 = vcmp.gt.f32.partialorder %v3610_v41, 0.0  ;;  %v3674_v51 = vmul.f32 0.1, %v3610_v41  ;;  %v5075_v45 = vadd.f32 %v5033_v44, %v6283_v47  ;;  %v3461_v53 = vpop.f32.mrb[13].mxu0 }
 0x1e2   : > { %vm3641_vm12 = vcmp.gt.f32.partialorder %v3609_v43, 0.0  ;;  %v3673_v54 = vmul.f32 0.1, %v3609_v43  ;;  %v5076_v46 = vadd.f32 %v3461_v53, %v6285_v48 }
 0x1e3   : > { %v3706_v56 = vsel %vm3642_vm11, %v3610_v41, %v3674_v51  ;;  %v3612_v58 = vadd.f32 %v5075_v45, %v6294_v52 }
 0x1e4   : > { %3738 = vst [vmem:[%s6302_s16 + $0x58] sm:$0xff] %v3706_v56  ;;  %v3705_v59 = vsel %vm3641_vm12, %v3609_v43, %v3673_v54  ;;  %v3611_v60 = vadd.f32 %v5076_v46, %v6294_v52  ;;  %v5036_v62 = vpop.f32.mrb[14].mxu0 }
 0x1e5   : > { %3737 = vst [vmem:[%s6302_s16 + $0x50] sm:$0xff] %v3705_v59  ;;  %vm3644_vm13 = vcmp.gt.f32.partialorder %v3612_v58, 0.0  ;;  %v3676_v63 = vmul.f32 0.1, %v3612_v58  ;;  %v5077_v47 = vadd.f32 %v5036_v62, %v6287_v49  ;;  %v3471_v0 = vpop.f32.mrb[15].mxu0 }
 0x1e6   : > { %vm3643_vm14 = vcmp.gt.f32.partialorder %v3611_v60, 0.0  ;;  %v3675_v2 = vmul.f32 0.1, %v3611_v60  ;;  %v5078_v48 = vadd.f32 %v3471_v0, %v6289_v50 }
 0x1e7   : > { %v3708_v4 = vsel %vm3644_vm13, %v3612_v58, %v3676_v63  ;;  %v3614_v5 = vadd.f32 %v5077_v47, %v6294_v52 }
 0x1e8   : > { %3740 = vst [vmem:[%s6302_s16 + $0x68] sm:$0xff] %v3708_v4  ;;  %v3707_v6 = vsel %vm3643_vm14, %v3611_v60, %v3675_v2  ;;  %v3613_v7 = vadd.f32 %v5078_v48, %v6294_v52  ;;  %v4839_v9 = vpop.f32.mrb[16].mxu1  ;;  %v5039_v10 = vpop.f32.mrb[16].mxu0 }
 0x1e9   : > { %3739 = vst [vmem:[%s6302_s16 + $0x60] sm:$0xff] %v3707_v6  ;;  %vm3646_vm15 = vcmp.gt.f32.partialorder %v3614_v5, 0.0  ;;  %v3678_v55 = vmul.f32 0.1, %v3614_v5  ;;  %v5079_v49 = vadd.f32 %v5039_v10, %v4839_v9  ;;  %v1932_v57 = vpop.f32.mrb[17].mxu1  ;;  %v3481_v28 = vpop.f32.mrb[17].mxu0 }
 0x1ea   : > { %vm3645_vm0 = vcmp.gt.f32.partialorder %v3613_v7, 0.0  ;;  %v3677_v24 = vmul.f32 0.1, %v3613_v7  ;;  %v5080_v50 = vadd.f32 %v3481_v28, %v1932_v57 }
 0x1eb   : > { %v3710_v25 = vsel %vm3646_vm15, %v3614_v5, %v3678_v55  ;;  %v3616_v8 = vadd.f32 %v5079_v49, %v6294_v52 }
 0x1ec   : > { %3742 = vst [vmem:[%s6302_s16 + $0x78] sm:$0xff] %v3710_v25  ;;  %v3709_v11 = vsel %vm3645_vm0, %v3613_v7, %v3677_v24  ;;  %v3615_v13 = vadd.f32 %v5080_v50, %v6294_v52  ;;  %v4842_v15 = vpop.f32.mrb[18].mxu1  ;;  %v5042_v17 = vpop.f32.mrb[18].mxu0 }
 0x1ed   : > { %3741 = vst [vmem:[%s6302_s16 + $0x70] sm:$0xff] %v3709_v11  ;;  %vm3648_vm1 = vcmp.gt.f32.partialorder %v3616_v8, 0.0  ;;  %v3680_v19 = vmul.f32 0.1, %v3616_v8  ;;  %v5081_v21 = vadd.f32 %v5042_v17, %v4842_v15  ;;  %v1942_v22 = vpop.f32.mrb[19].mxu1  ;;  %v3491_v37 = vpop.f32.mrb[19].mxu0 }
 0x1ee   : > { %vm3647_vm2 = vcmp.gt.f32.partialorder %v3615_v13, 0.0  ;;  %v3679_v33 = vmul.f32 0.1, %v3615_v13  ;;  %v5082_v12 = vadd.f32 %v3491_v37, %v1942_v22 }
 0x1ef   : > { %v3712_v16 = vsel %vm3648_vm1, %v3616_v8, %v3680_v19  ;;  %v3618_v20 = vadd.f32 %v5081_v21, %v6294_v52 }
 0x1f0   : > { %3744 = vst [vmem:[%s6302_s16 + $0x88] sm:$0xff] %v3712_v16  ;;  %v3711_v1 = vsel %vm3647_vm2, %v3615_v13, %v3679_v33  ;;  %v3617_v3 = vadd.f32 %v5082_v12, %v6294_v52  ;;  %v4845_v61 = vpop.f32.mrb[20].mxu1  ;;  %v5045_v14 = vpop.f32.mrb[20].mxu0 }
 0x1f1   : > { %3743 = vst [vmem:[%s6302_s16 + $0x80] sm:$0xff] %v3711_v1  ;;  %vm3650_vm3 = vcmp.gt.f32.partialorder %v3618_v20, 0.0  ;;  %v3682_v18 = vmul.f32 0.1, %v3618_v20  ;;  %v5083_v23 = vadd.f32 %v5045_v14, %v4845_v61  ;;  %v1952_v26 = vpop.f32.mrb[21].mxu1  ;;  %v3501_v27 = vpop.f32.mrb[21].mxu0 }
 0x1f2   : > { %vm3649_vm4 = vcmp.gt.f32.partialorder %v3617_v3, 0.0  ;;  %v3681_v29 = vmul.f32 0.1, %v3617_v3  ;;  %v5084_v30 = vadd.f32 %v3501_v27, %v1952_v26 }
 0x1f3   : > { %v3714_v31 = vsel %vm3650_vm3, %v3618_v20, %v3682_v18  ;;  %v3620_v32 = vadd.f32 %v5083_v23, %v6294_v52 }
 0x1f4   : > { %3746 = vst [vmem:[%s6302_s16 + $0x98] sm:$0xff] %v3714_v31  ;;  %v3713_v34 = vsel %vm3649_vm4, %v3617_v3, %v3681_v29  ;;  %v3619_v35 = vadd.f32 %v5084_v30, %v6294_v52  ;;  %v4848_v36 = vpop.f32.mrb[22].mxu1  ;;  %v5048_v38 = vpop.f32.mrb[22].mxu0 }
 0x1f5   : > { %3745 = vst [vmem:[%s6302_s16 + $0x90] sm:$0xff] %v3713_v34  ;;  %vm3652_vm5 = vcmp.gt.f32.partialorder %v3620_v32, 0.0  ;;  %v3684_v39 = vmul.f32 0.1, %v3620_v32  ;;  %v5085_v40 = vadd.f32 %v5048_v38, %v4848_v36  ;;  %v1962_v41 = vpop.f32.mrb[23].mxu1  ;;  %v3511_v42 = vpop.f32.mrb[23].mxu0 }
 0x1f6   : > { %vm3651_vm6 = vcmp.gt.f32.partialorder %v3619_v35, 0.0  ;;  %v3683_v43 = vmul.f32 0.1, %v3619_v35  ;;  %v5086_v44 = vadd.f32 %v3511_v42, %v1962_v41 }
 0x1f7   : > { %v3716_v51 = vsel %vm3652_vm5, %v3620_v32, %v3684_v39  ;;  %v3622_v45 = vadd.f32 %v5085_v40, %v6294_v52 }
 0x1f8   : > { %3748 = vst [vmem:[%s6302_s16 + $0xa8] sm:$0xff] %v3716_v51  ;;  %v3715_v53 = vsel %vm3651_vm6, %v3619_v35, %v3683_v43  ;;  %v3621_v54 = vadd.f32 %v5086_v44, %v6294_v52  ;;  %v4851_v46 = vpop.f32.mrb[24].mxu1  ;;  %v5051_v56 = vpop.f32.mrb[24].mxu0 }
 0x1f9   : > { %3747 = vst [vmem:[%s6302_s16 + $0xa0] sm:$0xff] %v3715_v53  ;;  %vm3654_vm7 = vcmp.gt.f32.partialorder %v3622_v45, 0.0  ;;  %v3686_v58 = vmul.f32 0.1, %v3622_v45  ;;  %v5087_v59 = vadd.f32 %v5051_v56, %v4851_v46  ;;  %v1972_v60 = vpop.f32.mrb[25].mxu1  ;;  %v3521_v62 = vpop.f32.mrb[25].mxu0 }
 0x1fa   : > { %vm3653_vm8 = vcmp.gt.f32.partialorder %v3621_v54, 0.0  ;;  %v3685_v63 = vmul.f32 0.1, %v3621_v54  ;;  %v5088_v47 = vadd.f32 %v3521_v62, %v1972_v60 }
 0x1fb   : > { %v3718_v0 = vsel %vm3654_vm7, %v3622_v45, %v3686_v58  ;;  %v3624_v2 = vadd.f32 %v5087_v59, %v6294_v52 }
 0x1fc   : > { %3750 = vst [vmem:[%s6302_s16 + $0xb8] sm:$0xff] %v3718_v0  ;;  %v3717_v48 = vsel %vm3653_vm8, %v3621_v54, %v3685_v63  ;;  %v3623_v4 = vadd.f32 %v5088_v47, %v6294_v52  ;;  %v4854_v5 = vpop.f32.mrb[26].mxu1  ;;  %v5054_v6 = vpop.f32.mrb[26].mxu0 }
 0x1fd   : > { %3749 = vst [vmem:[%s6302_s16 + $0xb0] sm:$0xff] %v3717_v48  ;;  %vm3656_vm9 = vcmp.gt.f32.partialorder %v3624_v2, 0.0  ;;  %v3688_v7 = vmul.f32 0.1, %v3624_v2  ;;  %v5089_v9 = vadd.f32 %v5054_v6, %v4854_v5  ;;  %v1982_v10 = vpop.f32.mrb[27].mxu1  ;;  %v3531_v55 = vpop.f32.mrb[27].mxu0 }
 0x1fe   : > { %vm3655_vm10 = vcmp.gt.f32.partialorder %v3623_v4, 0.0  ;;  %v3687_v49 = vmul.f32 0.1, %v3623_v4  ;;  %v5090_v57 = vadd.f32 %v3531_v55, %v1982_v10 }
 0x1ff   : > { %v3720_v28 = vsel %vm3656_vm9, %v3624_v2, %v3688_v7  ;;  %v3626_v24 = vadd.f32 %v5089_v9, %v6294_v52 }
 0x200   : > { %3752 = vst [vmem:[%s6302_s16 + $0xc8] sm:$0xff] %v3720_v28  ;;  %v3719_v50 = vsel %vm3655_vm10, %v3623_v4, %v3687_v49  ;;  %v3625_v25 = vadd.f32 %v5090_v57, %v6294_v52  ;;  %v4857_v8 = vpop.f32.mrb[28].mxu1  ;;  %v5057_v11 = vpop.f32.mrb[28].mxu0 }
 0x201   : > { %3751 = vst [vmem:[%s6302_s16 + $0xc0] sm:$0xff] %v3719_v50  ;;  %vm3658_vm11 = vcmp.gt.f32.partialorder %v3626_v24, 0.0  ;;  %v3690_v13 = vmul.f32 0.1, %v3626_v24  ;;  %v5091_v15 = vadd.f32 %v5057_v11, %v4857_v8  ;;  %v1992_v17 = vpop.f32.mrb[29].mxu1  ;;  %v3541_v19 = vpop.f32.mrb[29].mxu0 }
 0x202   : > { %vm3657_vm12 = vcmp.gt.f32.partialorder %v3625_v25, 0.0  ;;  %v3689_v21 = vmul.f32 0.1, %v3625_v25  ;;  %v5092_v22 = vadd.f32 %v3541_v19, %v1992_v17 }
 0x203   : > { %v3722_v37 = vsel %vm3658_vm11, %v3626_v24, %v3690_v13  ;;  %v3628_v33 = vadd.f32 %v5091_v15, %v6294_v52 }
 0x204   : > { %3754 = vst [vmem:[%s6302_s16 + $0xd8] sm:$0xff] %v3722_v37  ;;  %v3721_v12 = vsel %vm3657_vm12, %v3625_v25, %v3689_v21  ;;  %v3627_v16 = vadd.f32 %v5092_v22, %v6294_v52  ;;  %v4860_v20 = vpop.f32.mrb[30].mxu1  ;;  %v5060_v1 = vpop.f32.mrb[30].mxu0 }
 0x205   : > { %3753 = vst [vmem:[%s6302_s16 + $0xd0] sm:$0xff] %v3721_v12  ;;  %vm3660_vm13 = vcmp.gt.f32.partialorder %v3628_v33, 0.0  ;;  %v3692_v3 = vmul.f32 0.1, %v3628_v33  ;;  %v5093_v61 = vadd.f32 %v5060_v1, %v4860_v20  ;;  %v2002_v14 = vpop.f32.mrb[31].mxu1  ;;  %v3551_v18 = vpop.f32.mrb[31].mxu0 }
 0x206   : > { %vm3659_vm14 = vcmp.gt.f32.partialorder %v3627_v16, 0.0  ;;  %v3691_v23 = vmul.f32 0.1, %v3627_v16  ;;  %v5094_v26 = vadd.f32 %v3551_v18, %v2002_v14 }
 0x207   : > { %v3724_v27 = vsel %vm3660_vm13, %v3628_v33, %v3692_v3  ;;  %v3630_v29 = vadd.f32 %v5093_v61, %v6294_v52 }
 0x208   : > { %3756 = vst [vmem:[%s6302_s16 + $0xe8] sm:$0xff] %v3724_v27  ;;  %v3723_v30 = vsel %vm3659_vm14, %v3627_v16, %v3691_v23  ;;  %v3629_v31 = vadd.f32 %v5094_v26, %v6294_v52 }
 0x209   : > { %3755 = vst [vmem:[%s6302_s16 + $0xe0] sm:$0xff] %v3723_v30  ;;  %vm3662_vm15 = vcmp.gt.f32.partialorder %v3630_v29, 0.0  ;;  %v3694_v32 = vmul.f32 0.1, %v3630_v29 }
 0x20a   : > { %vm3661_vm0 = vcmp.gt.f32.partialorder %v3629_v31, 0.0  ;;  %v3693_v34 = vmul.f32 0.1, %v3629_v31 }
 0x20b   : > { %v3726_v35 = vsel %vm3662_vm15, %v3630_v29, %v3694_v32 }
 0x20c   : > { %3758 = vst [vmem:[%s6302_s16 + $0xf8] sm:$0xff] %v3726_v35  ;;  %v3725_v36 = vsel %vm3661_vm0, %v3629_v31, %v3693_v34 }
 0x20d   : > { %3757 = vst [vmem:[%s6302_s16 + $0xf0] sm:$0xff] %v3725_v36 }
 0x20e PF: > { %s13_s12 = sadd.s32 1, %s5334_s12  }
 0x20f   : > { %p10_p4 = scmp.ge.s32.totalorder %s13_s12, 4  }
 0x211   :  { %12 = sbr.rel (!%p10_p4) target bundleno = 1 (0x1), region = 72 }

// kernel: darknet_forward.9
= control target key start
LH: loop header
LB: loop body
LE: loop exit
PB: predicated region body
PF: predicated region fallthrough
CT: control target
= control target key end

     0   :  { %s1565_s12 = smov 0   ;;  %s1722_s0 = inlined_call_operand.vmem [shape: f32[2,4,5,9,16], index: 0, kind: input, shape index: {}]   ;;  %s1723_s1 = inlined_call_operand.vmem [shape: f32[9,16,128], index: 1, kind: input, shape index: {}]   ;;  %s1724_s2 = inlined_call_operand.vmem [shape: f32[1,128], index: 2, kind: input, shape index: {}]   ;;  %s1725_s3 = inlined_call_operand.vmem [shape: f32[2,32,128], index: 3, kind: output, shape index: {}]  }
   0x1 LB: > { %s1222_s13 = sadd.s32 4294967295, %s1543_s12   ;;  %p1226_p0 = scmp.ge.s32.totalorder %s1543_s12, 1  ;;  %s1543_s12 = sphi %s1565_s12, %s13_s12  }
   0x2   : > { %p137_p1 = scmp.lt.s32.totalorder %s1543_s12, 3 }
   0x4   : > { %p138_p2 = pnand %p1226_p0, %p137_p1 }
   0x5   : > { %v1234_v0 = vld [vmem:[%s1723_s1 + $0x10] sm:$0xff] (!%p138_p2)  ;;  %v1235_v1 = vld [vmem:[%s1723_s1 + $0x18] sm:$0xff] (!%p138_p2)  ;;  %v1264_v2 = vld [vmem:[%s1723_s1 + $0x40] sm:$0xff] (!%p138_p2)  ;;  %p161_p3 = scmp.lt.s32.totalorder (!%p138_p2), %s1222_s13, 1  ;;  %vm185_vm0 = vcmask (!%p138_p2), 130048  }
   0x6   : > { %141 = sbr.rel (%p138_p2) target bundleno = 277 (0x115), region = 32  ;;  %v1458_v3 = vpack.c.bf16 (!%p138_p2), %v1235_v1, %v1234_v0  ;;  %v1265_v4 = vld [vmem:[%s1723_s1 + $0x48] sm:$0xff] (!%p138_p2)  ;;  %v175_v5 = vld [vmem:[%s1723_s1] sm:$0xff] (!%p138_p2)  ;;  %v1274_v9 = vld [vmem:[%s1723_s1 + $0x50] sm:$0xff] (!%p138_p2) }
   0x7   : > { %v176_v6 = vld [vmem:[%s1723_s1 + $0x8] sm:$0xff] (!%p138_p2)  ;;  %v1591_v7 = vpack.c.bf16 (!%p138_p2), %v1265_v4, %v1264_v2  ;;  %v1275_v10 = vld [vmem:[%s1723_s1 + $0x58] sm:$0xff] (!%p138_p2)  ;;  %v1244_v12 = vld [vmem:[%s1723_s1 + $0x20] sm:$0xff] (!%p138_p2) }
   0x8   : > { %v1462_v8 = vpack.c.bf16 (!%p138_p2), %v176_v6, %v175_v5  ;;  %1459 = vmatprep.subr.bf16.mxu1 (!%p138_p2), %v1458_v3  ;;  %v1478_v11 = vpack.c.bf16 (!%p138_p2), %v1275_v10, %v1274_v9  ;;  %v1245_v13 = vld [vmem:[%s1723_s1 + $0x28] sm:$0xff] (!%p138_p2)  ;;  %v1284_v14 = vld [vmem:[%s1723_s1 + $0x60] sm:$0xff] (!%p138_p2)  ;;  %v1254_v26 = vld [vmem:[%s1723_s1 + $0x30] sm:$0xff] (!%p138_p2) }
   0x9   : > { %1475 = vmatprep.subr.bf16.mxu0 (!%p138_p2), %v1591_v7  ;;  %1461 = vmatpush3.bf16.msra.mxu1 (!%p138_p2), %v1458_v3  ;;  %v1285_v15 = vld [vmem:[%s1723_s1 + $0x68] sm:$0xff] (!%p138_p2)  ;;  %v1466_v19 = vpack.c.bf16 (!%p138_p2), %v1245_v13, %v1244_v12  ;;  %v1255_v27 = vld [vmem:[%s1723_s1 + $0x38] sm:$0xff] (!%p138_p2)  ;;  %v1294_v28 = vld [vmem:[%s1723_s1 + $0x70] sm:$0xff] (!%p138_p2) }
   0xa   : > { %1477 = vmatpush3.bf16.msra.mxu0 (!%p138_p2), %v1591_v7  ;;  %1463 = vmatprep.subr.bf16.mxu1 (!%p138_p2), %v1462_v8  ;;  %v1482_v22 = vpack.c.bf16 (!%p138_p2), %v1285_v15, %v1284_v14  ;;  %v1295_v29 = vld [vmem:[%s1723_s1 + $0x78] sm:$0xff] (!%p138_p2)  ;;  %v1470_v34 = vpack.c.bf16 (!%p138_p2), %v1255_v27, %v1254_v26  ;;  %v1304_v39 = vld [vmem:[%s1723_s1 + $0x80] sm:$0xff] (!%p138_p2)  ;;  %v1305_v40 = vld [vmem:[%s1723_s1 + $0x88] sm:$0xff] (!%p138_p2) }
   0xb   : > { %1479 = vmatprep.subr.bf16.mxu0 (!%p138_p2), %v1478_v11  ;;  %v1486_v35 = vpack.c.bf16 (!%p138_p2), %v1295_v29, %v1294_v28  ;;  %v1490_v43 = vpack.c.bf16 (!%p138_p2), %v1305_v40, %v1304_v39  ;;  %v1310_v57 = vld [vmem:[%s1724_s2] ss:$0 sm:$0xff] (!%p138_p2) }
   0xd   : > { %s1727_s13 = smov (!%p161_p3, %s1222_s13), 1 }
   0xe   : > { %s1528_s30 = smul.u32 320, %s1727_s13  ;;  %s1313_s4 = sshll.u32 %s1727_s13, 5 }
   0xf   : > { %s170_s7 = scalar_lea.vmem %s1725_s3, %s1313_s4 }
  0x10   : > { %s1619_s16 = scalar_lea.vmem %s1722_s0, %s1528_s30 }
  0x11   : > { %v1230_v16 = vld [vmem:[%s1619_s16 + $0x50] sm:$0xff]  ;;  %v1624_v18 = vld [vmem:[%s1619_s16 + $0x60] sm:$0xff] }
  0x12   : > { %v1260_v17 = vld [vmem:[%s1619_s16 + $0xf0] sm:$0xff]  ;;  %1372 = vmatprep.mubr.msk.f32.mxu1 %vm185_vm0, %v1230_v16  ;;  %v1261_v20 = vld [vmem:[%s1619_s16 + $0x100] sm:$0xff] }
  0x13   : > { %1412 = vmatprep.mubr.msk.f32.mxu0 %vm185_vm0, %v1260_v17  ;;  %v1630_v21 = vld [vmem:[%s1619_s16 + $0x70] sm:$0xff]  ;;  %1373 = vmatmul.mubr.msk.f32.vlgmr.msra.gmra.mrb[0].mxu1 %vm185_vm0, %v1624_v18  ;;  %v1270_v23 = vld [vmem:[%s1619_s16 + $0xa1] sm:$0xff] }
  0x14   : > { %1413 = vmatmul.mubr.msk.f32.vlgmr.msra.gmra.mrb[0].mxu0 %vm185_vm0, %v1261_v20  ;;  %1465 = vmatpush3.bf16.msra.mxu1 %v1462_v8  ;;  %v1233_v24 = vld [vmem:[%s1619_s16 + $0x80] sm:$0xff]  ;;  %v172_v30 = vld [vmem:[%s1619_s16 + $0x10] sm:$0xff] }
  0x15   : > { %1481 = vmatpush3.bf16.msra.mxu0 %v1478_v11  ;;  %1375 = vmatprep.mubr.msk.f32.mxu1 %vm185_vm0, %v1630_v21  ;;  %v171_v25 = vld [vmem:[%s1619_s16] sm:$0xff]  ;;  %v1271_v31 = vld [vmem:[%s1619_s16 + $0xb1] sm:$0xff] }
  0x16   : > { %1467 = vmatprep.subr.bf16.mxu1 %v1466_v19  ;;  %1422 = vmatprep.mubr.msk.f32.mxu0 %vm185_vm0, %v1270_v23  ;;  %v173_v32 = vld [vmem:[%s1619_s16 + $0x20] sm:$0xff]  ;;  %v174_v36 = vld [vmem:[%s1619_s16 + $0x30] sm:$0xff] }
  0x17   : > { %1483 = vmatprep.subr.bf16.mxu0 %v1482_v22  ;;  %1376 = vmatmul.mubr.msk.f32.gmra.mrb[2].mxu1 %vm185_vm0, %v1233_v24  ;;  %v1272_v33 = vld [vmem:[%s1619_s16 + $0xc1] sm:$0xff]  ;;  %v1273_v37 = vld [vmem:[%s1619_s16 + $0xd1] sm:$0xff] }
  0x18   : > { %1382 = vmatprep.mubr.msk.f32.mxu1 %vm185_vm0, %v171_v25  ;;  %v380_v38 = vld [vmem:[%s1619_s16 + $0x1] sm:$0xff]  ;;  %v381_v41 = vld [vmem:[%s1619_s16 + $0x11] sm:$0xff] }
  0x19   : > { %v382_v42 = vld [vmem:[%s1619_s16 + $0x21] sm:$0xff]  ;;  %v383_v44 = vld [vmem:[%s1619_s16 + $0x31] sm:$0xff] }
  0x1a   : > { %v1283_v45 = vld [vmem:[%s1619_s16 + $0x40] sm:$0xff]  ;;  %v1251_v47 = vld [vmem:[%s1619_s16 + $0xb0] sm:$0xff] }
  0x1b   : > { %1383 = vmatmul.mubr.msk.f32.vlgmr.msra.gmra.mrb[0].mxu1 %vm185_vm0, %v172_v30  ;;  %v1250_v46 = vld [vmem:[%s1619_s16 + $0xa0] sm:$0xff]  ;;  %v1253_v49 = vld [vmem:[%s1619_s16 + $0xd0] sm:$0xff] }
  0x1c   : > { %1423 = vmatmul.mubr.msk.f32.vlgmr.msra.gmra.mrb[0].mxu0 %vm185_vm0, %v1271_v31  ;;  %1469 = vmatpush3.bf16.msra.mxu1 %v1466_v19  ;;  %v1252_v48 = vld [vmem:[%s1619_s16 + $0xc0] sm:$0xff]  ;;  %v1293_v50 = vld [vmem:[%s1619_s16 + $0x90] sm:$0xff] }
  0x1d   : > { %1485 = vmatpush3.bf16.msra.mxu0 %v1482_v22  ;;  %1385 = vmatprep.mubr.msk.f32.mxu1 %vm185_vm0, %v173_v32  ;;  %v1262_v51 = vld [vmem:[%s1619_s16 + $0x110] sm:$0xff]  ;;  %v1263_v52 = vld [vmem:[%s1619_s16 + $0x120] sm:$0xff] }
  0x1e   : > { %1425 = vmatprep.mubr.msk.f32.mxu0 %vm185_vm0, %v1272_v33  ;;  %1471 = vmatprep.subr.bf16.mxu1 %v1470_v34  ;;  %v1303_v53 = vld [vmem:[%s1619_s16 + $0x41] sm:$0xff] }
  0x1f   : > { %1487 = vmatprep.subr.bf16.mxu0 %v1486_v35  ;;  %1386 = vmatmul.mubr.msk.f32.gmra.mrb[2].mxu1 %vm185_vm0, %v174_v36 }
  0x20   : > { %1426 = vmatmul.mubr.msk.f32.gmra.mrb[2].mxu0 %vm185_vm0, %v1273_v37  ;;  %1392 = vmatprep.mubr.msk.f32.mxu1 %vm185_vm0, %v380_v38 }
  0x21   : > { %1432 = vmatprep.mubr.msk.f32.mxu0 %vm185_vm0, %v172_v30 }
  0x23   : > { %1393 = vmatmul.mubr.msk.f32.vlgmr.msra.gmra.mrb[0].mxu1 %vm185_vm0, %v381_v41 }
  0x24   : > { %1433 = vmatmul.mubr.msk.f32.vlgmr.msra.gmra.mrb[0].mxu0 %vm185_vm0, %v173_v32  ;;  %1473 = vmatpush3.bf16.msra.mxu1 %v1470_v34 }
  0x25   : > { %1489 = vmatpush3.bf16.msra.mxu0 %v1486_v35  ;;  %1395 = vmatprep.mubr.msk.f32.mxu1 %vm185_vm0, %v382_v42 }
  0x26   : > { %1435 = vmatprep.mubr.msk.f32.mxu0 %vm185_vm0, %v174_v36  ;;  %1494 = vmatprep.subr.bf16.mxu1 %v1591_v7 }
  0x27   : > { %1491 = vmatprep.subr.bf16.mxu0 %v1490_v43  ;;  %1396 = vmatmul.mubr.msk.f32.gmra.mrb[2].mxu1 %vm185_vm0, %v383_v44 }
  0x28   : > { %1436 = vmatmul.mubr.msk.f32.gmra.mrb[2].mxu0 %vm185_vm0, %v1283_v45  ;;  %1402 = vmatprep.mubr.msk.f32.mxu1 %vm185_vm0, %v1250_v46 }
  0x29   : > { %1442 = vmatprep.mubr.msk.f32.mxu0 %vm185_vm0, %v1624_v18 }
  0x2b   : > { %1403 = vmatmul.mubr.msk.f32.vlgmr.msra.gmra.mrb[0].mxu1 %vm185_vm0, %v1251_v47 }
  0x2c   : > { %1443 = vmatmul.mubr.msk.f32.vlgmr.msra.gmra.mrb[0].mxu0 %vm185_vm0, %v1630_v21  ;;  %1495 = vmatpush3.bf16.msra.mxu1 %v1591_v7 }
  0x2d   : > { %1493 = vmatpush3.bf16.msra.mxu0 %v1490_v43  ;;  %1405 = vmatprep.mubr.msk.f32.mxu1 %vm185_vm0, %v1252_v48 }
  0x2e   : > { %1445 = vmatprep.mubr.msk.f32.mxu0 %vm185_vm0, %v1233_v24 }
  0x2f   : > { %1406 = vmatmul.mubr.msk.f32.gmra.mrb[2].mxu1 %vm185_vm0, %v1253_v49 }
  0x30   : > { %1446 = vmatmul.mubr.msk.f32.gmra.mrb[2].mxu0 %vm185_vm0, %v1293_v50  ;;  %1415 = vmatprep.mubr.msk.f32.mxu1 %vm185_vm0, %v1262_v51 }
  0x31   : > { %1452 = vmatprep.mubr.msk.f32.mxu0 %vm185_vm0, %v381_v41 }
  0x34   : > { %1453 = vmatmul.mubr.msk.f32.vlgmr.msra.gmra.mrb[0].mxu0 %vm185_vm0, %v382_v42 }
  0x35   : > { %1455 = vmatprep.mubr.msk.f32.mxu0 %vm185_vm0, %v383_v44 }
  0x37   : > { %1416 = vmatmul.mubr.msk.f32.vlgmr.msra.gmra.mrb[2].mxu1 %vm185_vm0, %v1263_v52 }
  0x38   : > { %1456 = vmatmul.mubr.msk.f32.gmra.mrb[2].mxu0 %vm185_vm0, %v1303_v53 }
  0xfe   : > { %v1404_v54 = vpop.f32.mrb[0].mxu1 }
  0xff   : > { %v574_v55 = vpop.f32.mrb[1].mxu1 }
 0x107   : > { %v1454_v56 = vpop.f32.mrb[0].mxu0 }
 0x108   : > { %v1496_v58 = vadd.f32 %v1454_v56, %v1404_v54  ;;  %v1117_v59 = vpop.f32.mrb[1].mxu0 }
 0x109   : > { %v1497_v60 = vadd.f32 %v1117_v59, %v574_v55 }
 0x10a   : > { %v1148_v61 = vadd.f32 %v1496_v58, %v1310_v57  ;;  %v1417_v63 = vpop.f32.mrb[2].mxu1 }
 0x10b   : > { %v1147_v62 = vadd.f32 %v1497_v60, %v1310_v57  ;;  %v1457_v0 = vpop.f32.mrb[2].mxu0  ;;  %v693_v3 = vpop.f32.mrb[3].mxu1 }
 0x10c   : > { %vm1152_vm1 = vcmp.gt.f32.partialorder %v1148_v61, 0.0  ;;  %v1156_v1 = vmul.f32 0.1, %v1148_v61  ;;  %v1498_v2 = vadd.f32 %v1457_v0, %v1417_v63  ;;  %v1127_v4 = vpop.f32.mrb[3].mxu0 }
 0x10d   : > { %vm1151_vm2 = vcmp.gt.f32.partialorder %v1147_v62, 0.0  ;;  %v1155_v5 = vmul.f32 0.1, %v1147_v62  ;;  %v1499_v6 = vadd.f32 %v1127_v4, %v693_v3 }
 0x10e   : > { %v1160_v7 = vsel %vm1152_vm1, %v1148_v61, %v1156_v1  ;;  %v1150_v8 = vadd.f32 %v1498_v2, %v1310_v57 }
 0x10f   : > { %1164 = vst [vmem:[%s170_s7 + $0x8] sm:$0xff] %v1160_v7  ;;  %v1159_v9 = vsel %vm1151_vm2, %v1147_v62, %v1155_v5  ;;  %v1149_v10 = vadd.f32 %v1499_v6, %v1310_v57 }
 0x110   : > { %1163 = vst [vmem:[%s170_s7] sm:$0xff] %v1159_v9  ;;  %vm1154_vm3 = vcmp.gt.f32.partialorder %v1150_v8, 0.0  ;;  %v1158_v11 = vmul.f32 0.1, %v1150_v8 }
 0x111   : > { %vm1153_vm4 = vcmp.gt.f32.partialorder %v1149_v10, 0.0  ;;  %v1157_v12 = vmul.f32 0.1, %v1149_v10 }
 0x112   : > { %v1162_v13 = vsel %vm1154_vm3, %v1150_v8, %v1158_v11 }
 0x113   : > { %1166 = vst [vmem:[%s170_s7 + $0x18] sm:$0xff] %v1162_v13  ;;  %v1161_v14 = vsel %vm1153_vm4, %v1149_v10, %v1157_v12 }
 0x114   : > { %1165 = vst [vmem:[%s170_s7 + $0x10] sm:$0xff] %v1161_v14 }
 0x115 PF: > { %s13_s12 = sadd.s32 1, %s1543_s12  }
 0x116   : > { %p10_p4 = scmp.ge.s32.totalorder %s13_s12, 4  }
 0x118   :  { %12 = sbr.rel (!%p10_p4) target bundleno = 1 (0x1), region = 75 }

// kernel: darknet_forward.10
= control target key start
LH: loop header
LB: loop body
LE: loop exit
PB: predicated region body
PF: predicated region fallthrough
CT: control target
= control target key end

     0   :  { %s684_s24 = smov 0   ;;  %s742_s0 = inlined_call_operand.vmem [shape: f32[2,4,8,32], index: 0, kind: input, shape index: {}]   ;;  %s743_s1 = inlined_call_operand.vmem [shape: f32[1,32,128], index: 1, kind: input, shape index: {}]   ;;  %s744_s2 = inlined_call_operand.vmem [shape: f32[1,128], index: 2, kind: input, shape index: {}]   ;;  %s745_s3 = inlined_call_operand.vmem [shape: f32[1,128], index: 3, kind: input, shape index: {}]   ;;  %s746_s4 = inlined_call_operand.vmem [shape: f32[1,128], index: 4, kind: input, shape index: {}]   ;;  %s747_s5 = inlined_call_operand.vmem [shape: f32[32,128], index: 5, kind: input, shape index: {}]   ;;  %s748_s6 = inlined_call_operand.vmem [shape: f32[2,32,128], index: 6, kind: output, shape index: {0}]   ;;  %s749_s7 = inlined_call_operand.vmem [shape: f32[2,32,128], index: 7, kind: output, shape index: {1}]  }
   0x1 LB: > { %s555_s25 = sadd.s32 4294967295, %s642_s24   ;;  %p559_p0 = scmp.ge.s32.totalorder %s642_s24, 1  ;;  %s642_s24 = sphi %s684_s24, %s18_s24  }
   0x2   : > { %p240_p1 = scmp.lt.s32.totalorder %s642_s24, 3 }
   0x4   : > { %p241_p2 = pnand %p559_p0, %p240_p1 }
   0x5   : > { %v296_v0 = vld [vmem:[%s743_s1] sm:$0xff] (!%p241_p2)  ;;  %v297_v1 = vld [vmem:[%s743_s1 + $0x8] sm:$0xff] (!%p241_p2)  ;;  %v298_v2 = vld [vmem:[%s743_s1 + $0x10] sm:$0xff] (!%p241_p2)  ;;  %p277_p3 = scmp.lt.s32.totalorder (!%p241_p2), %s555_s25, 1  ;;  %vm307_vm0 = vcmask (!%p241_p2), 261120  }
   0x6   : > { %244 = sbr.rel (%p241_p2) target bundleno = 270 (0x10e), region = 44  ;;  %v600_v3 = vpack.c.bf16 (!%p241_p2), %v297_v1, %v296_v0  ;;  %v299_v4 = vld [vmem:[%s743_s1 + $0x18] sm:$0xff] (!%p241_p2)  ;;  %v566_v10 = vld [vmem:[%s744_s2] ss:$0 sm:$0xff] (!%p241_p2)  ;;  %v456_v42 = vld [vmem:[%s747_s5 + $0x8] sm:$0xff] (!%p241_p2) }
   0x7   : > { %v604_v5 = vpack.c.bf16 (!%p241_p2), %v299_v4, %v298_v2  ;;  %v571_v32 = vld [vmem:[%s745_s3] ss:$0 sm:$0xff] (!%p241_p2)  ;;  %v458_v47 = vld [vmem:[%s747_s5 + $0x18] sm:$0xff] (!%p241_p2)  ;;  %v457_v56 = vld [vmem:[%s747_s5 + $0x10] sm:$0xff] (!%p241_p2) }
   0x8   : > { %601 = vmatprep.subr.bf16.mxu0 (!%p241_p2), %v600_v3  ;;  %608 = vmatprep.subr.bf16.mxu1 (!%p241_p2), %v600_v3  ;;  %v572_v33 = vld [vmem:[%s746_s4] ss:$0 sm:$0xff] (!%p241_p2) }
   0x9   : > { %603 = vmatpush3.bf16.msra.mxu0 (!%p241_p2), %v600_v3  ;;  %610 = vmatpush3.bf16.msra.mxu1 (!%p241_p2), %v600_v3  ;;  %v455_v51 = vld [vmem:[%s747_s5] sm:$0xff] (!%p241_p2) }
   0xa   : > { %605 = vmatprep.subr.bf16.mxu0 (!%p241_p2), %v604_v5  ;;  %609 = vmatprep.subr.bf16.mxu1 (!%p241_p2), %v604_v5 }
   0xd   : > { %s751_s25 = smov (!%p277_p3, %s555_s25), 1  ;;  %607 = vmatpush3.bf16.msra.mxu0 %v604_v5  ;;  %611 = vmatpush3.bf16.msra.mxu1 %v604_v5 }
   0xe   : > { %s704_s11 = sshll.u32 %s751_s25, 5 }
   0xf   : > { %s281_s14 = scalar_lea.vmem %s742_s0, %s704_s11  ;;  %s286_s19 = scalar_lea.vmem %s748_s6, %s704_s11 }
  0x10   : > { %v292_v6 = vld [vmem:[%s281_s14] sm:$0xff]  ;;  %v294_v7 = vld [vmem:[%s281_s14 + $0x10] sm:$0xff]  ;;  %v293_v8 = vld [vmem:[%s281_s14 + $0x8] sm:$0xff]  ;;  %s291_s8 = scalar_lea.vmem %s749_s7, %s704_s11 }
  0x11   : > { %594 = vmatprep.mubr.msk.f32.mxu0 %vm307_vm0, %v292_v6  ;;  %597 = vmatprep.mubr.msk.f32.mxu1 %vm307_vm0, %v294_v7  ;;  %v295_v9 = vld [vmem:[%s281_s14 + $0x18] sm:$0xff] }
  0x12   : > { %595 = vmatmul.mubr.msk.f32.vlgmr.msra.gmra.mrb[0].mxu0 %vm307_vm0, %v293_v8  ;;  %598 = vmatmul.mubr.msk.f32.vlgmr.msra.gmra.mrb[0].mxu1 %vm307_vm0, %v295_v9 }
  0xe5   : > { %v596_v11 = vpop.f32.mrb[0].mxu0  ;;  %v599_v12 = vpop.f32.mrb[0].mxu1 }
  0xe6   : > { %v392_v13 = vadd.f32 %v596_v11, %v566_v10  ;;  %v402_v14 = vadd.f32 %v599_v12, %v566_v10  ;;  %v386_v15 = vpop.f32.mrb[1].mxu0  ;;  %v396_v16 = vpop.f32.mrb[1].mxu1 }
  0xe7   : > { %v387_v17 = vadd.f32 %v566_v10, %v386_v15  ;;  %v397_v18 = vadd.f32 %v566_v10, %v396_v16 }
  0xe8   : > { %406 = vst [vmem:[%s286_s19 + $0x8] sm:$0xff] %v392_v13  ;;  %v411_v19 = vmul.f32 1.442695, %v392_v13  ;;  %408 = vst [vmem:[%s286_s19 + $0x18] sm:$0xff] %v402_v14  ;;  %v415_v20 = vmul.f32 1.442695, %v402_v14 }
  0xe9   : > { %405 = vst [vmem:[%s286_s19] sm:$0xff] %v387_v17  ;;  %v409_v21 = vmul.f32 1.442695, %v387_v17  ;;  %407 = vst [vmem:[%s286_s19 + $0x10] sm:$0xff] %v397_v18  ;;  %v413_v22 = vmul.f32 1.442695, %v397_v18 }
  0xea   : > { %620 = vpow2.f32 %v411_v19 }
  0xeb   : > { %622 = vpow2.f32 %v415_v20 }
  0xec   : > { %624 = vpow2.f32 %v409_v21 }
  0xed   : > { %626 = vpow2.f32 %v413_v22 }
  0xf4   : > { %v621_v23 = vpop.eup %620 }
  0xf5   : > { %v623_v24 = vpop.eup %622  ;;  %v418_v25 = vadd.f32 1.0, %v621_v23  ;;  %v448_v40 = vmul.f32 %v621_v23, %v572_v33 }
  0xf6   : > { %v625_v26 = vpop.eup %624  ;;  %v420_v27 = vadd.f32 1.0, %v623_v24  ;;  %v450_v44 = vmul.f32 %v623_v24, %v572_v33 }
  0xf7   : > { %v627_v28 = vpop.eup %626  ;;  %628 = vrcp.f32 %v418_v25  ;;  %v417_v29 = vadd.f32 1.0, %v625_v26  ;;  %v447_v49 = vmul.f32 %v625_v26, %v572_v33 }
  0xf8   : > { %630 = vrcp.f32 %v420_v27  ;;  %v419_v30 = vadd.f32 1.0, %v627_v28  ;;  %v449_v53 = vmul.f32 %v627_v28, %v572_v33 }
  0xf9   : > { %632 = vrcp.f32 %v417_v29 }
  0xfa   : > { %634 = vrcp.f32 %v419_v30 }
 0x101   : > { %v629_v31 = vpop.eup %628 }
 0x102   : > { %v631_v34 = vpop.eup %630  ;;  %v426_v35 = vsub.f32 1.0, %v629_v31 }
 0x103   : > { %v633_v36 = vpop.eup %632  ;;  %v428_v37 = vsub.f32 1.0, %v631_v34 }
 0x104   : > { %v635_v38 = vpop.eup %634  ;;  %v437_v39 = vmul.f32 %v571_v32, %v426_v35  ;;  %v425_v41 = vsub.f32 1.0, %v633_v36 }
 0x105   : > { %v439_v43 = vmul.f32 %v571_v32, %v428_v37  ;;  %v427_v45 = vsub.f32 1.0, %v635_v38 }
 0x106   : > { %v452_v46 = vadd.f32 %v448_v40, %v437_v39  ;;  %v436_v48 = vmul.f32 %v571_v32, %v425_v41 }
 0x107   : > { %v454_v50 = vadd.f32 %v450_v44, %v439_v43  ;;  %v438_v52 = vmul.f32 %v571_v32, %v427_v45 }
 0x108   : > { %v460_v54 = vadd.f32 %v456_v42, %v452_v46  ;;  %v451_v55 = vadd.f32 %v447_v49, %v436_v48 }
 0x109   : > { %v462_v57 = vadd.f32 %v458_v47, %v454_v50  ;;  %v453_v58 = vadd.f32 %v449_v53, %v438_v52 }
 0x10a   : > { %464 = vst [vmem:[%s291_s8 + $0x8] sm:$0xff] %v460_v54  ;;  %v459_v59 = vadd.f32 %v455_v51, %v451_v55 }
 0x10b   : > { %466 = vst [vmem:[%s291_s8 + $0x18] sm:$0xff] %v462_v57  ;;  %v461_v60 = vadd.f32 %v457_v56, %v453_v58 }
 0x10c   : > { %463 = vst [vmem:[%s291_s8] sm:$0xff] %v459_v59 }
 0x10d   : > { %465 = vst [vmem:[%s291_s8 + $0x10] sm:$0xff] %v461_v60 }
 0x10e PF: > { %s18_s24 = sadd.s32 1, %s642_s24  }
 0x10f   : > { %p15_p4 = scmp.ge.s32.totalorder %s18_s24, 4  }
 0x111   :  { %17 = sbr.rel (!%p15_p4) target bundleno = 1 (0x1), region = 86 }

// kernel: darknet_forward.11
= control target key start
LH: loop header
LB: loop body
LE: loop exit
PB: predicated region body
PF: predicated region fallthrough
CT: control target
= control target key end

     0   :  { %s876_s24 = smov 0   ;;  %s1003_s0 = inlined_call_operand.vmem [shape: f32[2,9,9,48], index: 0, kind: input, shape index: {}]   ;;  %s1004_s1 = inlined_call_operand.vmem [shape: f32[1,48,128], index: 1, kind: input, shape index: {}]   ;;  %s1005_s2 = inlined_call_operand.vmem [shape: f32[1,128], index: 2, kind: input, shape index: {}]   ;;  %s1006_s3 = inlined_call_operand.vmem [shape: f32[1,128], index: 3, kind: input, shape index: {}]   ;;  %s1007_s4 = inlined_call_operand.vmem [shape: f32[1,128], index: 4, kind: input, shape index: {}]   ;;  %s1008_s5 = inlined_call_operand.vmem [shape: f32[64,128], index: 5, kind: input, shape index: {}]   ;;  %s1009_s6 = inlined_call_operand.vmem [shape: f32[2,64,128], index: 6, kind: output, shape index: {0}]   ;;  %s1010_s7 = inlined_call_operand.vmem [shape: f32[2,64,128], index: 7, kind: output, shape index: {1}]  }
   0x1 LB: > { %s690_s25 = sadd.s32 4294967295, %s834_s24   ;;  %p694_p0 = scmp.ge.s32.totalorder %s834_s24, 1  ;;  %s834_s24 = sphi %s876_s24, %s18_s24  }
   0x2   : > { %p240_p1 = scmp.lt.s32.totalorder %s834_s24, 3 }
   0x4   : > { %p241_p2 = pnand %p694_p0, %p240_p1 }
   0x5   : > { %v349_v0 = vld [vmem:[%s1004_s1] sm:$0xff] (!%p241_p2)  ;;  %v350_v1 = vld [vmem:[%s1004_s1 + $0x8] sm:$0xff] (!%p241_p2)  ;;  %v351_v2 = vld [vmem:[%s1004_s1 + $0x10] sm:$0xff] (!%p241_p2)  ;;  %p277_p3 = scmp.lt.s32.totalorder (!%p241_p2), %s690_s25, 1  ;;  %vm362_vm0 = vcmask (!%p241_p2), 392192  }
   0x6   : > { %244 = sbr.rel (%p241_p2) target bundleno = 284 (0x11c), region = 44  ;;  %v769_v3 = vpack.c.bf16 (!%p241_p2), %v350_v1, %v349_v0  ;;  %v352_v4 = vld [vmem:[%s1004_s1 + $0x18] sm:$0xff] (!%p241_p2)  ;;  %v353_v6 = vld [vmem:[%s1004_s1 + $0x20] sm:$0xff] (!%p241_p2)  ;;  %v354_v7 = vld [vmem:[%s1004_s1 + $0x28] sm:$0xff] (!%p241_p2) }
   0x7   : > { %v773_v5 = vpack.c.bf16 (!%p241_p2), %v352_v4, %v351_v2  ;;  %v777_v8 = vpack.c.bf16 (!%p241_p2), %v354_v7, %v353_v6  ;;  %v716_v44 = vld [vmem:[%s1005_s2] ss:$0 sm:$0xff] (!%p241_p2) }
   0x8   : > { %770 = vmatprep.subr.bf16.mxu0 (!%p241_p2), %v769_v3  ;;  %781 = vmatprep.subr.bf16.mxu1 (!%p241_p2), %v769_v3 }
   0x9   : > { %772 = vmatpush3.bf16.msra.mxu0 (!%p241_p2), %v769_v3  ;;  %784 = vmatpush3.bf16.msra.mxu1 (!%p241_p2), %v769_v3 }
   0xa   : > { %774 = vmatprep.subr.bf16.mxu0 (!%p241_p2), %v773_v5  ;;  %782 = vmatprep.subr.bf16.mxu1 (!%p241_p2), %v773_v5 }
   0xd   : > { %s1012_s25 = smov (!%p277_p3, %s690_s25), 1  ;;  %776 = vmatpush3.bf16.msra.mxu0 %v773_v5  ;;  %785 = vmatpush3.bf16.msra.mxu1 %v773_v5 }
   0xe   : > { %s787_s15 = smul.u32 144, %s1012_s25  ;;  %778 = vmatprep.subr.bf16.mxu0 %v777_v8  ;;  %783 = vmatprep.subr.bf16.mxu1 %v777_v8  ;;  %s729_s19 = sshll.u32 %s1012_s25, 6 }
   0xf   : > { %s945_s26 = scalar_lea.vmem %s1009_s6, %s729_s19  ;;  %s972_s14 = scalar_lea.vmem %s1010_s7, %s729_s19 }
  0x10   : > { %s908_s18 = scalar_lea.vmem %s1003_s0, %s787_s15 }
  0x11   : > { %v292_v9 = vld [vmem:[%s908_s18] sm:$0xff]  ;;  %v700_v11 = vld [vmem:[%s908_s18 + $0x10] sm:$0xff]  ;;  %780 = vmatpush3.bf16.msra.mxu0 %v777_v8  ;;  %786 = vmatpush3.bf16.msra.mxu1 %v777_v8 }
  0x12   : > { %v300_v10 = vld [vmem:[%s908_s18 + $0x1] sm:$0xff]  ;;  %v708_v12 = vld [vmem:[%s908_s18 + $0x11] sm:$0xff] }
  0x13   : > { %v325_v13 = vmax.f32 %v292_v9, %v300_v10  ;;  %v296_v14 = vld [vmem:[%s908_s18 + $0x40] sm:$0xff]  ;;  %v333_v16 = vmax.f32 %v700_v11, %v708_v12  ;;  %v704_v17 = vld [vmem:[%s908_s18 + $0x50] sm:$0xff] }
  0x14   : > { %v304_v15 = vld [vmem:[%s908_s18 + $0x41] sm:$0xff]  ;;  %v712_v18 = vld [vmem:[%s908_s18 + $0x51] sm:$0xff] }
  0x15   : > { %v329_v19 = vmax.f32 %v296_v14, %v304_v15  ;;  %v701_v20 = vld [vmem:[%s908_s18 + $0x20] sm:$0xff]  ;;  %v337_v21 = vmax.f32 %v704_v17, %v712_v18  ;;  %v341_v25 = vmax.f32 %v325_v13, %v333_v16  ;;  %v702_v28 = vld [vmem:[%s908_s18 + $0x30] sm:$0xff] }
  0x16   : > { %v709_v22 = vld [vmem:[%s908_s18 + $0x21] sm:$0xff]  ;;  %v710_v29 = vld [vmem:[%s908_s18 + $0x31] sm:$0xff] }
  0x17   : > { %v705_v23 = vld [vmem:[%s908_s18 + $0x60] sm:$0xff]  ;;  %v334_v26 = vmax.f32 %v701_v20, %v709_v22  ;;  %v706_v30 = vld [vmem:[%s908_s18 + $0x70] sm:$0xff]  ;;  %v345_v31 = vmax.f32 %v329_v19, %v337_v21  ;;  %v335_v32 = vmax.f32 %v702_v28, %v710_v29  ;;  %757 = vmatprep.mubr.msk.f32.mxu0 %vm362_vm0, %v341_v25 }
  0x18   : > { %v713_v24 = vld [vmem:[%s908_s18 + $0x61] sm:$0xff]  ;;  %v714_v33 = vld [vmem:[%s908_s18 + $0x71] sm:$0xff]  ;;  %v725_v22 = vld [vmem:[%s1006_s3] ss:$0 sm:$0xff] }
  0x19   : > { %v338_v27 = vmax.f32 %v705_v23, %v713_v24  ;;  %v707_v34 = vld [vmem:[%s908_s18 + $0x80] sm:$0xff]  ;;  %v342_v36 = vmax.f32 %v333_v16, %v334_v26  ;;  %v339_v38 = vmax.f32 %v706_v30, %v714_v33  ;;  %763 = vmatprep.mubr.msk.f32.mxu1 %vm362_vm0, %v345_v31  ;;  %v343_v40 = vmax.f32 %v334_v26, %v335_v32 }
  0x1a   : > { %v715_v35 = vld [vmem:[%s908_s18 + $0x81] sm:$0xff]  ;;  %v344_v42 = vmax.f32 %v335_v32, %v329_v19  ;;  %v726_v23 = vld [vmem:[%s1007_s4] ss:$0 sm:$0xff] }
  0x1b   : > { %v346_v37 = vmax.f32 %v337_v21, %v338_v27  ;;  %v340_v39 = vmax.f32 %v707_v34, %v715_v35  ;;  %758 = vmatmul.mubr.msk.f32.vlgmr.msra.gmra.mrb[0].mxu0 %vm362_vm0, %v342_v36  ;;  %v347_v41 = vmax.f32 %v338_v27, %v339_v38  ;;  %v579_v34 = vld [vmem:[%s1008_s5 + $0x8] sm:$0xff] }
  0x1c   : > { %760 = vmatprep.mubr.msk.f32.mxu0 %vm362_vm0, %v343_v40 }
  0x1d   : > { %764 = vmatmul.mubr.msk.f32.vlgmr.msra.gmra.mrb[0].mxu1 %vm362_vm0, %v346_v37  ;;  %v348_v43 = vmax.f32 %v339_v38, %v340_v39 }
  0x1e   : > { %766 = vmatprep.mubr.msk.f32.mxu1 %vm362_vm0, %v347_v41  ;;  %v583_v41 = vld [vmem:[%s1008_s5 + $0x28] sm:$0xff] }
  0x1f   : > { %761 = vmatmul.mubr.msk.f32.gmra.mrb[2].mxu0 %vm362_vm0, %v344_v42 }
  0x21   : > { %767 = vmatmul.mubr.msk.f32.gmra.mrb[2].mxu1 %vm362_vm0, %v348_v43 }
  0xee   : > { %v759_v45 = vpop.f32.mrb[0].mxu0 }
  0xef   : > { %v459_v47 = vadd.f32 %v759_v45, %v716_v44  ;;  %v453_v49 = vpop.f32.mrb[1].mxu0 }
  0xf0   : > { %v765_v46 = vpop.f32.mrb[0].mxu1  ;;  %v454_v51 = vadd.f32 %v716_v44, %v453_v49 }
  0xf1   : > { %v479_v48 = vadd.f32 %v765_v46, %v716_v44  ;;  %v473_v50 = vpop.f32.mrb[1].mxu1  ;;  %493 = vst [vmem:[%s945_s26 + $0x8] sm:$0xff] %v459_v47  ;;  %v502_v53 = vmul.f32 1.442695, %v459_v47  ;;  %v578_v47 = vld [vmem:[%s1008_s5] sm:$0xff] }
  0xf2   : > { %v474_v52 = vadd.f32 %v716_v44, %v473_v50  ;;  %492 = vst [vmem:[%s945_s26] sm:$0xff] %v454_v51  ;;  %v500_v55 = vmul.f32 1.442695, %v454_v51  ;;  %v762_v57 = vpop.f32.mrb[2].mxu0 }
  0xf3   : > { %497 = vst [vmem:[%s945_s26 + $0x28] sm:$0xff] %v479_v48  ;;  %v510_v54 = vmul.f32 1.442695, %v479_v48  ;;  %796 = vpow2.f32 %v502_v53  ;;  %v469_v59 = vadd.f32 %v762_v57, %v716_v44  ;;  %v463_v61 = vpop.f32.mrb[3].mxu0 }
  0xf4   : > { %496 = vst [vmem:[%s945_s26 + $0x20] sm:$0xff] %v474_v52  ;;  %v508_v56 = vmul.f32 1.442695, %v474_v52  ;;  %v768_v58 = vpop.f32.mrb[2].mxu1  ;;  %v464_v63 = vadd.f32 %v716_v44, %v463_v61 }
  0xf5   : > { %v489_v60 = vadd.f32 %v768_v58, %v716_v44  ;;  %v483_v62 = vpop.f32.mrb[3].mxu1  ;;  %798 = vpow2.f32 %v510_v54  ;;  %495 = vst [vmem:[%s945_s26 + $0x18] sm:$0xff] %v469_v59  ;;  %v506_v1 = vmul.f32 1.442695, %v469_v59  ;;  %v582_v54 = vld [vmem:[%s1008_s5 + $0x20] sm:$0xff]  ;;  %v581_v59 = vld [vmem:[%s1008_s5 + $0x18] sm:$0xff] }
  0xf6   : > { %v484_v0 = vadd.f32 %v716_v44, %v483_v62  ;;  %800 = vpow2.f32 %v500_v55  ;;  %494 = vst [vmem:[%s945_s26 + $0x10] sm:$0xff] %v464_v63  ;;  %v504_v3 = vmul.f32 1.442695, %v464_v63 }
  0xf7   : > { %499 = vst [vmem:[%s945_s26 + $0x38] sm:$0xff] %v489_v60  ;;  %v514_v2 = vmul.f32 1.442695, %v489_v60  ;;  %802 = vpow2.f32 %v508_v56 }
  0xf8   : > { %498 = vst [vmem:[%s945_s26 + $0x30] sm:$0xff] %v484_v0  ;;  %v512_v4 = vmul.f32 1.442695, %v484_v0  ;;  %804 = vpow2.f32 %v506_v1  ;;  %v585_v0 = vld [vmem:[%s1008_s5 + $0x38] sm:$0xff] }
  0xf9   : > { %806 = vpow2.f32 %v514_v2 }
  0xfa   : > { %808 = vpow2.f32 %v504_v3 }
  0xfb   : > { %810 = vpow2.f32 %v512_v4 }
  0xfd   : > { %v797_v5 = vpop.eup %796 }
  0xfe   : > { %v517_v7 = vadd.f32 1.0, %v797_v5  ;;  %v563_v30 = vmul.f32 %v797_v5, %v726_v23  ;;  %v580_v5 = vld [vmem:[%s1008_s5 + $0x10] sm:$0xff] }
  0xff   : > { %v799_v6 = vpop.eup %798 }
 0x100   : > { %v801_v8 = vpop.eup %800  ;;  %v521_v9 = vadd.f32 1.0, %v799_v6  ;;  %812 = vrcp.f32 %v517_v7  ;;  %v567_v31 = vmul.f32 %v799_v6, %v726_v23 }
 0x101   : > { %v803_v10 = vpop.eup %802  ;;  %v516_v11 = vadd.f32 1.0, %v801_v8  ;;  %v562_v36 = vmul.f32 %v801_v8, %v726_v23 }
 0x102   : > { %v805_v12 = vpop.eup %804  ;;  %814 = vrcp.f32 %v521_v9  ;;  %v520_v13 = vadd.f32 1.0, %v803_v10  ;;  %v566_v38 = vmul.f32 %v803_v10, %v726_v23  ;;  %v584_v10 = vld [vmem:[%s1008_s5 + $0x30] sm:$0xff] }
 0x103   : > { %v807_v14 = vpop.eup %806  ;;  %816 = vrcp.f32 %v516_v11  ;;  %v519_v15 = vadd.f32 1.0, %v805_v12  ;;  %v565_v44 = vmul.f32 %v805_v12, %v726_v23 }
 0x104   : > { %v809_v16 = vpop.eup %808  ;;  %818 = vrcp.f32 %v520_v13  ;;  %v523_v17 = vadd.f32 1.0, %v807_v14  ;;  %v569_v50 = vmul.f32 %v807_v14, %v726_v23 }
 0x105   : > { %v811_v18 = vpop.eup %810  ;;  %820 = vrcp.f32 %v519_v15  ;;  %v518_v19 = vadd.f32 1.0, %v809_v16  ;;  %v564_v2 = vmul.f32 %v809_v16, %v726_v23 }
 0x106   : > { %822 = vrcp.f32 %v523_v17  ;;  %v522_v20 = vadd.f32 1.0, %v811_v18  ;;  %v568_v7 = vmul.f32 %v811_v18, %v726_v23 }
 0x107   : > { %824 = vrcp.f32 %v518_v19 }
 0x108   : > { %826 = vrcp.f32 %v522_v20 }
 0x10a   : > { %v813_v21 = vpop.eup %812 }
 0x10b   : > { %v533_v25 = vsub.f32 1.0, %v813_v21 }
 0x10c   : > { %v815_v24 = vpop.eup %814 }
 0x10d   : > { %v817_v26 = vpop.eup %816  ;;  %v537_v27 = vsub.f32 1.0, %v815_v24  ;;  %v548_v29 = vmul.f32 %v725_v22, %v533_v25 }
 0x10e   : > { %v819_v28 = vpop.eup %818  ;;  %v532_v32 = vsub.f32 1.0, %v817_v26 }
 0x10f   : > { %v821_v33 = vpop.eup %820  ;;  %v552_v35 = vmul.f32 %v725_v22, %v537_v27  ;;  %v536_v37 = vsub.f32 1.0, %v819_v28  ;;  %v571_v40 = vadd.f32 %v563_v30, %v548_v29 }
 0x110   : > { %v823_v39 = vpop.eup %822  ;;  %v547_v42 = vmul.f32 %v725_v22, %v532_v32  ;;  %v535_v43 = vsub.f32 1.0, %v821_v33 }
 0x111   : > { %v825_v45 = vpop.eup %824  ;;  %v575_v46 = vadd.f32 %v567_v31, %v552_v35  ;;  %v551_v48 = vmul.f32 %v725_v22, %v536_v37  ;;  %v539_v49 = vsub.f32 1.0, %v823_v39  ;;  %v587_v52 = vadd.f32 %v579_v34, %v571_v40 }
 0x112   : > { %v827_v51 = vpop.eup %826  ;;  %v570_v53 = vadd.f32 %v562_v36, %v547_v42  ;;  %v550_v55 = vmul.f32 %v725_v22, %v535_v43  ;;  %v534_v56 = vsub.f32 1.0, %v825_v45 }
 0x113   : > { %v591_v57 = vadd.f32 %v583_v41, %v575_v46  ;;  %v574_v58 = vadd.f32 %v566_v38, %v551_v48  ;;  %v554_v60 = vmul.f32 %v725_v22, %v539_v49  ;;  %v538_v61 = vsub.f32 1.0, %v827_v51  ;;  %595 = vst [vmem:[%s972_s14 + $0x8] sm:$0xff] %v587_v52 }
 0x114   : > { %v586_v62 = vadd.f32 %v578_v47, %v570_v53  ;;  %v573_v63 = vadd.f32 %v565_v44, %v550_v55  ;;  %v549_v1 = vmul.f32 %v725_v22, %v534_v56 }
 0x115   : > { %599 = vst [vmem:[%s972_s14 + $0x28] sm:$0xff] %v591_v57  ;;  %v590_v3 = vadd.f32 %v582_v54, %v574_v58  ;;  %v577_v4 = vadd.f32 %v569_v50, %v554_v60  ;;  %v553_v6 = vmul.f32 %v725_v22, %v538_v61 }
 0x116   : > { %594 = vst [vmem:[%s972_s14] sm:$0xff] %v586_v62  ;;  %v589_v8 = vadd.f32 %v581_v59, %v573_v63  ;;  %v572_v9 = vadd.f32 %v564_v2, %v549_v1 }
 0x117   : > { %598 = vst [vmem:[%s972_s14 + $0x20] sm:$0xff] %v590_v3  ;;  %v593_v11 = vadd.f32 %v585_v0, %v577_v4  ;;  %v576_v12 = vadd.f32 %v568_v7, %v553_v6 }
 0x118   : > { %597 = vst [vmem:[%s972_s14 + $0x18] sm:$0xff] %v589_v8  ;;  %v588_v13 = vadd.f32 %v580_v5, %v572_v9 }
 0x119   : > { %601 = vst [vmem:[%s972_s14 + $0x38] sm:$0xff] %v593_v11  ;;  %v592_v14 = vadd.f32 %v584_v10, %v576_v12 }
 0x11a   : > { %596 = vst [vmem:[%s972_s14 + $0x10] sm:$0xff] %v588_v13 }
 0x11b   : > { %600 = vst [vmem:[%s972_s14 + $0x30] sm:$0xff] %v592_v14 }
 0x11c PF: > { %s18_s24 = sadd.s32 1, %s834_s24  }
 0x11d   : > { %p15_p4 = scmp.ge.s32.totalorder %s18_s24, 4  }
 0x11f   :  { %17 = sbr.rel (!%p15_p4) target bundleno = 1 (0x1), region = 87 }

</bundles_post_ra>
